<compile_context>
chip_gen: v7x
topology: tpu7x:2x2x1
jax: 0.10.0
libtpu: 0.0.40
codegen_flags: <defaults>
</compile_context>

<pallas_src>
import functools

import jax
import jax.numpy as jnp
from jax import lax
from jax.experimental import pallas as pl
from jax.experimental.pallas import tpu as pltpu


# ----------------------------------------------------------------------------
# Pallas kernel: one batch element per grid step, x_ref is the (C, HW) block.
# ----------------------------------------------------------------------------
def _rcam_kernel(x_ref, w1_ref, w2_ref, tap_ref, y_ref, wt_ref, *, H, W, K, CH):
    C, HW = x_ref.shape
    PAD = K // 2
    inv_hw = 1.0 / HW
    inv_c = 1.0 / C

    # ---------- pass 1: channel pooling (streamed) + fused (C,2) MLP ----------
    pm_chunks, pa_chunks = [], []
    for c0 in range(0, C, CH):
        xr = x_ref[c0:c0 + CH, :].astype(jnp.float32)            # (CH, HW)
        pm_chunks.append(jnp.max(xr, axis=1, keepdims=True))      # (CH, 1)
        pa_chunks.append(jnp.sum(xr, axis=1, keepdims=True) * inv_hw)
    pm = jnp.concatenate(pm_chunks, axis=0)                       # (C, 1)
    pa = jnp.concatenate(pa_chunks, axis=0)                       # (C, 1)

    # pack max/avg as two columns (avoid lane-concat: build with iota + where)
    col_id = lax.broadcasted_iota(jnp.int32, (C, 2), 1)
    p = jnp.where(col_id == 0, pm, pa)                            # (C, 2)

    h = jnp.maximum(
        jnp.dot(w1_ref[...], p, preferred_element_type=jnp.float32), 0.0)   # (HID, 2)
    o = jnp.dot(w2_ref[...], h, preferred_element_type=jnp.float32)         # (C, 2)
    ca = jax.nn.sigmoid(jnp.sum(o, axis=1, keepdims=True))                   # (C, 1)

    # ---------- pass 2: spatial pooling with ca folded in (xc never built) ----------
    s_max = jnp.full((1, HW), -jnp.inf, jnp.float32)
    s_sum = jnp.zeros((1, HW), jnp.float32)
    for c0 in range(0, C, CH):
        xc = x_ref[c0:c0 + CH, :].astype(jnp.float32) * ca[c0:c0 + CH, :]
        s_max = jnp.maximum(s_max, jnp.max(xc, axis=0, keepdims=True))
        s_sum = s_sum + jnp.sum(xc, axis=0, keepdims=True)
    s_avg = s_sum * inv_c

    row_id = lax.broadcasted_iota(jnp.int32, (2, HW), 0)
    maps = jnp.where(row_id == 0, s_max, s_avg)                   # (2, HW) packed slab

    # ---------- 7x7 "same" conv: 49 lane-rotates + premultiplied (weight*mask) taps ----
    acc = jnp.zeros((2, HW), jnp.float32)
    for ki in range(K):
        for kj in range(K):
            s = (ki - PAD) * W + (kj - PAD)                       # flat source offset
            idx = ki * K + kj
            shifted = maps if s == 0 else pltpu.roll(maps, shift=(-s) % HW, axis=1)
            acc = acc + tap_ref[idx] * shifted                    # one FMA per tap
    wmap = jax.nn.sigmoid(jnp.sum(acc, axis=0, keepdims=True))    # (1, HW)
    wt_ref[...] = wmap.astype(wt_ref.dtype)
    gate = wmap + 1.0                                             # (1, HW)

    # ---------- pass 3: residual gating, y = x * ca * (1 + wmap), streamed ----------
    for c0 in range(0, C, CH):
        xr = x_ref[c0:c0 + CH, :].astype(jnp.float32)
        y_ref[c0:c0 + CH, :] = ((xr * ca[c0:c0 + CH, :]) * gate).astype(y_ref.dtype)


# ----------------------------------------------------------------------------
# Wrapper: precompute tap-weight*validity-mask constants, pallas_call, reshapes.
# ----------------------------------------------------------------------------
def _build_tap_masks(w_sp, H, W):
    """tap[idx, c, :] = w_sp[0, c, ki, kj] * valid_mask(ki, kj)  for idx = ki*K + kj.

    valid_mask covers both row out-of-bounds and column wrap of the flat cyclic shift,
    so an in-register roll reproduces 'same' zero padding exactly.
    """
    K = w_sp.shape[-1]
    PAD = K // 2
    HW = H * W
    row = jnp.arange(HW, dtype=jnp.int32) // W
    col = jnp.arange(HW, dtype=jnp.int32) % W
    masks = []
    for ki in range(K):
        for kj in range(K):
            di, dj = ki - PAD, kj - PAD
            ok = ((row + di >= 0) & (row + di < H) &
                  (col + dj >= 0) & (col + dj < W))
            masks.append(ok.astype(jnp.float32))
    mask = jnp.stack(masks, axis=0)                               # (K*K, HW)
    wflat = w_sp.reshape(2, K * K).T.astype(jnp.float32)          # (K*K, 2)
    return wflat[:, :, None] * mask[:, None, :]                   # (K*K, 2, HW)


def rcam_pallas(x_nchw, p):
    B, C, H, W = x_nchw.shape
    HID = p["w_mlp1"].shape[0]
    HW = H * W
    K = p["w_sp"].shape[-1]

    CH = 32 if C % 32 == 0 else 8                                 # channel streaming chunk
    assert C % CH == 0, "channel count must be a multiple of the streaming chunk"

    x3 = x_nchw.reshape(B, C, HW)                                 # free reshape, no transpose
    tap = _build_tap_masks(p["w_sp"], H, W)                       # (K*K, 2, HW) ~ 100 KiB

    kernel = functools.partial(_rcam_kernel, H=H, W=W, K=K, CH=CH)

    y3, wt3 = pl.pallas_call(
        kernel,
        out_shape=(jax.ShapeDtypeStruct((B, C, HW), x_nchw.dtype),
                   jax.ShapeDtypeStruct((B, 1, HW), x_nchw.dtype)),
        grid=(B,),
        in_specs=[
            pl.BlockSpec((None, C, HW), lambda b: (b, 0, 0)),     # x (per-batch block)
            pl.BlockSpec((HID, C), lambda b: (0, 0)),             # mlp layer 1
            pl.BlockSpec((C, HID), lambda b: (0, 0)),             # mlp layer 2
            pl.BlockSpec((K * K, 2, HW), lambda b: (0, 0, 0)),    # tap-weight * mask
        ],
        out_specs=(
            pl.BlockSpec((None, C, HW), lambda b: (b, 0, 0)),
            pl.BlockSpec((None, 1, HW), lambda b: (b, 0, 0)),
        ),
        compiler_params=pltpu.CompilerParams(dimension_semantics=("parallel",)),
    )(x3, p["w_mlp1"], p["w_mlp2"], tap)

    return y3.reshape(B, C, H, W), wt3.reshape(B, 1, H, W)


# ----------------------------------------------------------------------------
# Deterministic synthetic parameters (shapes implied by the module __init__).
# The module's MLP is hard-wired to 128 channels, so channel=128, reduction=16.
# ----------------------------------------------------------------------------
def init_params(key, C, reduction=16, spatial_kernel=7):
    HID = max(C // reduction, 1)
    k1, k2, k3 = jax.random.split(key, 3)
    return dict(
        w_mlp1=jax.random.normal(k1, (HID, C), jnp.float32) * (C ** -0.5),   # 1x1 conv
        w_mlp2=jax.random.normal(k2, (C, HID), jnp.float32) * (HID ** -0.5), # 1x1 conv
        w_sp=jax.random.normal(k3, (1, 2, spatial_kernel, spatial_kernel),
                               jnp.float32) * 0.2,                           # 7x7 conv
    )


# ----------------------------------------------------------------------------
# Pure-JAX reference mirroring the PyTorch forward (for correctness check).
# ----------------------------------------------------------------------------
def rcam_ref(x, p):
    K = p["w_sp"].shape[-1]
    PAD = K // 2

    mx = jnp.max(x, axis=(2, 3))                    # (B, C)  AdaptiveMaxPool2d(1)
    av = jnp.mean(x, axis=(2, 3))                   # (B, C)  AdaptiveAvgPool2d(1)

    def mlp(v):                                     # (B, C) -> (B, C)
        h = jnp.maximum(v @ p["w_mlp1"].T, 0.0)
        return h @ p["w_mlp2"].T

    ca = jax.nn.sigmoid(mlp(mx) + mlp(av))[:, :, None, None]
    xc = ca * x
    smax = jnp.max(xc, axis=1, keepdims=True)
    savg = jnp.mean(xc, axis=1, keepdims=True)
    maps = jnp.concatenate([smax, savg], axis=1)    # (B, 2, H, W)
    conv = lax.conv_general_dilated(
        maps, p["w_sp"], (1, 1), ((PAD, PAD), (PAD, PAD)),
        dimension_numbers=("NCHW", "OIHW", "NCHW"))
    wmap = jax.nn.sigmoid(conv)                     # (B, 1, H, W)
    return xc * wmap + xc, wmap


if __name__ == "__main__":
    key = jax.random.PRNGKey(0)
    kx, kp = jax.random.split(key)
    B, C, H, W = 2, 128, 16, 16                     # mlp in the spec is hard-wired to 128 ch

    x = jax.random.normal(kx, (B, C, H, W), jnp.float32)
    params = init_params(kp, C, reduction=16, spatial_kernel=7)

    y, wt = rcam_pallas(x, params)
    jax.block_until_ready((y, wt))

    y_ref, wt_ref = rcam_ref(x, params)
    assert jnp.allclose(wt, wt_ref, atol=1e-5, rtol=1e-4), "weight mismatch"
    assert jnp.allclose(y, y_ref, atol=1e-4, rtol=1e-4), "feature mismatch"

    print("KERNEL_OK")
</pallas_src>

<mosaic_0001>
module attributes {stable_mosaic.version = 11 : i64} {
  func.func @_rcam_kernel(%arg0: i32, %arg1: memref<1x128x256xf32, #tpu.memory_space<vmem>>, %arg2: memref<8x128xf32, #tpu.memory_space<vmem>>, %arg3: memref<128x8xf32, #tpu.memory_space<vmem>>, %arg4: memref<49x2x256xf32, #tpu.memory_space<vmem>>, %arg5: memref<1x128x256xf32, #tpu.memory_space<vmem>>, %arg6: memref<1x1x256xf32, #tpu.memory_space<vmem>>) attributes {dimension_semantics = [#tpu.dimension_semantics<parallel>], iteration_bounds = array<i64: 2>, scalar_prefetch = 0 : i64, scratch_operands = 0 : i64, tpu.core_type = #tpu.core_type<tc>, window_params = [{transform_indices = @transform_0, window_bounds = array<i64: 1, 128, 256>}, {pipeline_mode = #tpu.pipeline_mode<synchronous>, transform_indices = @transform_1, window_bounds = array<i64: 8, 128>}, {pipeline_mode = #tpu.pipeline_mode<synchronous>, transform_indices = @transform_2, window_bounds = array<i64: 128, 8>}, {pipeline_mode = #tpu.pipeline_mode<synchronous>, transform_indices = @transform_3, window_bounds = array<i64: 49, 2, 256>}, {transform_indices = @transform_4, window_bounds = array<i64: 1, 128, 256>}, {transform_indices = @transform_5, window_bounds = array<i64: 1, 1, 256>}]} {
    %c0 = arith.constant 0 : index
    %c0_0 = arith.constant 0 : index
    %c0_1 = arith.constant 0 : index
    %0 = vector.load %arg1[%c0, %c0_0, %c0_1] : memref<1x128x256xf32, #tpu.memory_space<vmem>>, vector<1x32x256xf32>
    %1 = vector.shape_cast %0 : vector<1x32x256xf32> to vector<32x256xf32>
    %cst = arith.constant dense<0xFF800000> : vector<32xf32>
    %2 = vector.multi_reduction <maximumf>, %1, %cst [1] : vector<32x256xf32> to vector<32xf32>
    %3 = vector.shape_cast %2 : vector<32xf32> to vector<32x1xf32>
    %cst_2 = arith.constant dense<0.000000e+00> : vector<32xf32>
    %4 = vector.multi_reduction <add>, %1, %cst_2 [1] : vector<32x256xf32> to vector<32xf32>
    %5 = vector.shape_cast %4 : vector<32xf32> to vector<32x1xf32>
    %cst_3 = arith.constant 3.906250e-03 : f32
    %6 = vector.broadcast %cst_3 : f32 to vector<32x1xf32>
    %7 = arith.mulf %5, %6 : vector<32x1xf32>
    %c0_4 = arith.constant 0 : index
    %c32 = arith.constant 32 : index
    %c0_5 = arith.constant 0 : index
    %8 = vector.load %arg1[%c0_4, %c32, %c0_5] : memref<1x128x256xf32, #tpu.memory_space<vmem>>, vector<1x32x256xf32>
    %9 = vector.shape_cast %8 : vector<1x32x256xf32> to vector<32x256xf32>
    %cst_6 = arith.constant dense<0xFF800000> : vector<32xf32>
    %10 = vector.multi_reduction <maximumf>, %9, %cst_6 [1] : vector<32x256xf32> to vector<32xf32>
    %11 = vector.shape_cast %10 : vector<32xf32> to vector<32x1xf32>
    %cst_7 = arith.constant dense<0.000000e+00> : vector<32xf32>
    %12 = vector.multi_reduction <add>, %9, %cst_7 [1] : vector<32x256xf32> to vector<32xf32>
    %13 = vector.shape_cast %12 : vector<32xf32> to vector<32x1xf32>
    %cst_8 = arith.constant 3.906250e-03 : f32
    %14 = vector.broadcast %cst_8 : f32 to vector<32x1xf32>
    %15 = arith.mulf %13, %14 : vector<32x1xf32>
    %c0_9 = arith.constant 0 : index
    %c64 = arith.constant 64 : index
    %c0_10 = arith.constant 0 : index
    %16 = vector.load %arg1[%c0_9, %c64, %c0_10] : memref<1x128x256xf32, #tpu.memory_space<vmem>>, vector<1x32x256xf32>
    %17 = vector.shape_cast %16 : vector<1x32x256xf32> to vector<32x256xf32>
    %cst_11 = arith.constant dense<0xFF800000> : vector<32xf32>
    %18 = vector.multi_reduction <maximumf>, %17, %cst_11 [1] : vector<32x256xf32> to vector<32xf32>
    %19 = vector.shape_cast %18 : vector<32xf32> to vector<32x1xf32>
    %cst_12 = arith.constant dense<0.000000e+00> : vector<32xf32>
    %20 = vector.multi_reduction <add>, %17, %cst_12 [1] : vector<32x256xf32> to vector<32xf32>
    %21 = vector.shape_cast %20 : vector<32xf32> to vector<32x1xf32>
    %cst_13 = arith.constant 3.906250e-03 : f32
    %22 = vector.broadcast %cst_13 : f32 to vector<32x1xf32>
    %23 = arith.mulf %21, %22 : vector<32x1xf32>
    %c0_14 = arith.constant 0 : index
    %c96 = arith.constant 96 : index
    %c0_15 = arith.constant 0 : index
    %24 = vector.load %arg1[%c0_14, %c96, %c0_15] : memref<1x128x256xf32, #tpu.memory_space<vmem>>, vector<1x32x256xf32>
    %25 = vector.shape_cast %24 : vector<1x32x256xf32> to vector<32x256xf32>
    %cst_16 = arith.constant dense<0xFF800000> : vector<32xf32>
    %26 = vector.multi_reduction <maximumf>, %25, %cst_16 [1] : vector<32x256xf32> to vector<32xf32>
    %27 = vector.shape_cast %26 : vector<32xf32> to vector<32x1xf32>
    %cst_17 = arith.constant dense<0.000000e+00> : vector<32xf32>
    %28 = vector.multi_reduction <add>, %25, %cst_17 [1] : vector<32x256xf32> to vector<32xf32>
    %29 = vector.shape_cast %28 : vector<32xf32> to vector<32x1xf32>
    %cst_18 = arith.constant 3.906250e-03 : f32
    %30 = vector.broadcast %cst_18 : f32 to vector<32x1xf32>
    %31 = arith.mulf %29, %30 : vector<32x1xf32>
    %32 = tpu.concatenate %3, %11, %19, %27 in 0 : vector<32x1xf32>, vector<32x1xf32>, vector<32x1xf32>, vector<32x1xf32> -> vector<128x1xf32>
    %33 = tpu.concatenate %7, %15, %23, %31 in 0 : vector<32x1xf32>, vector<32x1xf32>, vector<32x1xf32>, vector<32x1xf32> -> vector<128x1xf32>
    %34 = tpu.iota {dimensions = array<i32: 1>} : vector<128x2xi32>
    %c0_i32 = arith.constant 0 : i32
    %35 = vector.broadcast %c0_i32 : i32 to vector<128x2xi32>
    %36 = arith.cmpi eq, %34, %35 : vector<128x2xi32>
    %37 = vector.shape_cast %32 : vector<128x1xf32> to vector<128x1xf32>
    %38 = vector.broadcast %37 : vector<128x1xf32> to vector<128x2xf32>
    %39 = vector.shape_cast %33 : vector<128x1xf32> to vector<128x1xf32>
    %40 = vector.broadcast %39 : vector<128x1xf32> to vector<128x2xf32>
    %41 = arith.select %36, %38, %40 : vector<128x2xi1>, vector<128x2xf32>
    %c0_19 = arith.constant 0 : index
    %c0_20 = arith.constant 0 : index
    %42 = vector.load %arg2[%c0_19, %c0_20] : memref<8x128xf32, #tpu.memory_space<vmem>>, vector<8x128xf32>
    %cst_21 = arith.constant dense<0.000000e+00> : vector<8x2xf32>
    %43 = tpu.matmul %42, %41, %cst_21 {dimension_numbers = #tpu.dot_dimension_numbers<[1], [0], [0], [1], [0, 0, 1, 1], [], []>} : vector<8x128xf32>, vector<128x2xf32>, vector<8x2xf32> -> vector<8x2xf32>
    %cst_22 = arith.constant 0.000000e+00 : f32
    %44 = vector.broadcast %cst_22 : f32 to vector<8x2xf32>
    %45 = arith.maximumf %43, %44 : vector<8x2xf32>
    %c0_23 = arith.constant 0 : index
    %c0_24 = arith.constant 0 : index
    %46 = vector.load %arg3[%c0_23, %c0_24] : memref<128x8xf32, #tpu.memory_space<vmem>>, vector<128x8xf32>
    %cst_25 = arith.constant dense<0.000000e+00> : vector<128x2xf32>
    %47 = tpu.matmul %46, %45, %cst_25 {dimension_numbers = #tpu.dot_dimension_numbers<[1], [0], [0], [1], [0, 0, 1, 1], [], []>} : vector<128x8xf32>, vector<8x2xf32>, vector<128x2xf32> -> vector<128x2xf32>
    %cst_26 = arith.constant dense<0.000000e+00> : vector<128xf32>
    %48 = vector.multi_reduction <add>, %47, %cst_26 [1] : vector<128x2xf32> to vector<128xf32>
    %49 = vector.shape_cast %48 : vector<128xf32> to vector<128x1xf32>
    %50 = arith.negf %49 : vector<128x1xf32>
    %51 = math.exp %50 : vector<128x1xf32>
    %cst_27 = arith.constant 1.000000e+00 : f32
    %52 = vector.broadcast %cst_27 : f32 to vector<128x1xf32>
    %53 = arith.addf %52, %51 : vector<128x1xf32>
    %54 = arith.divf %52, %53 : vector<128x1xf32>
    %cst_28 = arith.constant 0xFF800000 : f32
    %55 = vector.broadcast %cst_28 : f32 to vector<1x256xf32>
    %cst_29 = arith.constant 0.000000e+00 : f32
    %56 = vector.broadcast %cst_29 : f32 to vector<1x256xf32>
    %c0_30 = arith.constant 0 : index
    %c0_31 = arith.constant 0 : index
    %c0_32 = arith.constant 0 : index
    %57 = vector.load %arg1[%c0_30, %c0_31, %c0_32] : memref<1x128x256xf32, #tpu.memory_space<vmem>>, vector<1x32x256xf32>
    %58 = vector.shape_cast %57 : vector<1x32x256xf32> to vector<32x256xf32>
    %59 = vector.extract_strided_slice %54 {offsets = [0, 0], sizes = [32, 1], strides = [1, 1]} : vector<128x1xf32> to vector<32x1xf32>
    %60 = vector.broadcast %59 : vector<32x1xf32> to vector<32x256xf32>
    %61 = arith.mulf %58, %60 : vector<32x256xf32>
    %cst_33 = arith.constant dense<0xFF800000> : vector<256xf32>
    %62 = vector.multi_reduction <maximumf>, %61, %cst_33 [0] : vector<32x256xf32> to vector<256xf32>
    %63 = vector.shape_cast %62 : vector<256xf32> to vector<1x256xf32>
    %64 = arith.maximumf %55, %63 : vector<1x256xf32>
    %cst_34 = arith.constant dense<0.000000e+00> : vector<256xf32>
    %65 = vector.multi_reduction <add>, %61, %cst_34 [0] : vector<32x256xf32> to vector<256xf32>
    %66 = vector.shape_cast %65 : vector<256xf32> to vector<1x256xf32>
    %67 = arith.addf %56, %66 : vector<1x256xf32>
    %c0_35 = arith.constant 0 : index
    %c32_36 = arith.constant 32 : index
    %c0_37 = arith.constant 0 : index
    %68 = vector.load %arg1[%c0_35, %c32_36, %c0_37] : memref<1x128x256xf32, #tpu.memory_space<vmem>>, vector<1x32x256xf32>
    %69 = vector.shape_cast %68 : vector<1x32x256xf32> to vector<32x256xf32>
    %70 = vector.extract_strided_slice %54 {offsets = [32, 0], sizes = [32, 1], strides = [1, 1]} : vector<128x1xf32> to vector<32x1xf32>
    %71 = vector.broadcast %70 : vector<32x1xf32> to vector<32x256xf32>
    %72 = arith.mulf %69, %71 : vector<32x256xf32>
    %cst_38 = arith.constant dense<0xFF800000> : vector<256xf32>
    %73 = vector.multi_reduction <maximumf>, %72, %cst_38 [0] : vector<32x256xf32> to vector<256xf32>
    %74 = vector.shape_cast %73 : vector<256xf32> to vector<1x256xf32>
    %75 = arith.maximumf %64, %74 : vector<1x256xf32>
    %cst_39 = arith.constant dense<0.000000e+00> : vector<256xf32>
    %76 = vector.multi_reduction <add>, %72, %cst_39 [0] : vector<32x256xf32> to vector<256xf32>
    %77 = vector.shape_cast %76 : vector<256xf32> to vector<1x256xf32>
    %78 = arith.addf %67, %77 : vector<1x256xf32>
    %c0_40 = arith.constant 0 : index
    %c64_41 = arith.constant 64 : index
    %c0_42 = arith.constant 0 : index
    %79 = vector.load %arg1[%c0_40, %c64_41, %c0_42] : memref<1x128x256xf32, #tpu.memory_space<vmem>>, vector<1x32x256xf32>
    %80 = vector.shape_cast %79 : vector<1x32x256xf32> to vector<32x256xf32>
    %81 = vector.extract_strided_slice %54 {offsets = [64, 0], sizes = [32, 1], strides = [1, 1]} : vector<128x1xf32> to vector<32x1xf32>
    %82 = vector.broadcast %81 : vector<32x1xf32> to vector<32x256xf32>
    %83 = arith.mulf %80, %82 : vector<32x256xf32>
    %cst_43 = arith.constant dense<0xFF800000> : vector<256xf32>
    %84 = vector.multi_reduction <maximumf>, %83, %cst_43 [0] : vector<32x256xf32> to vector<256xf32>
    %85 = vector.shape_cast %84 : vector<256xf32> to vector<1x256xf32>
    %86 = arith.maximumf %75, %85 : vector<1x256xf32>
    %cst_44 = arith.constant dense<0.000000e+00> : vector<256xf32>
    %87 = vector.multi_reduction <add>, %83, %cst_44 [0] : vector<32x256xf32> to vector<256xf32>
    %88 = vector.shape_cast %87 : vector<256xf32> to vector<1x256xf32>
    %89 = arith.addf %78, %88 : vector<1x256xf32>
    %c0_45 = arith.constant 0 : index
    %c96_46 = arith.constant 96 : index
    %c0_47 = arith.constant 0 : index
    %90 = vector.load %arg1[%c0_45, %c96_46, %c0_47] : memref<1x128x256xf32, #tpu.memory_space<vmem>>, vector<1x32x256xf32>
    %91 = vector.shape_cast %90 : vector<1x32x256xf32> to vector<32x256xf32>
    %92 = vector.extract_strided_slice %54 {offsets = [96, 0], sizes = [32, 1], strides = [1, 1]} : vector<128x1xf32> to vector<32x1xf32>
    %93 = vector.broadcast %92 : vector<32x1xf32> to vector<32x256xf32>
    %94 = arith.mulf %91, %93 : vector<32x256xf32>
    %cst_48 = arith.constant dense<0xFF800000> : vector<256xf32>
    %95 = vector.multi_reduction <maximumf>, %94, %cst_48 [0] : vector<32x256xf32> to vector<256xf32>
    %96 = vector.shape_cast %95 : vector<256xf32> to vector<1x256xf32>
    %97 = arith.maximumf %86, %96 : vector<1x256xf32>
    %cst_49 = arith.constant dense<0.000000e+00> : vector<256xf32>
    %98 = vector.multi_reduction <add>, %94, %cst_49 [0] : vector<32x256xf32> to vector<256xf32>
    %99 = vector.shape_cast %98 : vector<256xf32> to vector<1x256xf32>
    %100 = arith.addf %89, %99 : vector<1x256xf32>
    %cst_50 = arith.constant 7.812500e-03 : f32
    %101 = vector.broadcast %cst_50 : f32 to vector<1x256xf32>
    %102 = arith.mulf %100, %101 : vector<1x256xf32>
    %103 = tpu.iota {dimensions = array<i32: 0>} : vector<2x256xi32>
    %c0_i32_51 = arith.constant 0 : i32
    %104 = vector.broadcast %c0_i32_51 : i32 to vector<2x256xi32>
    %105 = arith.cmpi eq, %103, %104 : vector<2x256xi32>
    %106 = vector.shape_cast %97 : vector<1x256xf32> to vector<1x256xf32>
    %107 = vector.broadcast %106 : vector<1x256xf32> to vector<2x256xf32>
    %108 = vector.shape_cast %102 : vector<1x256xf32> to vector<1x256xf32>
    %109 = vector.broadcast %108 : vector<1x256xf32> to vector<2x256xf32>
    %110 = arith.select %105, %107, %109 : vector<2x256xi1>, vector<2x256xf32>
    %cst_52 = arith.constant 0.000000e+00 : f32
    %111 = vector.broadcast %cst_52 : f32 to vector<2x256xf32>
    %c51_i32 = arith.constant 51 : i32
    %112 = tpu.dynamic_rotate %110 by %c51_i32 dim 1 : vector<2x256xf32>, i32 -> vector<2x256xf32>
    %c0_53 = arith.constant 0 : index
    %c0_54 = arith.constant 0 : index
    %c0_55 = arith.constant 0 : index
    %113 = vector.load %arg4[%c0_53, %c0_54, %c0_55] : memref<49x2x256xf32, #tpu.memory_space<vmem>>, vector<1x2x256xf32>
    %114 = vector.shape_cast %113 : vector<1x2x256xf32> to vector<2x256xf32>
    %115 = arith.mulf %114, %112 : vector<2x256xf32>
    %116 = arith.addf %111, %115 : vector<2x256xf32>
    %c50_i32 = arith.constant 50 : i32
    %117 = tpu.dynamic_rotate %110 by %c50_i32 dim 1 : vector<2x256xf32>, i32 -> vector<2x256xf32>
    %c1 = arith.constant 1 : index
    %c0_56 = arith.constant 0 : index
    %c0_57 = arith.constant 0 : index
    %118 = vector.load %arg4[%c1, %c0_56, %c0_57] : memref<49x2x256xf32, #tpu.memory_space<vmem>>, vector<1x2x256xf32>
    %119 = vector.shape_cast %118 : vector<1x2x256xf32> to vector<2x256xf32>
    %120 = arith.mulf %119, %117 : vector<2x256xf32>
    %121 = arith.addf %116, %120 : vector<2x256xf32>
    %c49_i32 = arith.constant 49 : i32
    %122 = tpu.dynamic_rotate %110 by %c49_i32 dim 1 : vector<2x256xf32>, i32 -> vector<2x256xf32>
    %c2 = arith.constant 2 : index
    %c0_58 = arith.constant 0 : index
    %c0_59 = arith.constant 0 : index
    %123 = vector.load %arg4[%c2, %c0_58, %c0_59] : memref<49x2x256xf32, #tpu.memory_space<vmem>>, vector<1x2x256xf32>
    %124 = vector.shape_cast %123 : vector<1x2x256xf32> to vector<2x256xf32>
    %125 = arith.mulf %124, %122 : vector<2x256xf32>
    %126 = arith.addf %121, %125 : vector<2x256xf32>
    %c48_i32 = arith.constant 48 : i32
    %127 = tpu.dynamic_rotate %110 by %c48_i32 dim 1 : vector<2x256xf32>, i32 -> vector<2x256xf32>
    %c3 = arith.constant 3 : index
    %c0_60 = arith.constant 0 : index
    %c0_61 = arith.constant 0 : index
    %128 = vector.load %arg4[%c3, %c0_60, %c0_61] : memref<49x2x256xf32, #tpu.memory_space<vmem>>, vector<1x2x256xf32>
    %129 = vector.shape_cast %128 : vector<1x2x256xf32> to vector<2x256xf32>
    %130 = arith.mulf %129, %127 : vector<2x256xf32>
    %131 = arith.addf %126, %130 : vector<2x256xf32>
    %c47_i32 = arith.constant 47 : i32
    %132 = tpu.dynamic_rotate %110 by %c47_i32 dim 1 : vector<2x256xf32>, i32 -> vector<2x256xf32>
    %c4 = arith.constant 4 : index
    %c0_62 = arith.constant 0 : index
    %c0_63 = arith.constant 0 : index
    %133 = vector.load %arg4[%c4, %c0_62, %c0_63] : memref<49x2x256xf32, #tpu.memory_space<vmem>>, vector<1x2x256xf32>
    %134 = vector.shape_cast %133 : vector<1x2x256xf32> to vector<2x256xf32>
    %135 = arith.mulf %134, %132 : vector<2x256xf32>
    %136 = arith.addf %131, %135 : vector<2x256xf32>
    %c46_i32 = arith.constant 46 : i32
    %137 = tpu.dynamic_rotate %110 by %c46_i32 dim 1 : vector<2x256xf32>, i32 -> vector<2x256xf32>
    %c5 = arith.constant 5 : index
    %c0_64 = arith.constant 0 : index
    %c0_65 = arith.constant 0 : index
    %138 = vector.load %arg4[%c5, %c0_64, %c0_65] : memref<49x2x256xf32, #tpu.memory_space<vmem>>, vector<1x2x256xf32>
    %139 = vector.shape_cast %138 : vector<1x2x256xf32> to vector<2x256xf32>
    %140 = arith.mulf %139, %137 : vector<2x256xf32>
    %141 = arith.addf %136, %140 : vector<2x256xf32>
    %c45_i32 = arith.constant 45 : i32
    %142 = tpu.dynamic_rotate %110 by %c45_i32 dim 1 : vector<2x256xf32>, i32 -> vector<2x256xf32>
    %c6 = arith.constant 6 : index
    %c0_66 = arith.constant 0 : index
    %c0_67 = arith.constant 0 : index
    %143 = vector.load %arg4[%c6, %c0_66, %c0_67] : memref<49x2x256xf32, #tpu.memory_space<vmem>>, vector<1x2x256xf32>
    %144 = vector.shape_cast %143 : vector<1x2x256xf32> to vector<2x256xf32>
    %145 = arith.mulf %144, %142 : vector<2x256xf32>
    %146 = arith.addf %141, %145 : vector<2x256xf32>
    %c35_i32 = arith.constant 35 : i32
    %147 = tpu.dynamic_rotate %110 by %c35_i32 dim 1 : vector<2x256xf32>, i32 -> vector<2x256xf32>
    %c7 = arith.constant 7 : index
    %c0_68 = arith.constant 0 : index
    %c0_69 = arith.constant 0 : index
    %148 = vector.load %arg4[%c7, %c0_68, %c0_69] : memref<49x2x256xf32, #tpu.memory_space<vmem>>, vector<1x2x256xf32>
    %149 = vector.shape_cast %148 : vector<1x2x256xf32> to vector<2x256xf32>
    %150 = arith.mulf %149, %147 : vector<2x256xf32>
    %151 = arith.addf %146, %150 : vector<2x256xf32>
    %c34_i32 = arith.constant 34 : i32
    %152 = tpu.dynamic_rotate %110 by %c34_i32 dim 1 : vector<2x256xf32>, i32 -> vector<2x256xf32>
    %c8 = arith.constant 8 : index
    %c0_70 = arith.constant 0 : index
    %c0_71 = arith.constant 0 : index
    %153 = vector.load %arg4[%c8, %c0_70, %c0_71] : memref<49x2x256xf32, #tpu.memory_space<vmem>>, vector<1x2x256xf32>
    %154 = vector.shape_cast %153 : vector<1x2x256xf32> to vector<2x256xf32>
    %155 = arith.mulf %154, %152 : vector<2x256xf32>
    %156 = arith.addf %151, %155 : vector<2x256xf32>
    %c33_i32 = arith.constant 33 : i32
    %157 = tpu.dynamic_rotate %110 by %c33_i32 dim 1 : vector<2x256xf32>, i32 -> vector<2x256xf32>
    %c9 = arith.constant 9 : index
    %c0_72 = arith.constant 0 : index
    %c0_73 = arith.constant 0 : index
    %158 = vector.load %arg4[%c9, %c0_72, %c0_73] : memref<49x2x256xf32, #tpu.memory_space<vmem>>, vector<1x2x256xf32>
    %159 = vector.shape_cast %158 : vector<1x2x256xf32> to vector<2x256xf32>
    %160 = arith.mulf %159, %157 : vector<2x256xf32>
    %161 = arith.addf %156, %160 : vector<2x256xf32>
    %c32_i32 = arith.constant 32 : i32
    %162 = tpu.dynamic_rotate %110 by %c32_i32 dim 1 : vector<2x256xf32>, i32 -> vector<2x256xf32>
    %c10 = arith.constant 10 : index
    %c0_74 = arith.constant 0 : index
    %c0_75 = arith.constant 0 : index
    %163 = vector.load %arg4[%c10, %c0_74, %c0_75] : memref<49x2x256xf32, #tpu.memory_space<vmem>>, vector<1x2x256xf32>
    %164 = vector.shape_cast %163 : vector<1x2x256xf32> to vector<2x256xf32>
    %165 = arith.mulf %164, %162 : vector<2x256xf32>
    %166 = arith.addf %161, %165 : vector<2x256xf32>
    %c31_i32 = arith.constant 31 : i32
    %167 = tpu.dynamic_rotate %110 by %c31_i32 dim 1 : vector<2x256xf32>, i32 -> vector<2x256xf32>
    %c11 = arith.constant 11 : index
    %c0_76 = arith.constant 0 : index
    %c0_77 = arith.constant 0 : index
    %168 = vector.load %arg4[%c11, %c0_76, %c0_77] : memref<49x2x256xf32, #tpu.memory_space<vmem>>, vector<1x2x256xf32>
    %169 = vector.shape_cast %168 : vector<1x2x256xf32> to vector<2x256xf32>
    %170 = arith.mulf %169, %167 : vector<2x256xf32>
    %171 = arith.addf %166, %170 : vector<2x256xf32>
    %c30_i32 = arith.constant 30 : i32
    %172 = tpu.dynamic_rotate %110 by %c30_i32 dim 1 : vector<2x256xf32>, i32 -> vector<2x256xf32>
    %c12 = arith.constant 12 : index
    %c0_78 = arith.constant 0 : index
    %c0_79 = arith.constant 0 : index
    %173 = vector.load %arg4[%c12, %c0_78, %c0_79] : memref<49x2x256xf32, #tpu.memory_space<vmem>>, vector<1x2x256xf32>
    %174 = vector.shape_cast %173 : vector<1x2x256xf32> to vector<2x256xf32>
    %175 = arith.mulf %174, %172 : vector<2x256xf32>
    %176 = arith.addf %171, %175 : vector<2x256xf32>
    %c29_i32 = arith.constant 29 : i32
    %177 = tpu.dynamic_rotate %110 by %c29_i32 dim 1 : vector<2x256xf32>, i32 -> vector<2x256xf32>
    %c13 = arith.constant 13 : index
    %c0_80 = arith.constant 0 : index
    %c0_81 = arith.constant 0 : index
    %178 = vector.load %arg4[%c13, %c0_80, %c0_81] : memref<49x2x256xf32, #tpu.memory_space<vmem>>, vector<1x2x256xf32>
    %179 = vector.shape_cast %178 : vector<1x2x256xf32> to vector<2x256xf32>
    %180 = arith.mulf %179, %177 : vector<2x256xf32>
    %181 = arith.addf %176, %180 : vector<2x256xf32>
    %c19_i32 = arith.constant 19 : i32
    %182 = tpu.dynamic_rotate %110 by %c19_i32 dim 1 : vector<2x256xf32>, i32 -> vector<2x256xf32>
    %c14 = arith.constant 14 : index
    %c0_82 = arith.constant 0 : index
    %c0_83 = arith.constant 0 : index
    %183 = vector.load %arg4[%c14, %c0_82, %c0_83] : memref<49x2x256xf32, #tpu.memory_space<vmem>>, vector<1x2x256xf32>
    %184 = vector.shape_cast %183 : vector<1x2x256xf32> to vector<2x256xf32>
    %185 = arith.mulf %184, %182 : vector<2x256xf32>
    %186 = arith.addf %181, %185 : vector<2x256xf32>
    %c18_i32 = arith.constant 18 : i32
    %187 = tpu.dynamic_rotate %110 by %c18_i32 dim 1 : vector<2x256xf32>, i32 -> vector<2x256xf32>
    %c15 = arith.constant 15 : index
    %c0_84 = arith.constant 0 : index
    %c0_85 = arith.constant 0 : index
    %188 = vector.load %arg4[%c15, %c0_84, %c0_85] : memref<49x2x256xf32, #tpu.memory_space<vmem>>, vector<1x2x256xf32>
    %189 = vector.shape_cast %188 : vector<1x2x256xf32> to vector<2x256xf32>
    %190 = arith.mulf %189, %187 : vector<2x256xf32>
    %191 = arith.addf %186, %190 : vector<2x256xf32>
    %c17_i32 = arith.constant 17 : i32
    %192 = tpu.dynamic_rotate %110 by %c17_i32 dim 1 : vector<2x256xf32>, i32 -> vector<2x256xf32>
    %c16 = arith.constant 16 : index
    %c0_86 = arith.constant 0 : index
    %c0_87 = arith.constant 0 : index
    %193 = vector.load %arg4[%c16, %c0_86, %c0_87] : memref<49x2x256xf32, #tpu.memory_space<vmem>>, vector<1x2x256xf32>
    %194 = vector.shape_cast %193 : vector<1x2x256xf32> to vector<2x256xf32>
    %195 = arith.mulf %194, %192 : vector<2x256xf32>
    %196 = arith.addf %191, %195 : vector<2x256xf32>
    %c16_i32 = arith.constant 16 : i32
    %197 = tpu.dynamic_rotate %110 by %c16_i32 dim 1 : vector<2x256xf32>, i32 -> vector<2x256xf32>
    %c17 = arith.constant 17 : index
    %c0_88 = arith.constant 0 : index
    %c0_89 = arith.constant 0 : index
    %198 = vector.load %arg4[%c17, %c0_88, %c0_89] : memref<49x2x256xf32, #tpu.memory_space<vmem>>, vector<1x2x256xf32>
    %199 = vector.shape_cast %198 : vector<1x2x256xf32> to vector<2x256xf32>
    %200 = arith.mulf %199, %197 : vector<2x256xf32>
    %201 = arith.addf %196, %200 : vector<2x256xf32>
    %c15_i32 = arith.constant 15 : i32
    %202 = tpu.dynamic_rotate %110 by %c15_i32 dim 1 : vector<2x256xf32>, i32 -> vector<2x256xf32>
    %c18 = arith.constant 18 : index
    %c0_90 = arith.constant 0 : index
    %c0_91 = arith.constant 0 : index
    %203 = vector.load %arg4[%c18, %c0_90, %c0_91] : memref<49x2x256xf32, #tpu.memory_space<vmem>>, vector<1x2x256xf32>
    %204 = vector.shape_cast %203 : vector<1x2x256xf32> to vector<2x256xf32>
    %205 = arith.mulf %204, %202 : vector<2x256xf32>
    %206 = arith.addf %201, %205 : vector<2x256xf32>
    %c14_i32 = arith.constant 14 : i32
    %207 = tpu.dynamic_rotate %110 by %c14_i32 dim 1 : vector<2x256xf32>, i32 -> vector<2x256xf32>
    %c19 = arith.constant 19 : index
    %c0_92 = arith.constant 0 : index
    %c0_93 = arith.constant 0 : index
    %208 = vector.load %arg4[%c19, %c0_92, %c0_93] : memref<49x2x256xf32, #tpu.memory_space<vmem>>, vector<1x2x256xf32>
    %209 = vector.shape_cast %208 : vector<1x2x256xf32> to vector<2x256xf32>
    %210 = arith.mulf %209, %207 : vector<2x256xf32>
    %211 = arith.addf %206, %210 : vector<2x256xf32>
    %c13_i32 = arith.constant 13 : i32
    %212 = tpu.dynamic_rotate %110 by %c13_i32 dim 1 : vector<2x256xf32>, i32 -> vector<2x256xf32>
    %c20 = arith.constant 20 : index
    %c0_94 = arith.constant 0 : index
    %c0_95 = arith.constant 0 : index
    %213 = vector.load %arg4[%c20, %c0_94, %c0_95] : memref<49x2x256xf32, #tpu.memory_space<vmem>>, vector<1x2x256xf32>
    %214 = vector.shape_cast %213 : vector<1x2x256xf32> to vector<2x256xf32>
    %215 = arith.mulf %214, %212 : vector<2x256xf32>
    %216 = arith.addf %211, %215 : vector<2x256xf32>
    %c3_i32 = arith.constant 3 : i32
    %217 = tpu.dynamic_rotate %110 by %c3_i32 dim 1 : vector<2x256xf32>, i32 -> vector<2x256xf32>
    %c21 = arith.constant 21 : index
    %c0_96 = arith.constant 0 : index
    %c0_97 = arith.constant 0 : index
    %218 = vector.load %arg4[%c21, %c0_96, %c0_97] : memref<49x2x256xf32, #tpu.memory_space<vmem>>, vector<1x2x256xf32>
    %219 = vector.shape_cast %218 : vector<1x2x256xf32> to vector<2x256xf32>
    %220 = arith.mulf %219, %217 : vector<2x256xf32>
    %221 = arith.addf %216, %220 : vector<2x256xf32>
    %c2_i32 = arith.constant 2 : i32
    %222 = tpu.dynamic_rotate %110 by %c2_i32 dim 1 : vector<2x256xf32>, i32 -> vector<2x256xf32>
    %c22 = arith.constant 22 : index
    %c0_98 = arith.constant 0 : index
    %c0_99 = arith.constant 0 : index
    %223 = vector.load %arg4[%c22, %c0_98, %c0_99] : memref<49x2x256xf32, #tpu.memory_space<vmem>>, vector<1x2x256xf32>
    %224 = vector.shape_cast %223 : vector<1x2x256xf32> to vector<2x256xf32>
    %225 = arith.mulf %224, %222 : vector<2x256xf32>
    %226 = arith.addf %221, %225 : vector<2x256xf32>
    %c1_i32 = arith.constant 1 : i32
    %227 = tpu.dynamic_rotate %110 by %c1_i32 dim 1 : vector<2x256xf32>, i32 -> vector<2x256xf32>
    %c23 = arith.constant 23 : index
    %c0_100 = arith.constant 0 : index
    %c0_101 = arith.constant 0 : index
    %228 = vector.load %arg4[%c23, %c0_100, %c0_101] : memref<49x2x256xf32, #tpu.memory_space<vmem>>, vector<1x2x256xf32>
    %229 = vector.shape_cast %228 : vector<1x2x256xf32> to vector<2x256xf32>
    %230 = arith.mulf %229, %227 : vector<2x256xf32>
    %231 = arith.addf %226, %230 : vector<2x256xf32>
    %c24 = arith.constant 24 : index
    %c0_102 = arith.constant 0 : index
    %c0_103 = arith.constant 0 : index
    %232 = vector.load %arg4[%c24, %c0_102, %c0_103] : memref<49x2x256xf32, #tpu.memory_space<vmem>>, vector<1x2x256xf32>
    %233 = vector.shape_cast %232 : vector<1x2x256xf32> to vector<2x256xf32>
    %234 = arith.mulf %233, %110 : vector<2x256xf32>
    %235 = arith.addf %231, %234 : vector<2x256xf32>
    %c255_i32 = arith.constant 255 : i32
    %236 = tpu.dynamic_rotate %110 by %c255_i32 dim 1 : vector<2x256xf32>, i32 -> vector<2x256xf32>
    %c25 = arith.constant 25 : index
    %c0_104 = arith.constant 0 : index
    %c0_105 = arith.constant 0 : index
    %237 = vector.load %arg4[%c25, %c0_104, %c0_105] : memref<49x2x256xf32, #tpu.memory_space<vmem>>, vector<1x2x256xf32>
    %238 = vector.shape_cast %237 : vector<1x2x256xf32> to vector<2x256xf32>
    %239 = arith.mulf %238, %236 : vector<2x256xf32>
    %240 = arith.addf %235, %239 : vector<2x256xf32>
    %c254_i32 = arith.constant 254 : i32
    %241 = tpu.dynamic_rotate %110 by %c254_i32 dim 1 : vector<2x256xf32>, i32 -> vector<2x256xf32>
    %c26 = arith.constant 26 : index
    %c0_106 = arith.constant 0 : index
    %c0_107 = arith.constant 0 : index
    %242 = vector.load %arg4[%c26, %c0_106, %c0_107] : memref<49x2x256xf32, #tpu.memory_space<vmem>>, vector<1x2x256xf32>
    %243 = vector.shape_cast %242 : vector<1x2x256xf32> to vector<2x256xf32>
    %244 = arith.mulf %243, %241 : vector<2x256xf32>
    %245 = arith.addf %240, %244 : vector<2x256xf32>
    %c253_i32 = arith.constant 253 : i32
    %246 = tpu.dynamic_rotate %110 by %c253_i32 dim 1 : vector<2x256xf32>, i32 -> vector<2x256xf32>
    %c27 = arith.constant 27 : index
    %c0_108 = arith.constant 0 : index
    %c0_109 = arith.constant 0 : index
    %247 = vector.load %arg4[%c27, %c0_108, %c0_109] : memref<49x2x256xf32, #tpu.memory_space<vmem>>, vector<1x2x256xf32>
    %248 = vector.shape_cast %247 : vector<1x2x256xf32> to vector<2x256xf32>
    %249 = arith.mulf %248, %246 : vector<2x256xf32>
    %250 = arith.addf %245, %249 : vector<2x256xf32>
    %c243_i32 = arith.constant 243 : i32
    %251 = tpu.dynamic_rotate %110 by %c243_i32 dim 1 : vector<2x256xf32>, i32 -> vector<2x256xf32>
    %c28 = arith.constant 28 : index
    %c0_110 = arith.constant 0 : index
    %c0_111 = arith.constant 0 : index
    %252 = vector.load %arg4[%c28, %c0_110, %c0_111] : memref<49x2x256xf32, #tpu.memory_space<vmem>>, vector<1x2x256xf32>
    %253 = vector.shape_cast %252 : vector<1x2x256xf32> to vector<2x256xf32>
    %254 = arith.mulf %253, %251 : vector<2x256xf32>
    %255 = arith.addf %250, %254 : vector<2x256xf32>
    %c242_i32 = arith.constant 242 : i32
    %256 = tpu.dynamic_rotate %110 by %c242_i32 dim 1 : vector<2x256xf32>, i32 -> vector<2x256xf32>
    %c29 = arith.constant 29 : index
    %c0_112 = arith.constant 0 : index
    %c0_113 = arith.constant 0 : index
    %257 = vector.load %arg4[%c29, %c0_112, %c0_113] : memref<49x2x256xf32, #tpu.memory_space<vmem>>, vector<1x2x256xf32>
    %258 = vector.shape_cast %257 : vector<1x2x256xf32> to vector<2x256xf32>
    %259 = arith.mulf %258, %256 : vector<2x256xf32>
    %260 = arith.addf %255, %259 : vector<2x256xf32>
    %c241_i32 = arith.constant 241 : i32
    %261 = tpu.dynamic_rotate %110 by %c241_i32 dim 1 : vector<2x256xf32>, i32 -> vector<2x256xf32>
    %c30 = arith.constant 30 : index
    %c0_114 = arith.constant 0 : index
    %c0_115 = arith.constant 0 : index
    %262 = vector.load %arg4[%c30, %c0_114, %c0_115] : memref<49x2x256xf32, #tpu.memory_space<vmem>>, vector<1x2x256xf32>
    %263 = vector.shape_cast %262 : vector<1x2x256xf32> to vector<2x256xf32>
    %264 = arith.mulf %263, %261 : vector<2x256xf32>
    %265 = arith.addf %260, %264 : vector<2x256xf32>
    %c240_i32 = arith.constant 240 : i32
    %266 = tpu.dynamic_rotate %110 by %c240_i32 dim 1 : vector<2x256xf32>, i32 -> vector<2x256xf32>
    %c31 = arith.constant 31 : index
    %c0_116 = arith.constant 0 : index
    %c0_117 = arith.constant 0 : index
    %267 = vector.load %arg4[%c31, %c0_116, %c0_117] : memref<49x2x256xf32, #tpu.memory_space<vmem>>, vector<1x2x256xf32>
    %268 = vector.shape_cast %267 : vector<1x2x256xf32> to vector<2x256xf32>
    %269 = arith.mulf %268, %266 : vector<2x256xf32>
    %270 = arith.addf %265, %269 : vector<2x256xf32>
    %c239_i32 = arith.constant 239 : i32
    %271 = tpu.dynamic_rotate %110 by %c239_i32 dim 1 : vector<2x256xf32>, i32 -> vector<2x256xf32>
    %c32_118 = arith.constant 32 : index
    %c0_119 = arith.constant 0 : index
    %c0_120 = arith.constant 0 : index
    %272 = vector.load %arg4[%c32_118, %c0_119, %c0_120] : memref<49x2x256xf32, #tpu.memory_space<vmem>>, vector<1x2x256xf32>
    %273 = vector.shape_cast %272 : vector<1x2x256xf32> to vector<2x256xf32>
    %274 = arith.mulf %273, %271 : vector<2x256xf32>
    %275 = arith.addf %270, %274 : vector<2x256xf32>
    %c238_i32 = arith.constant 238 : i32
    %276 = tpu.dynamic_rotate %110 by %c238_i32 dim 1 : vector<2x256xf32>, i32 -> vector<2x256xf32>
    %c33 = arith.constant 33 : index
    %c0_121 = arith.constant 0 : index
    %c0_122 = arith.constant 0 : index
    %277 = vector.load %arg4[%c33, %c0_121, %c0_122] : memref<49x2x256xf32, #tpu.memory_space<vmem>>, vector<1x2x256xf32>
    %278 = vector.shape_cast %277 : vector<1x2x256xf32> to vector<2x256xf32>
    %279 = arith.mulf %278, %276 : vector<2x256xf32>
    %280 = arith.addf %275, %279 : vector<2x256xf32>
    %c237_i32 = arith.constant 237 : i32
    %281 = tpu.dynamic_rotate %110 by %c237_i32 dim 1 : vector<2x256xf32>, i32 -> vector<2x256xf32>
    %c34 = arith.constant 34 : index
    %c0_123 = arith.constant 0 : index
    %c0_124 = arith.constant 0 : index
    %282 = vector.load %arg4[%c34, %c0_123, %c0_124] : memref<49x2x256xf32, #tpu.memory_space<vmem>>, vector<1x2x256xf32>
    %283 = vector.shape_cast %282 : vector<1x2x256xf32> to vector<2x256xf32>
    %284 = arith.mulf %283, %281 : vector<2x256xf32>
    %285 = arith.addf %280, %284 : vector<2x256xf32>
    %c227_i32 = arith.constant 227 : i32
    %286 = tpu.dynamic_rotate %110 by %c227_i32 dim 1 : vector<2x256xf32>, i32 -> vector<2x256xf32>
    %c35 = arith.constant 35 : index
    %c0_125 = arith.constant 0 : index
    %c0_126 = arith.constant 0 : index
    %287 = vector.load %arg4[%c35, %c0_125, %c0_126] : memref<49x2x256xf32, #tpu.memory_space<vmem>>, vector<1x2x256xf32>
    %288 = vector.shape_cast %287 : vector<1x2x256xf32> to vector<2x256xf32>
    %289 = arith.mulf %288, %286 : vector<2x256xf32>
    %290 = arith.addf %285, %289 : vector<2x256xf32>
    %c226_i32 = arith.constant 226 : i32
    %291 = tpu.dynamic_rotate %110 by %c226_i32 dim 1 : vector<2x256xf32>, i32 -> vector<2x256xf32>
    %c36 = arith.constant 36 : index
    %c0_127 = arith.constant 0 : index
    %c0_128 = arith.constant 0 : index
    %292 = vector.load %arg4[%c36, %c0_127, %c0_128] : memref<49x2x256xf32, #tpu.memory_space<vmem>>, vector<1x2x256xf32>
    %293 = vector.shape_cast %292 : vector<1x2x256xf32> to vector<2x256xf32>
    %294 = arith.mulf %293, %291 : vector<2x256xf32>
    %295 = arith.addf %290, %294 : vector<2x256xf32>
    %c225_i32 = arith.constant 225 : i32
    %296 = tpu.dynamic_rotate %110 by %c225_i32 dim 1 : vector<2x256xf32>, i32 -> vector<2x256xf32>
    %c37 = arith.constant 37 : index
    %c0_129 = arith.constant 0 : index
    %c0_130 = arith.constant 0 : index
    %297 = vector.load %arg4[%c37, %c0_129, %c0_130] : memref<49x2x256xf32, #tpu.memory_space<vmem>>, vector<1x2x256xf32>
    %298 = vector.shape_cast %297 : vector<1x2x256xf32> to vector<2x256xf32>
    %299 = arith.mulf %298, %296 : vector<2x256xf32>
    %300 = arith.addf %295, %299 : vector<2x256xf32>
    %c224_i32 = arith.constant 224 : i32
    %301 = tpu.dynamic_rotate %110 by %c224_i32 dim 1 : vector<2x256xf32>, i32 -> vector<2x256xf32>
    %c38 = arith.constant 38 : index
    %c0_131 = arith.constant 0 : index
    %c0_132 = arith.constant 0 : index
    %302 = vector.load %arg4[%c38, %c0_131, %c0_132] : memref<49x2x256xf32, #tpu.memory_space<vmem>>, vector<1x2x256xf32>
    %303 = vector.shape_cast %302 : vector<1x2x256xf32> to vector<2x256xf32>
    %304 = arith.mulf %303, %301 : vector<2x256xf32>
    %305 = arith.addf %300, %304 : vector<2x256xf32>
    %c223_i32 = arith.constant 223 : i32
    %306 = tpu.dynamic_rotate %110 by %c223_i32 dim 1 : vector<2x256xf32>, i32 -> vector<2x256xf32>
    %c39 = arith.constant 39 : index
    %c0_133 = arith.constant 0 : index
    %c0_134 = arith.constant 0 : index
    %307 = vector.load %arg4[%c39, %c0_133, %c0_134] : memref<49x2x256xf32, #tpu.memory_space<vmem>>, vector<1x2x256xf32>
    %308 = vector.shape_cast %307 : vector<1x2x256xf32> to vector<2x256xf32>
    %309 = arith.mulf %308, %306 : vector<2x256xf32>
    %310 = arith.addf %305, %309 : vector<2x256xf32>
    %c222_i32 = arith.constant 222 : i32
    %311 = tpu.dynamic_rotate %110 by %c222_i32 dim 1 : vector<2x256xf32>, i32 -> vector<2x256xf32>
    %c40 = arith.constant 40 : index
    %c0_135 = arith.constant 0 : index
    %c0_136 = arith.constant 0 : index
    %312 = vector.load %arg4[%c40, %c0_135, %c0_136] : memref<49x2x256xf32, #tpu.memory_space<vmem>>, vector<1x2x256xf32>
    %313 = vector.shape_cast %312 : vector<1x2x256xf32> to vector<2x256xf32>
    %314 = arith.mulf %313, %311 : vector<2x256xf32>
    %315 = arith.addf %310, %314 : vector<2x256xf32>
    %c221_i32 = arith.constant 221 : i32
    %316 = tpu.dynamic_rotate %110 by %c221_i32 dim 1 : vector<2x256xf32>, i32 -> vector<2x256xf32>
    %c41 = arith.constant 41 : index
    %c0_137 = arith.constant 0 : index
    %c0_138 = arith.constant 0 : index
    %317 = vector.load %arg4[%c41, %c0_137, %c0_138] : memref<49x2x256xf32, #tpu.memory_space<vmem>>, vector<1x2x256xf32>
    %318 = vector.shape_cast %317 : vector<1x2x256xf32> to vector<2x256xf32>
    %319 = arith.mulf %318, %316 : vector<2x256xf32>
    %320 = arith.addf %315, %319 : vector<2x256xf32>
    %c211_i32 = arith.constant 211 : i32
    %321 = tpu.dynamic_rotate %110 by %c211_i32 dim 1 : vector<2x256xf32>, i32 -> vector<2x256xf32>
    %c42 = arith.constant 42 : index
    %c0_139 = arith.constant 0 : index
    %c0_140 = arith.constant 0 : index
    %322 = vector.load %arg4[%c42, %c0_139, %c0_140] : memref<49x2x256xf32, #tpu.memory_space<vmem>>, vector<1x2x256xf32>
    %323 = vector.shape_cast %322 : vector<1x2x256xf32> to vector<2x256xf32>
    %324 = arith.mulf %323, %321 : vector<2x256xf32>
    %325 = arith.addf %320, %324 : vector<2x256xf32>
    %c210_i32 = arith.constant 210 : i32
    %326 = tpu.dynamic_rotate %110 by %c210_i32 dim 1 : vector<2x256xf32>, i32 -> vector<2x256xf32>
    %c43 = arith.constant 43 : index
    %c0_141 = arith.constant 0 : index
    %c0_142 = arith.constant 0 : index
    %327 = vector.load %arg4[%c43, %c0_141, %c0_142] : memref<49x2x256xf32, #tpu.memory_space<vmem>>, vector<1x2x256xf32>
    %328 = vector.shape_cast %327 : vector<1x2x256xf32> to vector<2x256xf32>
    %329 = arith.mulf %328, %326 : vector<2x256xf32>
    %330 = arith.addf %325, %329 : vector<2x256xf32>
    %c209_i32 = arith.constant 209 : i32
    %331 = tpu.dynamic_rotate %110 by %c209_i32 dim 1 : vector<2x256xf32>, i32 -> vector<2x256xf32>
    %c44 = arith.constant 44 : index
    %c0_143 = arith.constant 0 : index
    %c0_144 = arith.constant 0 : index
    %332 = vector.load %arg4[%c44, %c0_143, %c0_144] : memref<49x2x256xf32, #tpu.memory_space<vmem>>, vector<1x2x256xf32>
    %333 = vector.shape_cast %332 : vector<1x2x256xf32> to vector<2x256xf32>
    %334 = arith.mulf %333, %331 : vector<2x256xf32>
    %335 = arith.addf %330, %334 : vector<2x256xf32>
    %c208_i32 = arith.constant 208 : i32
    %336 = tpu.dynamic_rotate %110 by %c208_i32 dim 1 : vector<2x256xf32>, i32 -> vector<2x256xf32>
    %c45 = arith.constant 45 : index
    %c0_145 = arith.constant 0 : index
    %c0_146 = arith.constant 0 : index
    %337 = vector.load %arg4[%c45, %c0_145, %c0_146] : memref<49x2x256xf32, #tpu.memory_space<vmem>>, vector<1x2x256xf32>
    %338 = vector.shape_cast %337 : vector<1x2x256xf32> to vector<2x256xf32>
    %339 = arith.mulf %338, %336 : vector<2x256xf32>
    %340 = arith.addf %335, %339 : vector<2x256xf32>
    %c207_i32 = arith.constant 207 : i32
    %341 = tpu.dynamic_rotate %110 by %c207_i32 dim 1 : vector<2x256xf32>, i32 -> vector<2x256xf32>
    %c46 = arith.constant 46 : index
    %c0_147 = arith.constant 0 : index
    %c0_148 = arith.constant 0 : index
    %342 = vector.load %arg4[%c46, %c0_147, %c0_148] : memref<49x2x256xf32, #tpu.memory_space<vmem>>, vector<1x2x256xf32>
    %343 = vector.shape_cast %342 : vector<1x2x256xf32> to vector<2x256xf32>
    %344 = arith.mulf %343, %341 : vector<2x256xf32>
    %345 = arith.addf %340, %344 : vector<2x256xf32>
    %c206_i32 = arith.constant 206 : i32
    %346 = tpu.dynamic_rotate %110 by %c206_i32 dim 1 : vector<2x256xf32>, i32 -> vector<2x256xf32>
    %c47 = arith.constant 47 : index
    %c0_149 = arith.constant 0 : index
    %c0_150 = arith.constant 0 : index
    %347 = vector.load %arg4[%c47, %c0_149, %c0_150] : memref<49x2x256xf32, #tpu.memory_space<vmem>>, vector<1x2x256xf32>
    %348 = vector.shape_cast %347 : vector<1x2x256xf32> to vector<2x256xf32>
    %349 = arith.mulf %348, %346 : vector<2x256xf32>
    %350 = arith.addf %345, %349 : vector<2x256xf32>
    %c205_i32 = arith.constant 205 : i32
    %351 = tpu.dynamic_rotate %110 by %c205_i32 dim 1 : vector<2x256xf32>, i32 -> vector<2x256xf32>
    %c48 = arith.constant 48 : index
    %c0_151 = arith.constant 0 : index
    %c0_152 = arith.constant 0 : index
    %352 = vector.load %arg4[%c48, %c0_151, %c0_152] : memref<49x2x256xf32, #tpu.memory_space<vmem>>, vector<1x2x256xf32>
    %353 = vector.shape_cast %352 : vector<1x2x256xf32> to vector<2x256xf32>
    %354 = arith.mulf %353, %351 : vector<2x256xf32>
    %355 = arith.addf %350, %354 : vector<2x256xf32>
    %cst_153 = arith.constant dense<0.000000e+00> : vector<256xf32>
    %356 = vector.multi_reduction <add>, %355, %cst_153 [0] : vector<2x256xf32> to vector<256xf32>
    %357 = vector.shape_cast %356 : vector<256xf32> to vector<1x256xf32>
    %358 = arith.negf %357 : vector<1x256xf32>
    %359 = math.exp %358 : vector<1x256xf32>
    %cst_154 = arith.constant 1.000000e+00 : f32
    %360 = vector.broadcast %cst_154 : f32 to vector<1x256xf32>
    %361 = arith.addf %360, %359 : vector<1x256xf32>
    %362 = arith.divf %360, %361 : vector<1x256xf32>
    %c0_155 = arith.constant 0 : index
    %c0_156 = arith.constant 0 : index
    %c0_157 = arith.constant 0 : index
    %363 = vector.load %arg6[%c0_155, %c0_156, %c0_157] : memref<1x1x256xf32, #tpu.memory_space<vmem>>, vector<1x1x256xf32>
    %364 = vector.shape_cast %363 : vector<1x1x256xf32> to vector<1x256xf32>
    %365 = vector.shape_cast %362 : vector<1x256xf32> to vector<1x1x256xf32>
    tpu.vector_store %arg6[%c0_155, %c0_156, %c0_157], %365 {strides = array<i32>} : memref<1x1x256xf32, #tpu.memory_space<vmem>>, vector<1x1x256xf32>,
    %cst_158 = arith.constant 1.000000e+00 : f32
    %366 = vector.broadcast %cst_158 : f32 to vector<1x256xf32>
    %367 = arith.addf %362, %366 : vector<1x256xf32>
    %c0_159 = arith.constant 0 : index
    %c0_160 = arith.constant 0 : index
    %c0_161 = arith.constant 0 : index
    %368 = vector.load %arg1[%c0_159, %c0_160, %c0_161] : memref<1x128x256xf32, #tpu.memory_space<vmem>>, vector<1x32x256xf32>
    %369 = vector.shape_cast %368 : vector<1x32x256xf32> to vector<32x256xf32>
    %370 = vector.extract_strided_slice %54 {offsets = [0, 0], sizes = [32, 1], strides = [1, 1]} : vector<128x1xf32> to vector<32x1xf32>
    %371 = vector.broadcast %370 : vector<32x1xf32> to vector<32x256xf32>
    %372 = arith.mulf %369, %371 : vector<32x256xf32>
    %373 = vector.broadcast %367 : vector<1x256xf32> to vector<32x256xf32>
    %374 = arith.mulf %372, %373 : vector<32x256xf32>
    %c0_162 = arith.constant 0 : index
    %c0_163 = arith.constant 0 : index
    %c0_164 = arith.constant 0 : index
    %375 = vector.load %arg5[%c0_162, %c0_163, %c0_164] : memref<1x128x256xf32, #tpu.memory_space<vmem>>, vector<1x32x256xf32>
    %376 = vector.shape_cast %375 : vector<1x32x256xf32> to vector<32x256xf32>
    %377 = vector.shape_cast %374 : vector<32x256xf32> to vector<1x32x256xf32>
    tpu.vector_store %arg5[%c0_162, %c0_163, %c0_164], %377 {strides = array<i32>} : memref<1x128x256xf32, #tpu.memory_space<vmem>>, vector<1x32x256xf32>,
    %c0_165 = arith.constant 0 : index
    %c32_166 = arith.constant 32 : index
    %c0_167 = arith.constant 0 : index
    %378 = vector.load %arg1[%c0_165, %c32_166, %c0_167] : memref<1x128x256xf32, #tpu.memory_space<vmem>>, vector<1x32x256xf32>
    %379 = vector.shape_cast %378 : vector<1x32x256xf32> to vector<32x256xf32>
    %380 = vector.extract_strided_slice %54 {offsets = [32, 0], sizes = [32, 1], strides = [1, 1]} : vector<128x1xf32> to vector<32x1xf32>
    %381 = vector.broadcast %380 : vector<32x1xf32> to vector<32x256xf32>
    %382 = arith.mulf %379, %381 : vector<32x256xf32>
    %383 = vector.broadcast %367 : vector<1x256xf32> to vector<32x256xf32>
    %384 = arith.mulf %382, %383 : vector<32x256xf32>
    %c0_168 = arith.constant 0 : index
    %c32_169 = arith.constant 32 : index
    %c0_170 = arith.constant 0 : index
    %385 = vector.load %arg5[%c0_168, %c32_169, %c0_170] : memref<1x128x256xf32, #tpu.memory_space<vmem>>, vector<1x32x256xf32>
    %386 = vector.shape_cast %385 : vector<1x32x256xf32> to vector<32x256xf32>
    %387 = vector.shape_cast %384 : vector<32x256xf32> to vector<1x32x256xf32>
    tpu.vector_store %arg5[%c0_168, %c32_169, %c0_170], %387 {strides = array<i32>} : memref<1x128x256xf32, #tpu.memory_space<vmem>>, vector<1x32x256xf32>,
    %c0_171 = arith.constant 0 : index
    %c64_172 = arith.constant 64 : index
    %c0_173 = arith.constant 0 : index
    %388 = vector.load %arg1[%c0_171, %c64_172, %c0_173] : memref<1x128x256xf32, #tpu.memory_space<vmem>>, vector<1x32x256xf32>
    %389 = vector.shape_cast %388 : vector<1x32x256xf32> to vector<32x256xf32>
    %390 = vector.extract_strided_slice %54 {offsets = [64, 0], sizes = [32, 1], strides = [1, 1]} : vector<128x1xf32> to vector<32x1xf32>
    %391 = vector.broadcast %390 : vector<32x1xf32> to vector<32x256xf32>
    %392 = arith.mulf %389, %391 : vector<32x256xf32>
    %393 = vector.broadcast %367 : vector<1x256xf32> to vector<32x256xf32>
    %394 = arith.mulf %392, %393 : vector<32x256xf32>
    %c0_174 = arith.constant 0 : index
    %c64_175 = arith.constant 64 : index
    %c0_176 = arith.constant 0 : index
    %395 = vector.load %arg5[%c0_174, %c64_175, %c0_176] : memref<1x128x256xf32, #tpu.memory_space<vmem>>, vector<1x32x256xf32>
    %396 = vector.shape_cast %395 : vector<1x32x256xf32> to vector<32x256xf32>
    %397 = vector.shape_cast %394 : vector<32x256xf32> to vector<1x32x256xf32>
    tpu.vector_store %arg5[%c0_174, %c64_175, %c0_176], %397 {strides = array<i32>} : memref<1x128x256xf32, #tpu.memory_space<vmem>>, vector<1x32x256xf32>,
    %c0_177 = arith.constant 0 : index
    %c96_178 = arith.constant 96 : index
    %c0_179 = arith.constant 0 : index
    %398 = vector.load %arg1[%c0_177, %c96_178, %c0_179] : memref<1x128x256xf32, #tpu.memory_space<vmem>>, vector<1x32x256xf32>
    %399 = vector.shape_cast %398 : vector<1x32x256xf32> to vector<32x256xf32>
    %400 = vector.extract_strided_slice %54 {offsets = [96, 0], sizes = [32, 1], strides = [1, 1]} : vector<128x1xf32> to vector<32x1xf32>
    %401 = vector.broadcast %400 : vector<32x1xf32> to vector<32x256xf32>
    %402 = arith.mulf %399, %401 : vector<32x256xf32>
    %403 = vector.broadcast %367 : vector<1x256xf32> to vector<32x256xf32>
    %404 = arith.mulf %402, %403 : vector<32x256xf32>
    %c0_180 = arith.constant 0 : index
    %c96_181 = arith.constant 96 : index
    %c0_182 = arith.constant 0 : index
    %405 = vector.load %arg5[%c0_180, %c96_181, %c0_182] : memref<1x128x256xf32, #tpu.memory_space<vmem>>, vector<1x32x256xf32>
    %406 = vector.shape_cast %405 : vector<1x32x256xf32> to vector<32x256xf32>
    %407 = vector.shape_cast %404 : vector<32x256xf32> to vector<1x32x256xf32>
    tpu.vector_store %arg5[%c0_180, %c96_181, %c0_182], %407 {strides = array<i32>} : memref<1x128x256xf32, #tpu.memory_space<vmem>>, vector<1x32x256xf32>,
    return
  }
  func.func @transform_0(%arg0: i32) -> (i32, i32, i32) {
    %c0_i32 = arith.constant 0 : i32
    %c0_i32_0 = arith.constant 0 : i32
    %c0_i32_1 = arith.constant 0 : i32
    return %arg0, %c0_i32, %c0_i32_0 : i32, i32, i32
  }
  func.func @transform_1(%arg0: i32) -> (i32, i32) {
    %c0_i32 = arith.constant 0 : i32
    %c0_i32_0 = arith.constant 0 : i32
    %c0_i32_1 = arith.constant 0 : i32
    return %c0_i32, %c0_i32_0 : i32, i32
  }
  func.func @transform_2(%arg0: i32) -> (i32, i32) {
    %c0_i32 = arith.constant 0 : i32
    %c0_i32_0 = arith.constant 0 : i32
    %c0_i32_1 = arith.constant 0 : i32
    return %c0_i32, %c0_i32_0 : i32, i32
  }
  func.func @transform_3(%arg0: i32) -> (i32, i32, i32) {
    %c0_i32 = arith.constant 0 : i32
    %c0_i32_0 = arith.constant 0 : i32
    %c0_i32_1 = arith.constant 0 : i32
    %c0_i32_2 = arith.constant 0 : i32
    return %c0_i32, %c0_i32_0, %c0_i32_1 : i32, i32, i32
  }
  func.func @transform_4(%arg0: i32) -> (i32, i32, i32) {
    %c0_i32 = arith.constant 0 : i32
    %c0_i32_0 = arith.constant 0 : i32
    %c0_i32_1 = arith.constant 0 : i32
    return %arg0, %c0_i32, %c0_i32_0 : i32, i32, i32
  }
  func.func @transform_5(%arg0: i32) -> (i32, i32, i32) {
    %c0_i32 = arith.constant 0 : i32
    %c0_i32_0 = arith.constant 0 : i32
    %c0_i32_1 = arith.constant 0 : i32
    return %arg0, %c0_i32, %c0_i32_0 : i32, i32, i32
  }
}

</mosaic_0001>

<bundles_post_ra>
// kernel: tpu_custom_call.1
= control target key start
LH: loop header
LB: loop body
LE: loop exit
PB: predicated region body
PF: predicated region fallthrough
CT: control target
= control target key end

     0   :  { %11 = vsyncpa [#allocation3], 0  ;;  %s4555_s0 = inlined_call_operand.hbm [shape: f32[2,128,256], index: 0, kind: input, shape index: {}]   ;;  %s4556_s1 = inlined_call_operand.vmem [shape: f32[8,128], index: 1, kind: input, shape index: {}]   ;;  %s4557_s2 = inlined_call_operand.vmem [shape: f32[128,8], index: 2, kind: input, shape index: {}]   ;;  %s4558_s3 = inlined_call_operand.hbm [shape: f32[49,2,256], index: 3, kind: input, shape index: {}]   ;;  %s4559_s4 = inlined_call_operand.hbm [shape: f32[2,128,256], index: 4, kind: output, shape index: {0}]   ;;  %s4560_s5 = inlined_call_operand.hbm [shape: f32[2,1,256], index: 5, kind: output, shape index: {1}]  }
   0x1   :  { %13 = vsyncpa [#allocation3 + $0x1], 0 }
   0x2   :  { %14 = vsyncpa [#allocation6], 0 }
   0x3   :  { %15 = vsyncpa [#allocation4], 0 }
   0x4   :  { %17 = vsyncpa [#allocation4 + $0x1], 0 }
   0x5   :  { %18 = vsyncpa [#allocation9], 0 }
   0x6   :  { %20 = vsyncpa [#allocation9 + $0x1], 0  ;;  %s3355_s18 = smov 0   ;;  %s3357_s19 = smov 0  }
   0x7   :  { %s3359_s20 = smov 0   ;;  %s3361_s21 = smov 0  }
   0x8 LB: > { %s3376_s22 = sadd.s32 4294967295, %s3260_s21   ;;  %s2625_s23 = sadd.s32 4294967294, %s3260_s21   ;;  %s3260_s21 = sphi %s3361_s21, %s4595_s21   ;;  %s3256_s20 = sphi %s3359_s20, %s4594_s20   ;;  %s3252_s19 = sphi %s3357_s19, %s4593_s19   ;;  %s3248_s18 = sphi %s3355_s18, %s4592_s18  }
   0x9   : > { %p46_p0 = scmp.ne.s32.totalorder %s3252_s19, %s3248_s18  ;;  %p4561_p1 = scmp.eq.s32.totalorder %s3376_s22, 0 }
   0xa   : > { %p139_p3 = scmp.eq.s32.totalorder %s2625_s23, 1  ;;  %p2626_p5 = scmp.ge.s32.totalorder %s3260_s21, 1 }
   0xb   : > { %p3385_p4 = por %p4561_p1, %p46_p0  ;;  %p172_p7 = scmp.lt.s32.totalorder %s3260_s21, 3 }
   0xc   : > { %p3390_p6 = por %p139_p3, %p46_p0  ;;  %s3262_s27 = smov [#allocation5]  }
   0xd   : > { %s4572_s24 = scalar_select %p3385_p4, 1, 0 }
   0xe   : > { %s4573_s25 = scalar_select %p3390_p6, 1, 0 }
   0xf   : > { %p3395_p8 = pnand %p2626_p5, %p172_p7  ;;  %s190_s28 = sshll.u32 %s3262_s27, 4  ;;  %s3399_s28 = int_to_ptr.vmem [resolvable:$true] %s190_s28 }
  0x10   : > { %s3411_s30 = sadd.s32 1, %s3260_s21   ;;  %s33_s6 = sadd.s32 1, %s3256_s20 }
  0x11   : > { %s4574_s26 = scalar_select %p3395_p8, 1, 0 }
  0x12   : > { %p2811_p9 = pneg %p3395_p8  ;;  %s30_s7 = ssub.s32 %s3260_s21, %s3411_s30 }
  0x13   : > { %s3100_s10 = scalar_lea.hbm %s4558_s3, 3136 }
  0x14   : > { %p3406_p11 = pnand %p2811_p9, %p4561_p1  ;;  %p3101_p12 = scmp.ne.s32.totalorder %s4558_s3, %s3100_s10 }
  0x15   : > { %p3107_p5 = scmp.lt.u32.totalorder %s3100_s10, %s4558_s3 }
  0x16   : > { %p3102_p13 = pneg %p3406_p11 }
  0x18   : > { %p3103_p0 = pnand %p3102_p13, %p3101_p12 }
  0x1a   : > { %p3104_p3 = pneg %p3103_p0 }
  0x1c   : > { %p3109_p7 = pnand %p3107_p5, %p3104_p3 }
  0x1e   : > { %3112 = shalt.err (!%p3109_p7)
}
  0x1f   : > { %s3113_s15 = scalar_lea.vmem %s3399_s28, 3136  ;;  %p3121_p2 = scmp.lt.s32.totalorder %s3399_s28, %s3399_s28 }
  0x20   : > { %p3114_p9 = scmp.ne.s32.totalorder %s3399_s28, %s3113_s15  ;;  %p3122_p6 = scmp.lt.s32.totalorder %s3113_s15, %s3113_s15 }
  0x22   : > { %p3116_p10 = pnand %p3114_p9, %p3102_p13  ;;  %p3123_p4 = por %p3122_p6, %p3121_p2 }
  0x24   : > { %p3117_p1 = pneg %p3116_p10 }
  0x26   : > { %p3124_p8 = pnand %p3123_p4, %p3117_p1 }
  0x28   : > { %3127 = shalt.err (!%p3124_p8)
}
  0x29   : > { %s3263_s16 = smov 64   ;;  %s3264_s17 = smov 4  }
  0x2a   : > { %2814 = dma.hbm_to_vmem [thread:$0]  (!%p3406_p11), %s4558_s3, 3136, %s3399_s28, [#allocation6], %s3263_s16, %s3263_s16, %s3264_s17  }
  0x2b   : > { %p31_p2 = scmp.eq.s32.totalorder %s30_s7, 0  ;;  %p40_p1 = scmp.ne.s32.totalorder %s3256_s20, %s3252_s19 }
  0x2c   : > { %p41_p4 = scmp.eq.s32.totalorder %s3260_s21, 0  ;;  %p2827_p6 = scmp.lt.s32.totalorder %s3260_s21, 2 }
  0x2d   : > { %s3442_s8 = scalar_select %p31_p2, %s3256_s20, %s33_s6  }
  0x2e   : > { %p42_p8 = por %p41_p4, %p40_p1  ;;  %p4576_p10 = scmp.eq.s32.totalorder %s3376_s22, 1 }
  0x2f   : > { %s204_s10 = sand.u32 1, %s3256_s20   ;;  %s2679_s11 = sshll.u32 %s3260_s21, 12 }
  0x30   : > { %p3446_p12 = por %p4576_p10, %p40_p1  ;;  %s2629_s12 = sshll.u32 %s204_s10, 8 }
  0x31   : > { %s3455_s14 = scalar_lea.hbm %s4555_s0, %s2679_s11  ;;  %s208_s28 = scalar_lea.vmem [#allocation2], %s2629_s12 }
  0x32   : > { %s215_s6 = sshll.u32 %s208_s28, 4  ;;  %p3457_p11 = pnand %p2827_p6, %p42_p8  ;;  %s3461_s6 = int_to_ptr.vmem [resolvable:$true] %s215_s6 }
  0x33   : > { %s3463_s15 = scalar_lea.sflag [#allocation3], %s204_s10  ;;  %s3128_s16 = scalar_lea.hbm %s3455_s14, 4096 }
  0x34   : > { %p3129_p13 = scmp.ne.s32.totalorder %s3455_s14, %s3128_s16  ;;  %p3130_p0 = pneg %p3457_p11 }
  0x35   : > { %s3133_s27 = scalar_lea.hbm %s4555_s0, 8192  ;;  %p3134_p7 = scmp.lt.u32.totalorder %s3455_s14, %s4555_s0 }
  0x36   : > { %p3131_p3 = pnand %p3130_p0, %p3129_p13  ;;  %p3135_p9 = scmp.lt.u32.totalorder %s3133_s27, %s3128_s16 }
  0x37   : > { %p3137_p1 = scmp.lt.u32.totalorder %s3128_s16, %s3455_s14 }
  0x38   : > { %p3132_p5 = pneg %p3131_p3  ;;  %p3136_p2 = por %p3135_p9, %p3134_p7 }
  0x3a   : > { %p3138_p4 = por %p3137_p1, %p3136_p2 }
  0x3c   : > { %p3139_p6 = pnand %p3138_p4, %p3132_p5 }
  0x3e   : > { %3142 = shalt.err (!%p3139_p6)
}
  0x3f   : > { %s3143_s10 = scalar_lea.vmem %s3461_s6, 4096  ;;  %s3265_s29 = smov [#allocation2]  }
  0x40   : > { %p3144_p8 = scmp.ne.s32.totalorder %s3461_s6, %s3143_s10  ;;  %s3148_s13 = sshll.u32 %s3265_s29, 4  ;;  %s3149_s13 = int_to_ptr.vmem [resolvable:$false] %s3148_s13 }
  0x41   : > { %s3150_s28 = scalar_lea.vmem %s3149_s13, 8192  ;;  %p3151_p3 = scmp.lt.s32.totalorder %s3461_s6, %s3149_s13 }
  0x42   : > { %p3146_p10 = pnand %p3144_p8, %p3130_p0  ;;  %p3152_p7 = scmp.lt.s32.totalorder %s3150_s28, %s3143_s10 }
  0x44   : > { %p3147_p13 = pneg %p3146_p10  ;;  %p3153_p9 = por %p3152_p7, %p3151_p3 }
  0x46   : > { %p3154_p2 = pnand %p3153_p9, %p3147_p13 }
  0x48   : > { %3157 = shalt.err (!%p3154_p2)
}
  0x49   : > { %s3266_s16 = smov 256   ;;  %s3267_s17 = smov 16  }
  0x4a   : > { %2818 = dma.hbm_to_vmem [thread:$0]  (!%p3457_p11), %s3455_s14, 4096, %s3461_s6, %s3463_s15, %s3266_s16, %s3266_s16, %s3267_s17  }
  0x4b   : > { %p4579_p0 = scmp.ne.s32.totalorder %s4574_s26, 0 }
  0x4d   : > { %227 = sbr.rel (%p4579_p0) target bundleno = 1509 (0x5e5), region = 36 }
  0x54   : > { %s3494_s23 = sand.u32 1, %s3252_s19   ;;  %p4580_p5 = scmp.ne.s32.totalorder %s4572_s24, 0 }
  0x55   : > { %s2633_s27 = sshll.u32 %s3494_s23, 8  ;;  %s230_s11 = scalar_lea.sflag [#allocation3], %s3494_s23 }
  0x56   : > { %s3500_s12 = scalar_lea.vmem [#allocation2], %s2633_s27 }
  0x57   : > { %3231 = dma.done.wait (%p4580_p5), %s230_s11, 4096  }
  0x58   : > { %3233 = vsyncadd (%p4580_p5), %s230_s11, 4294963200  ;;  %p4581_p11 = scmp.eq.s32.totalorder %s3376_s22, 0 }
  0x5a   : > { %3235 = dma.done.wait (%p4581_p11), [#allocation6], 3136   ;;  %p4582_p1 = pmov %p4581_p11 }
  0x5b   : > { %v3511_v0 = vld [vmem:[%s3500_s12] sm:$0xff]  ;;  %v3514_v1 = vld [vmem:[%s3500_s12 + $0x8] sm:$0xff]  ;;  %v3517_v2 = vld [vmem:[%s3500_s12 + $0x10] sm:$0xff]  ;;  %v3268_v28 = vmov 0   ;;  %vm3270_vm0 = vmmov 0   ;;  %vm680_vm2 = vcmask 64512  }
  0x5c   : > { %3237 = vsyncadd (%p4582_p1), [#allocation6], 4294964160  ;;  %v289_v3 = vadd.f32 %v3514_v1, %v3511_v0  ;;  %v277_v4 = vmax.f32 %v3511_v0, %v3514_v1  ;;  %v3524_v5 = vld [vmem:[%s3500_s12 + $0x18] sm:$0xff]  ;;  %v3531_v8 = vld [vmem:[%s3500_s12 + $0x20] sm:$0xff]  ;;  %2922 = vset.pattern.permute.xlu0 %v3268_v28  ;;  %2928 = vset.pattern.permute.xlu1 %v3268_v28  ;;  %vm874_vm3 = vcmask 15360   ;;  %s3272_s13 = smov 51  }
  0x5d   : > { %v292_v6 = vadd.f32 %v3524_v5, %v3517_v2  ;;  %v280_v7 = vmax.f32 %v3517_v2, %v3524_v5  ;;  %v3534_v9 = vld [vmem:[%s3500_s12 + $0x28] sm:$0xff]  ;;  %v3537_v10 = vld [vmem:[%s3500_s12 + $0x30] sm:$0xff]  ;;  %v3540_v11 = vld [vmem:[%s3500_s12 + $0x38] sm:$0xff]  ;;  %s3273_s28 = smov 50   ;;  %s3274_s16 = smov 49  }
  0x5e   : > { %290 = vadd.xlane.f32.xlu0 %v289_v3  ;;  %278 = vmax.xlane.f32.xlu1 %v277_v4  ;;  %v295_v12 = vadd.f32 %v3534_v9, %v3531_v8  ;;  %v298_v13 = vadd.f32 %v3540_v11, %v3537_v10  ;;  %v283_v14 = vmax.f32 %v3531_v8, %v3534_v9  ;;  %v3551_v16 = vld [vmem:[%s3500_s12 + $0x40] sm:$0xff]  ;;  %v3554_v17 = vld [vmem:[%s3500_s12 + $0x48] sm:$0xff]  ;;  %v3557_v18 = vld [vmem:[%s3500_s12 + $0x50] sm:$0xff]  ;;  %s3275_s17 = smov 48   ;;  %s3276_s11 = smov 47  }
  0x5f   : > { %v286_v15 = vmax.f32 %v3537_v10, %v3540_v11  ;;  %v3560_v19 = vld [vmem:[%s3500_s12 + $0x58] sm:$0xff]  ;;  %v325_v20 = vadd.f32 %v3554_v17, %v3551_v16  ;;  %v313_v22 = vmax.f32 %v3551_v16, %v3554_v17  ;;  %v3571_v24 = vld [vmem:[%s3500_s12 + $0x60] sm:$0xff]  ;;  %v3574_v25 = vld [vmem:[%s3500_s12 + $0x68] sm:$0xff]  ;;  %s3277_s24 = smov 46   ;;  %s3278_s26 = smov 45  }
  0x60   : > { %v328_v21 = vadd.f32 %v3560_v19, %v3557_v18  ;;  %v316_v23 = vmax.f32 %v3557_v18, %v3560_v19  ;;  %v3577_v26 = vld [vmem:[%s3500_s12 + $0x70] sm:$0xff]  ;;  %v3580_v27 = vld [vmem:[%s3500_s12 + $0x78] sm:$0xff]  ;;  %v331_v29 = vadd.f32 %v3574_v25, %v3571_v24  ;;  %v319_v31 = vmax.f32 %v3571_v24, %v3574_v25  ;;  %v3591_v33 = vld [vmem:[%s3500_s12 + $0x80] sm:$0xff]  ;;  %s3279_s14 = smov 35   ;;  %s3280_s6 = smov 34  }
  0x61   : > { %v334_v30 = vadd.f32 %v3580_v27, %v3577_v26  ;;  %v322_v32 = vmax.f32 %v3577_v26, %v3580_v27  ;;  %v3594_v34 = vld [vmem:[%s3500_s12 + $0x88] sm:$0xff]  ;;  %v3597_v35 = vld [vmem:[%s3500_s12 + $0x90] sm:$0xff]  ;;  %v3600_v36 = vld [vmem:[%s3500_s12 + $0x98] sm:$0xff]  ;;  %s3281_s7 = smov 33   ;;  %s3282_s15 = smov 32  }
  0x62   : > { %293 = vadd.xlane.f32.xlu0 %v292_v6  ;;  %281 = vmax.xlane.f32.xlu1 %v280_v7  ;;  %v361_v37 = vadd.f32 %v3594_v34, %v3591_v33  ;;  %v364_v38 = vadd.f32 %v3600_v36, %v3597_v35  ;;  %v349_v39 = vmax.f32 %v3591_v33, %v3594_v34  ;;  %v3611_v41 = vld [vmem:[%s3500_s12 + $0xa0] sm:$0xff]  ;;  %v3614_v42 = vld [vmem:[%s3500_s12 + $0xa8] sm:$0xff]  ;;  %v3617_v43 = vld [vmem:[%s3500_s12 + $0xb0] sm:$0xff]  ;;  %s3283_s10 = smov 31   ;;  %s3284_s29 = smov 30  }
  0x63   : > { %v352_v40 = vmax.f32 %v3597_v35, %v3600_v36  ;;  %v3620_v44 = vld [vmem:[%s3500_s12 + $0xb8] sm:$0xff]  ;;  %v367_v45 = vadd.f32 %v3614_v42, %v3611_v41  ;;  %v355_v47 = vmax.f32 %v3611_v41, %v3614_v42  ;;  %v3631_v49 = vld [vmem:[%s3500_s12 + $0xc0] sm:$0xff]  ;;  %v3634_v50 = vld [vmem:[%s3500_s12 + $0xc8] sm:$0xff] }
  0x64   : > { %v370_v46 = vadd.f32 %v3620_v44, %v3617_v43  ;;  %v358_v48 = vmax.f32 %v3617_v43, %v3620_v44  ;;  %v3637_v51 = vld [vmem:[%s3500_s12 + $0xd0] sm:$0xff]  ;;  %v3640_v52 = vld [vmem:[%s3500_s12 + $0xd8] sm:$0xff]  ;;  %v397_v53 = vadd.f32 %v3634_v50, %v3631_v49  ;;  %v385_v55 = vmax.f32 %v3631_v49, %v3634_v50  ;;  %v3651_v57 = vld [vmem:[%s3500_s12 + $0xe0] sm:$0xff] }
  0x65   : > { %v400_v54 = vadd.f32 %v3640_v52, %v3637_v51  ;;  %v388_v56 = vmax.f32 %v3637_v51, %v3640_v52  ;;  %v3654_v58 = vld [vmem:[%s3500_s12 + $0xe8] sm:$0xff]  ;;  %v3657_v59 = vld [vmem:[%s3500_s12 + $0xf0] sm:$0xff]  ;;  %v3660_v60 = vld [vmem:[%s3500_s12 + $0xf8] sm:$0xff] }
  0x66   : > { %296 = vadd.xlane.f32.xlu0 %v295_v12  ;;  %299 = vadd.xlane.f32.xlu1 %v298_v13  ;;  %v403_v61 = vadd.f32 %v3654_v58, %v3651_v57  ;;  %v406_v62 = vadd.f32 %v3660_v60, %v3657_v59  ;;  %v391_v63 = vmax.f32 %v3651_v57, %v3654_v58 }
  0x67   : > { %v394_v3 = vmax.f32 %v3657_v59, %v3660_v60 }
  0x6a   : > { %284 = vmax.xlane.f32.xlu0 %v283_v14  ;;  %287 = vmax.xlane.f32.xlu1 %v286_v15 }
  0x6e   : > { %326 = vadd.xlane.f32.xlu0 %v325_v20  ;;  %329 = vadd.xlane.f32.xlu1 %v328_v21 }
  0x72   : > { %314 = vmax.xlane.f32.xlu0 %v313_v22  ;;  %317 = vmax.xlane.f32.xlu1 %v316_v23 }
  0x76   : > { %332 = vadd.xlane.f32.xlu0 %v331_v29  ;;  %335 = vadd.xlane.f32.xlu1 %v334_v30 }
  0x7a   : > { %320 = vmax.xlane.f32.xlu0 %v319_v31  ;;  %323 = vmax.xlane.f32.xlu1 %v322_v32 }
  0x7e   : > { %362 = vadd.xlane.f32.xlu0 %v361_v37  ;;  %365 = vadd.xlane.f32.xlu1 %v364_v38 }
  0x82   : > { %350 = vmax.xlane.f32.xlu0 %v349_v39  ;;  %353 = vmax.xlane.f32.xlu1 %v352_v40 }
  0x86   : > { %368 = vadd.xlane.f32.xlu0 %v367_v45  ;;  %371 = vadd.xlane.f32.xlu1 %v370_v46 }
  0x8a   : > { %356 = vmax.xlane.f32.xlu0 %v355_v47  ;;  %359 = vmax.xlane.f32.xlu1 %v358_v48 }
  0x8e   : > { %398 = vadd.xlane.f32.xlu0 %v397_v53  ;;  %401 = vadd.xlane.f32.xlu1 %v400_v54 }
  0x92   : > { %386 = vmax.xlane.f32.xlu0 %v385_v55  ;;  %389 = vmax.xlane.f32.xlu1 %v388_v56 }
  0x96   : > { %404 = vadd.xlane.f32.xlu0 %v403_v61  ;;  %407 = vadd.xlane.f32.xlu1 %v406_v62 }
  0x9a   : > { %392 = vmax.xlane.f32.xlu0 %v391_v63  ;;  %395 = vmax.xlane.f32.xlu1 %v394_v3 }
  0xeb   : > { %v291_v4 = vpop.xlane.xlu0 %290  ;;  %v279_v6 = vpop.xlane.xlu1 %278 }
  0xec   : > { %v301_v46 = vmul.f32 0.00390625, %v291_v4 }
  0xef   : > { %v294_v7 = vpop.xlane.xlu0 %293  ;;  %v282_v12 = vpop.xlane.xlu1 %281 }
  0xf0   : > { %v2923_v13 = vpack.i.bf16 %v282_v12, %v279_v6  ;;  %v302_v38 = vmul.f32 0.00390625, %v294_v7  ;;  %v3269_v7 = vmov 0.0|0.0  }
  0xf1   : > { %2777 = vmatprep.subr.bf16.mxu0 %v3269_v7 }
  0xf2   : > { %2924 = vperm.xlu0 %2922, %v2923_v13   ;;  %v2944_v47 = vpack.i.bf16 %v302_v38, %v301_v46 }
  0xf3   : > { %v297_v14 = vpop.xlane.xlu0 %296  ;;  %v300_v15 = vpop.xlane.xlu1 %299 }
  0xf4   : > { %v303_v54 = vmul.f32 0.00390625, %v297_v14  ;;  %v304_v55 = vmul.f32 0.00390625, %v300_v15 }
  0xf6   : > { %v2949_v13 = vpack.i.bf16 %v304_v55, %v303_v54 }
  0xf7   : > { %v285_v20 = vpop.xlane.xlu0 %284  ;;  %v288_v21 = vpop.xlane.xlu1 %287 }
  0xf8   : > { %v2929_v22 = vpack.i.bf16 %v288_v21, %v285_v20 }
  0xfa   : > { %2930 = vperm.xlu1 %2928, %v2929_v22  }
  0xfb   : > { %v327_v23 = vpop.xlane.xlu0 %326  ;;  %v330_v28 = vpop.xlane.xlu1 %329 }
  0xfc   : > { %v337_v63 = vmul.f32 0.00390625, %v327_v23  ;;  %v338_v3 = vmul.f32 0.00390625, %v330_v28 }
  0xfe   : > { %v2954_v4 = vpack.i.bf16 %v338_v3, %v337_v63 }
  0xff   : > { %v315_v29 = vpop.xlane.xlu0 %314  ;;  %v318_v30 = vpop.xlane.xlu1 %317 }
 0x100   : > { %v2934_v31 = vpack.i.bf16 %v318_v30, %v315_v29 }
 0x102   : > { %2935 = vperm.xlu1 %2928, %v2934_v31  }
 0x103   : > { %v333_v32 = vpop.xlane.xlu0 %332  ;;  %v336_v37 = vpop.xlane.xlu1 %335 }
 0x104   : > { %v339_v22 = vmul.f32 0.00390625, %v333_v32  ;;  %v340_v14 = vmul.f32 0.00390625, %v336_v37 }
 0x106   : > { %v2959_v28 = vpack.i.bf16 %v340_v14, %v339_v22 }
 0x107   : > { %v321_v39 = vpop.xlane.xlu0 %320  ;;  %v324_v40 = vpop.xlane.xlu1 %323 }
 0x108   : > { %v2939_v45 = vpack.i.bf16 %v324_v40, %v321_v39 }
 0x10a   : > { %2940 = vperm.xlu1 %2928, %v2939_v45  }
 0x10b   : > { %v363_v48 = vpop.xlane.xlu0 %362  ;;  %v366_v53 = vpop.xlane.xlu1 %365 }
 0x10c   : > { %v373_v56 = vmul.f32 0.00390625, %v363_v48  ;;  %v374_v61 = vmul.f32 0.00390625, %v366_v53 }
 0x10e   : > { %v2984_v62 = vpack.i.bf16 %v374_v61, %v373_v56  ;;  %2945 = vperm.xlu1 %2928, %v2944_v47  }
 0x10f   : > { %v351_v6 = vpop.xlane.xlu0 %350  ;;  %v354_v12 = vpop.xlane.xlu1 %353 }
 0x110   : > { %2985 = vperm.xlu0 %2922, %v2984_v62   ;;  %v2964_v40 = vpack.i.bf16 %v354_v12, %v351_v6  ;;  %v3271_v6 = vmov 0.0  }
 0x111   : > { %2748 = vmatprep.mubr.msk.f32.mxu0 %vm3270_vm0, %v3271_v6 }
 0x112   : > { %2950 = vperm.xlu1 %2928, %v2949_v13  }
 0x113   : > { %v369_v20 = vpop.xlane.xlu0 %368  ;;  %v372_v21 = vpop.xlane.xlu1 %371 }
 0x114   : > { %v375_v15 = vmul.f32 0.00390625, %v369_v20  ;;  %v376_v29 = vmul.f32 0.00390625, %v372_v21  ;;  %v4564_v20 = vlaneseq }
 0x116   : > { %v2989_v30 = vpack.i.bf16 %v376_v29, %v375_v15  ;;  %2955 = vperm.xlu1 %2928, %v2954_v4   ;;  %v3672_v22 = vand.u32 127, %v4564_v20 }
 0x117   : > { %v357_v31 = vpop.xlane.xlu0 %356  ;;  %v360_v23 = vpop.xlane.xlu1 %359 }
 0x118   : > { %2990 = vperm.xlu0 %2922, %v2989_v30   ;;  %v2969_v32 = vpack.i.bf16 %v360_v23, %v357_v31  ;;  %vm415_vm1 = vcmp.eq.s32.totalorder %v3672_v22, 0  ;;  %vm1220_vm5 = vcmp.lt.s32.totalorder %v3672_v22, 51  ;;  %vm1241_vm6 = vcmp.lt.s32.totalorder %v3672_v22, 50 }
 0x119   : > { %vm1263_vm7 = vcmp.lt.s32.totalorder %v3672_v22, 49  ;;  %vm1285_vm8 = vcmp.lt.s32.totalorder %v3672_v22, 48  ;;  %vm1307_vm9 = vcmp.lt.s32.totalorder %v3672_v22, 47  ;;  %vm1329_vm10 = vcmp.lt.s32.totalorder %v3672_v22, 46 }
 0x11a   : > { %2960 = vperm.xlu1 %2928, %v2959_v28   ;;  %vm1351_vm11 = vcmp.lt.s32.totalorder %v3672_v22, 45  ;;  %vm1373_vm12 = vcmp.lt.s32.totalorder %v3672_v22, 35  ;;  %vm1395_vm13 = vcmp.lt.s32.totalorder %v3672_v22, 34  ;;  %vm1417_vm14 = vcmp.lt.s32.totalorder %v3672_v22, 33 }
 0x11b   : > { %v399_v38 = vpop.xlane.xlu0 %398  ;;  %v402_v39 = vpop.xlane.xlu1 %401  ;;  %vm1439_vm15 = vcmp.lt.s32.totalorder %v3672_v22, 32  ;;  %vm1461_vm0 = vcmp.lt.s32.totalorder %v3672_v22, 31 }
 0x11c   : > { %v409_v45 = vmul.f32 0.00390625, %v399_v38  ;;  %v410_v46 = vmul.f32 0.00390625, %v402_v39 }
 0x11e   : > { %v2994_v47 = vpack.i.bf16 %v410_v46, %v409_v45  ;;  %2965 = vperm.xlu1 %2928, %v2964_v40  }
 0x11f   : > { %v387_v48 = vpop.xlane.xlu0 %386  ;;  %v390_v53 = vpop.xlane.xlu1 %389 }
 0x120   : > { %2995 = vperm.xlu0 %2922, %v2994_v47   ;;  %v2974_v55 = vpack.i.bf16 %v390_v53, %v387_v48 }
 0x122   : > { %2970 = vperm.xlu1 %2928, %v2969_v32  }
 0x123   : > { %v405_v37 = vpop.xlane.xlu0 %404  ;;  %v408_v54 = vpop.xlane.xlu1 %407 }
 0x124   : > { %v411_v56 = vmul.f32 0.00390625, %v405_v37  ;;  %v412_v61 = vmul.f32 0.00390625, %v408_v54 }
 0x126   : > { %v2999_v62 = vpack.i.bf16 %v412_v61, %v411_v56  ;;  %2975 = vperm.xlu1 %2928, %v2974_v55  }
 0x127   : > { %v393_v63 = vpop.xlane.xlu0 %392  ;;  %v396_v3 = vpop.xlane.xlu1 %395 }
 0x128   : > { %v2979_v13 = vpack.i.bf16 %v396_v3, %v393_v63  ;;  %3000 = vperm.xlu0 %2922, %v2999_v62  }
 0x12a   : > { %2980 = vperm.xlu1 %2928, %v2979_v13  }
 0x171   : > { %v2925_v14 = vpop.permute.xlu0 %2924 }
 0x172   : > { %v2927_v29 = vunpack.i.h.bf16 %v2925_v14  ;;  %v2926_v30 = vunpack.i.l.bf16 %v2925_v14 }
 0x179   : > { %v2931_v12 = vpop.permute.xlu1 %2930 }
 0x17a   : > { %v2933_v45 = vunpack.i.h.bf16 %v2931_v12  ;;  %v2932_v46 = vunpack.i.l.bf16 %v2931_v12 }
 0x181   : > { %v2936_v4 = vpop.permute.xlu1 %2935 }
 0x182   : > { %v2938_v55 = vunpack.i.h.bf16 %v2936_v4  ;;  %v2937_v56 = vunpack.i.l.bf16 %v2936_v4 }
 0x189   : > { %v2941_v21 = vpop.permute.xlu1 %2940 }
 0x18a   : > { %v2943_v12 = vunpack.i.h.bf16 %v2941_v21  ;;  %v2942_v14 = vunpack.i.l.bf16 %v2941_v21 }
 0x18d   : > { %v2946_v15 = vpop.permute.xlu1 %2945 }
 0x18e   : > { %v2948_v31 = vunpack.i.h.bf16 %v2946_v15  ;;  %v2947_v23 = vunpack.i.l.bf16 %v2946_v15 }
 0x190   : > { %v576_v28 = vsel %vm415_vm1, %v2926_v30, %v2947_v23  ;;  %v577_v38 = vsel %vm415_vm1, %v2927_v29, %v2948_v31  ;;  %v2986_v30 = vpop.permute.xlu0 %2985 }
 0x191   : > { %v2951_v39 = vpop.permute.xlu1 %2950  ;;  %v2778_v40 = vpack.c.bf16 %v577_v38, %v576_v28  ;;  %v2988_v38 = vunpack.i.h.bf16 %v2986_v30 }
 0x192   : > { %v2953_v47 = vunpack.i.h.bf16 %v2951_v39  ;;  %v2952_v48 = vunpack.i.l.bf16 %v2951_v39  ;;  %v2987_v39 = vunpack.i.l.bf16 %v2986_v30 }
 0x193   : > { %2779 = vmatpush3.bf16.msra.mxu0 %v2778_v40 }
 0x194   : > { %2780 = vmatprep.subr.bf16.mxu0 %v3269_v7  ;;  %v578_v53 = vsel %vm415_vm1, %v2932_v46, %v2952_v48  ;;  %v579_v32 = vsel %vm415_vm1, %v2933_v45, %v2953_v47 }
 0x195   : > { %v2956_v37 = vpop.permute.xlu1 %2955  ;;  %v2781_v54 = vpack.c.bf16 %v579_v32, %v578_v53 }
 0x196   : > { %v2958_v61 = vunpack.i.h.bf16 %v2956_v37  ;;  %v2957_v62 = vunpack.i.l.bf16 %v2956_v37 }
 0x197   : > { %2782 = vmatpush3.bf16.msra.mxu0 %v2781_v54  ;;  %v2991_v46 = vpop.permute.xlu0 %2990 }
 0x198   : > { %2783 = vmatprep.subr.bf16.mxu0 %v3269_v7  ;;  %v580_v63 = vsel %vm415_vm1, %v2937_v56, %v2957_v62  ;;  %v581_v3 = vsel %vm415_vm1, %v2938_v55, %v2958_v61  ;;  %v2993_v32 = vunpack.i.h.bf16 %v2991_v46  ;;  %v2992_v37 = vunpack.i.l.bf16 %v2991_v46 }
 0x199   : > { %v2961_v13 = vpop.permute.xlu1 %2960  ;;  %v2784_v6 = vpack.c.bf16 %v581_v3, %v580_v63 }
 0x19a   : > { %v2963_v15 = vunpack.i.h.bf16 %v2961_v13  ;;  %v2962_v29 = vunpack.i.l.bf16 %v2961_v13 }
 0x19b   : > { %2785 = vmatpush3.bf16.msra.mxu0 %v2784_v6 }
 0x19c   : > { %2786 = vmatprep.subr.bf16.mxu0 %v3269_v7  ;;  %v582_v4 = vsel %vm415_vm1, %v2942_v14, %v2962_v29  ;;  %v583_v31 = vsel %vm415_vm1, %v2943_v12, %v2963_v15 }
 0x19d   : > { %v2966_v23 = vpop.permute.xlu1 %2965  ;;  %v2787_v28 = vpack.c.bf16 %v583_v31, %v582_v4 }
 0x19e   : > { %v2968_v40 = vunpack.i.h.bf16 %v2966_v23  ;;  %v2967_v45 = vunpack.i.l.bf16 %v2966_v23 }
 0x19f   : > { %2788 = vmatpush3.bf16.msra.mxu0 %v2787_v28  ;;  %v2996_v56 = vpop.permute.xlu0 %2995 }
 0x1a0   : > { %2789 = vmatprep.subr.bf16.mxu0 %v3269_v7  ;;  %v584_v21 = vsel %vm415_vm1, %v2967_v45, %v2987_v39  ;;  %v585_v47 = vsel %vm415_vm1, %v2968_v40, %v2988_v38  ;;  %v2998_v13 = vunpack.i.h.bf16 %v2996_v56  ;;  %v2997_v6 = vunpack.i.l.bf16 %v2996_v56  ;;  %v669_v56 = vld [vmem:[%s4557_s2 + $0x28] sm:$0xff] }
 0x1a1   : > { %v2971_v48 = vpop.permute.xlu1 %2970  ;;  %v2790_v53 = vpack.c.bf16 %v585_v47, %v584_v21  ;;  %v592_v21 = vld [vmem:[%s4556_s1] sm:$0xff] }
 0x1a2   : > { %v2973_v54 = vunpack.i.h.bf16 %v2971_v48  ;;  %v2972_v55 = vunpack.i.l.bf16 %v2971_v48  ;;  %v664_v47 = vld [vmem:[%s4557_s2] sm:$0xff] }
 0x1a3   : > { %2791 = vmatpush3.bf16.msra.mxu0 %v2790_v53  ;;  %2753 = vmatprep.mubr.msk.f32.mxu1 %vm680_vm2, %v664_v47 }
 0x1a4   : > { %2792 = vmatprep.subr.bf16.mxu0 %v3269_v7  ;;  %v586_v61 = vsel %vm415_vm1, %v2972_v55, %v2992_v37  ;;  %v587_v62 = vsel %vm415_vm1, %v2973_v54, %v2993_v32  ;;  %v665_v32 = vld [vmem:[%s4557_s2 + $0x8] sm:$0xff]  ;;  %v666_v37 = vld [vmem:[%s4557_s2 + $0x10] sm:$0xff]  ;;  %v667_v54 = vld [vmem:[%s4557_s2 + $0x18] sm:$0xff] }
 0x1a5   : > { %v2976_v63 = vpop.permute.xlu1 %2975  ;;  %v2793_v3 = vpack.c.bf16 %v587_v62, %v586_v61  ;;  %v668_v55 = vld [vmem:[%s4557_s2 + $0x20] sm:$0xff]  ;;  %v670_v61 = vld [vmem:[%s4557_s2 + $0x30] sm:$0xff]  ;;  %v671_v62 = vld [vmem:[%s4557_s2 + $0x38] sm:$0xff] }
 0x1a6   : > { %v2978_v12 = vunpack.i.h.bf16 %v2976_v63  ;;  %v2977_v14 = vunpack.i.l.bf16 %v2976_v63  ;;  %v672_v63 = vld [vmem:[%s4557_s2 + $0x40] sm:$0xff] }
 0x1a7   : > { %v3001_v15 = vpop.permute.xlu0 %3000  ;;  %2794 = vmatpush3.bf16.msra.mxu0 %v2793_v3  ;;  %v673_v3 = vld [vmem:[%s4557_s2 + $0x48] sm:$0xff] }
 0x1a8   : > { %2795 = vmatprep.subr.bf16.mxu0 %v3269_v7  ;;  %v588_v29 = vsel %vm415_vm1, %v2977_v14, %v2997_v6  ;;  %v589_v30 = vsel %vm415_vm1, %v2978_v12, %v2998_v13  ;;  %v3003_v23 = vunpack.i.h.bf16 %v3001_v15  ;;  %v3002_v28 = vunpack.i.l.bf16 %v3001_v15  ;;  %v674_v13 = vld [vmem:[%s4557_s2 + $0x50] sm:$0xff]  ;;  %v675_v6 = vld [vmem:[%s4557_s2 + $0x58] sm:$0xff]  ;;  %v676_v12 = vld [vmem:[%s4557_s2 + $0x60] sm:$0xff] }
 0x1a9   : > { %v2981_v4 = vpop.permute.xlu1 %2980  ;;  %v2796_v31 = vpack.c.bf16 %v589_v30, %v588_v29  ;;  %v677_v14 = vld [vmem:[%s4557_s2 + $0x68] sm:$0xff]  ;;  %v678_v15 = vld [vmem:[%s4557_s2 + $0x70] sm:$0xff]  ;;  %v679_v29 = vld [vmem:[%s4557_s2 + $0x78] sm:$0xff] }
 0x1aa   : > { %v2983_v38 = vunpack.i.h.bf16 %v2981_v4  ;;  %v2982_v39 = vunpack.i.l.bf16 %v2981_v4 }
 0x1ab   : > { %2797 = vmatpush3.bf16.msra.mxu0 %v2796_v31 }
 0x1ac   : > { %2798 = vmatprep.subr.bf16.mxu0 %v3269_v7  ;;  %v590_v40 = vsel %vm415_vm1, %v2982_v39, %v3002_v28  ;;  %v591_v45 = vsel %vm415_vm1, %v2983_v38, %v3003_v23  ;;  %vm1483_vm1 = vcmp.lt.s32.totalorder %v3672_v22, 30 }
 0x1ad   : > { %v2799_v46 = vpack.c.bf16 %v591_v45, %v590_v40 }
 0x1af   : > { %2800 = vmatpush3.bf16.msra.mxu0 %v2799_v46 }
 0x1b2   : > { %2749 = vmatmul.mubr.f32.vlgmr.msra.gmra.mrb[0].mxu0 %v592_v21 }
 0x285   : > { %v659_v7 = vpop.f32.mrb[0].mxu0 }
 0x286   : > { %v663_v48 = vmax.f32 %v659_v7, 0.0  ;;  %v2750_v53 = vpop.f32.mrb[1].mxu0 }
 0x288   : > { %2751 = vmatprep.subr.mxu1 %v663_v48 }
 0x289   : > { %2752 = vmatpush3.msra.mxu1 %v663_v48 }
 0x28a   : > { %2754 = vmatmul.mubr.msk.f32.vlgmr.msra.gmra.mrb[0].mxu1 %vm680_vm2, %v665_v32 }
 0x28b   : > { %2756 = vmatprep.mubr.msk.f32.mxu1 %vm680_vm2, %v666_v37 }
 0x28e   : > { %2757 = vmatmul.mubr.msk.f32.gmra.mrb[2].mxu1 %vm680_vm2, %v667_v54 }
 0x28f   : > { %2759 = vmatprep.mubr.msk.f32.mxu1 %vm680_vm2, %v668_v55 }
 0x292   : > { %2760 = vmatmul.mubr.msk.f32.gmra.mrb[4].mxu1 %vm680_vm2, %v669_v56 }
 0x293   : > { %2762 = vmatprep.mubr.msk.f32.mxu1 %vm680_vm2, %v670_v61 }
 0x296   : > { %2763 = vmatmul.mubr.msk.f32.gmra.mrb[6].mxu1 %vm680_vm2, %v671_v62 }
 0x297   : > { %2765 = vmatprep.mubr.msk.f32.mxu1 %vm680_vm2, %v672_v63 }
 0x29a   : > { %2766 = vmatmul.mubr.msk.f32.gmra.mrb[8].mxu1 %vm680_vm2, %v673_v3 }
 0x29b   : > { %2768 = vmatprep.mubr.msk.f32.mxu1 %vm680_vm2, %v674_v13 }
 0x29e   : > { %2769 = vmatmul.mubr.msk.f32.gmra.mrb[10].mxu1 %vm680_vm2, %v675_v6 }
 0x29f   : > { %2771 = vmatprep.mubr.msk.f32.mxu1 %vm680_vm2, %v676_v12 }
 0x2a2   : > { %2772 = vmatmul.mubr.msk.f32.gmra.mrb[12].mxu1 %vm680_vm2, %v677_v14 }
 0x2a3   : > { %2774 = vmatprep.mubr.msk.f32.mxu1 %vm680_vm2, %v678_v15 }
 0x2a6   : > { %2775 = vmatmul.mubr.msk.f32.gmra.mrb[14].mxu1 %vm680_vm2, %v679_v29  ;;  %vm1505_vm2 = vcmp.lt.s32.totalorder %v3672_v22, 29 }
 0x35d   : > { %v2755_v30 = vpop.f32.mrb[0].mxu1 }
 0x35e   : > { %v795_v4 = vpop.f32.mrb[1].mxu1  ;;  %v878_v31 = vsel %vm874_vm3, %v2755_v30, 0.0 }
 0x35f   : > { %879 = vadd.xlane.f32.xlu0 %v878_v31  ;;  %v875_v23 = vsel %vm874_vm3, %v795_v4, 0.0 }
 0x360   : > { %876 = vadd.xlane.f32.xlu1 %v875_v23 }
 0x361   : > { %v2758_v28 = vpop.f32.mrb[2].mxu1 }
 0x362   : > { %v805_v38 = vpop.f32.mrb[3].mxu1  ;;  %v884_v39 = vsel %vm874_vm3, %v2758_v28, 0.0 }
 0x363   : > { %885 = vadd.xlane.f32.xlu0 %v884_v39  ;;  %v881_v46 = vsel %vm874_vm3, %v805_v38, 0.0 }
 0x365   : > { %v2761_v40 = vpop.f32.mrb[4].mxu1 }
 0x366   : > { %v815_v45 = vpop.f32.mrb[5].mxu1  ;;  %v890_v21 = vsel %vm874_vm3, %v2761_v40, 0.0 }
 0x367   : > { %882 = vadd.xlane.f32.xlu0 %v881_v46  ;;  %891 = vadd.xlane.f32.xlu1 %v890_v21  ;;  %v887_v48 = vsel %vm874_vm3, %v815_v45, 0.0 }
 0x369   : > { %v2764_v47 = vpop.f32.mrb[6].mxu1 }
 0x36a   : > { %v825_v7 = vpop.f32.mrb[7].mxu1  ;;  %v896_v53 = vsel %vm874_vm3, %v2764_v47, 0.0 }
 0x36b   : > { %888 = vadd.xlane.f32.xlu0 %v887_v48  ;;  %897 = vadd.xlane.f32.xlu1 %v896_v53  ;;  %v893_v54 = vsel %vm874_vm3, %v825_v7, 0.0 }
 0x36d   : > { %v2767_v32 = vpop.f32.mrb[8].mxu1 }
 0x36e   : > { %v835_v37 = vpop.f32.mrb[9].mxu1  ;;  %v902_v62 = vsel %vm874_vm3, %v2767_v32, 0.0 }
 0x36f   : > { %894 = vadd.xlane.f32.xlu1 %v893_v54  ;;  %v899_v55 = vsel %vm874_vm3, %v835_v37, 0.0 }
 0x370   : > { %900 = vadd.xlane.f32.xlu0 %v899_v55 }
 0x371   : > { %v2770_v56 = vpop.f32.mrb[10].mxu1 }
 0x372   : > { %v845_v61 = vpop.f32.mrb[11].mxu1  ;;  %v908_v6 = vsel %vm874_vm3, %v2770_v56, 0.0 }
 0x373   : > { %903 = vadd.xlane.f32.xlu1 %v902_v62  ;;  %v905_v63 = vsel %vm874_vm3, %v845_v61, 0.0 }
 0x374   : > { %906 = vadd.xlane.f32.xlu0 %v905_v63 }
 0x375   : > { %v2773_v3 = vpop.f32.mrb[12].mxu1 }
 0x376   : > { %v855_v13 = vpop.f32.mrb[13].mxu1  ;;  %v914_v12 = vsel %vm874_vm3, %v2773_v3, 0.0 }
 0x377   : > { %909 = vadd.xlane.f32.xlu1 %v908_v6  ;;  %v911_v29 = vsel %vm874_vm3, %v855_v13, 0.0 }
 0x378   : > { %915 = vadd.xlane.f32.xlu0 %v914_v12 }
 0x379   : > { %v2776_v14 = vpop.f32.mrb[14].mxu1 }
 0x37a   : > { %v865_v15 = vpop.f32.mrb[15].mxu1  ;;  %v920_v4 = vsel %vm874_vm3, %v2776_v14, 0.0 }
 0x37b   : > { %912 = vadd.xlane.f32.xlu1 %v911_v29  ;;  %v917_v30 = vsel %vm874_vm3, %v865_v15, 0.0  ;;  %vm1527_vm3 = vcmp.lt.s32.totalorder %v3672_v22, 19 }
 0x37c   : > { %918 = vadd.xlane.f32.xlu0 %v917_v30 }
 0x37f   : > { %921 = vadd.xlane.f32.xlu1 %v920_v4 }
 0x3ec   : > { %v880_v31 = vpop.xlane.xlu0 %879 }
 0x3ed   : > { %v877_v23 = vpop.xlane.xlu1 %876  ;;  %v2654_v39 = vmul.f32 -1.442695, %v880_v31 }
 0x3ee   : > { %v2653_v40 = vmul.f32 -1.442695, %v877_v23 }
 0x3ef   : > { %3004 = vpow2.f32 %v2654_v39 }
 0x3f0   : > { %v886_v28 = vpop.xlane.xlu0 %885  ;;  %3006 = vpow2.f32 %v2653_v40 }
 0x3f1   : > { %v2656_v47 = vmul.f32 -1.442695, %v886_v28 }
 0x3f4   : > { %v892_v38 = vpop.xlane.xlu1 %891  ;;  %v883_v45 = vpop.xlane.xlu0 %882 }
 0x3f5   : > { %v2655_v21 = vmul.f32 -1.442695, %v883_v45  ;;  %v2658_v37 = vmul.f32 -1.442695, %v892_v38 }
 0x3f7   : > { %3008 = vpow2.f32 %v2655_v21 }
 0x3f8   : > { %v898_v46 = vpop.xlane.xlu1 %897  ;;  %v889_v7 = vpop.xlane.xlu0 %888  ;;  %3010 = vpow2.f32 %v2656_v47 }
 0x3f9   : > { %v3005_v53 = vpop.eup %3004  ;;  %v2657_v55 = vmul.f32 -1.442695, %v889_v7  ;;  %3012 = vpow2.f32 %v2658_v37  ;;  %v2660_v63 = vmul.f32 -1.442695, %v898_v46 }
 0x3fa   : > { %v3007_v32 = vpop.eup %3006  ;;  %v972_v56 = vadd.f32 1.0, %v3005_v53 }
 0x3fb   : > { %v971_v62 = vadd.f32 1.0, %v3007_v32  ;;  %3014 = vpow2.f32 %v2657_v55 }
 0x3fc   : > { %v895_v48 = vpop.xlane.xlu1 %894  ;;  %3016 = vrcp.f32 %v972_v56 }
 0x3fd   : > { %v901_v54 = vpop.xlane.xlu0 %900  ;;  %v2659_v6 = vmul.f32 -1.442695, %v895_v48  ;;  %3018 = vrcp.f32 %v971_v62 }
 0x3fe   : > { %v2661_v15 = vmul.f32 -1.442695, %v901_v54  ;;  %3020 = vpow2.f32 %v2660_v63 }
 0x400   : > { %v904_v61 = vpop.xlane.xlu1 %903 }
 0x401   : > { %v3009_v3 = vpop.eup %3008  ;;  %v2662_v13 = vmul.f32 -1.442695, %v904_v61  ;;  %v907_v12 = vpop.xlane.xlu0 %906 }
 0x402   : > { %v3011_v14 = vpop.eup %3010  ;;  %v973_v29 = vadd.f32 1.0, %v3009_v3  ;;  %v2663_v30 = vmul.f32 -1.442695, %v907_v12 }
 0x403   : > { %3022 = vpow2.f32 %v2662_v13  ;;  %v974_v31 = vadd.f32 1.0, %v3011_v14  ;;  %v3013_v28 = vpop.eup %3012 }
 0x404   : > { %v910_v4 = vpop.xlane.xlu1 %909  ;;  %3024 = vpow2.f32 %v2659_v6  ;;  %v976_v48 = vadd.f32 1.0, %v3013_v28 }
 0x405   : > { %3026 = vpow2.f32 %v2661_v15  ;;  %v2664_v23 = vmul.f32 -1.442695, %v910_v4  ;;  %v3015_v38 = vpop.eup %3014  ;;  %v916_v63 = vpop.xlane.xlu0 %915 }
 0x406   : > { %3028 = vrcp.f32 %v973_v29  ;;  %v3797_v39 = vpop.eup %3016  ;;  %v975_v47 = vadd.f32 1.0, %v3015_v38 }
 0x407   : > { %3030 = vpow2.f32 %v2663_v30  ;;  %v3799_v40 = vpop.eup %3018  ;;  %v1021_v56 = vmul.f32 %v3797_v39, %v3517_v2  ;;  %v1022_v12 = vmul.f32 %v3797_v39, %v3524_v5 }
 0x408   : > { %3032 = vrcp.f32 %v974_v31  ;;  %v3021_v45 = vpop.eup %3020  ;;  %v1019_v61 = vmul.f32 %v3799_v40, %v3511_v0  ;;  %v913_v13 = vpop.xlane.xlu1 %912  ;;  %v1020_v0 = vmul.f32 %v3799_v40, %v3514_v1  ;;  %v2666_v1 = vmul.f32 -1.442695, %v916_v63 }
 0x409   : > { %3034 = vpow2.f32 %v2664_v23  ;;  %v978_v29 = vadd.f32 1.0, %v3021_v45 }
 0x40a   : > { %3036 = vrcp.f32 %v975_v47  ;;  %v1054_v28 = vadd.f32 %v1022_v12, %v1020_v0 }
 0x40b   : > { %3038 = vrcp.f32 %v976_v48 }
 0x40d   : > { %v3023_v46 = vpop.eup %3022 }
 0x40e   : > { %v3025_v21 = vpop.eup %3024  ;;  %v980_v32 = vadd.f32 1.0, %v3023_v46  ;;  %v922_v46 = vpop.xlane.xlu1 %921 }
 0x40f   : > { %v3027_v7 = vpop.eup %3026  ;;  %v977_v54 = vadd.f32 1.0, %v3025_v21 }
 0x410   : > { %v3801_v53 = vpop.eup %3028  ;;  %v979_v62 = vadd.f32 1.0, %v3027_v7  ;;  %3040 = vrcp.f32 %v980_v32 }
 0x411   : > { %v3031_v37 = vpop.eup %3030  ;;  %v1023_v3 = vmul.f32 %v3801_v53, %v3531_v8  ;;  %v1024_v14 = vmul.f32 %v3801_v53, %v3534_v9  ;;  %3042 = vrcp.f32 %v977_v54  ;;  %v1045_v8 = vadd.f32 %v1021_v56, %v1019_v61  ;;  %v919_v9 = vpop.xlane.xlu0 %918 }
 0x412   : > { %v3803_v55 = vpop.eup %3032  ;;  %v981_v2 = vadd.f32 1.0, %v3031_v37  ;;  %3044 = vrcp.f32 %v979_v62  ;;  %v2667_v7 = vmul.f32 -1.442695, %v919_v9  ;;  %v2668_v37 = vmul.f32 -1.442695, %v922_v46 }
 0x413   : > { %v3035_v6 = vpop.eup %3034  ;;  %v1025_v15 = vmul.f32 %v3803_v55, %v3537_v10  ;;  %v1026_v30 = vmul.f32 %v3803_v55, %v3540_v11  ;;  %v1027_v4 = vmax.f32 %v1019_v61, %v1023_v3  ;;  %v1036_v31 = vmax.f32 %v1020_v0, %v1024_v14 }
 0x414   : > { %v982_v5 = vadd.f32 1.0, %v3035_v6  ;;  %v1046_v23 = vadd.f32 %v1045_v8, %v1023_v3  ;;  %3046 = vrcp.f32 %v981_v2  ;;  %v2665_v10 = vmul.f32 -1.442695, %v913_v13  ;;  %v3821_v48 = vpop.eup %3036 }
 0x415   : > { %v1028_v38 = vmax.f32 %v1021_v56, %v1025_v15  ;;  %3048 = vrcp.f32 %v978_v29  ;;  %v1037_v21 = vmax.f32 %v1022_v12, %v1026_v30  ;;  %v1055_v47 = vadd.f32 %v1054_v28, %v1024_v14  ;;  %v3823_v54 = vpop.eup %3038 }
 0x416   : > { %3050 = vrcp.f32 %v982_v5  ;;  %v1047_v32 = vadd.f32 %v1046_v23, %v1025_v15  ;;  %v1065_v3 = vmul.f32 %v3821_v48, %v3551_v16  ;;  %v1066_v14 = vmul.f32 %v3821_v48, %v3554_v17 }
 0x417   : > { %v1029_v45 = vmax.f32 %v1027_v4, %v1028_v38  ;;  %v1038_v11 = vmax.f32 %v1036_v31, %v1037_v21  ;;  %3052 = vpow2.f32 %v2666_v1  ;;  %v1056_v63 = vadd.f32 %v1055_v47, %v1026_v30 }
 0x418   : > { %3054 = vpow2.f32 %v2665_v10  ;;  %v1048_v12 = vrot.slane %v1047_v32, 4  ;;  %v1067_v16 = vmul.f32 %v3823_v54, %v3557_v18  ;;  %v1068_v29 = vmul.f32 %v3823_v54, %v3560_v19 }
 0x419   : > { %v1030_v62 = vrot.slane %v1029_v45, 4  ;;  %3056 = vpow2.f32 %v2667_v7  ;;  %v1039_v6 = vrot.slane %v1038_v11, 4  ;;  %v1057_v4 = vrot.slane %v1056_v63, 4 }
 0x41a   : > { %v3825_v61 = vpop.eup %3040  ;;  %3058 = vpow2.f32 %v2668_v37  ;;  %v1049_v31 = vadd.f32 %v1048_v12, %v1047_v32  ;;  %v1093_v23 = vadd.f32 %v1067_v16, %v1065_v3  ;;  %v1102_v19 = vadd.f32 %v1068_v29, %v1066_v14 }
 0x41b   : > { %4583 = vst [vmem:[#allocation14_spill] sm:$0xff] %v3825_v61  ;;  %v3827_v56 = vpop.eup %3042  ;;  %v3837_v2 = vmul.f32 %v3825_v61, %v3597_v35  ;;  %v3841_v0 = vmul.f32 %v3825_v61, %v3600_v36  ;;  %v1031_v30 = vmax.f32 %v1029_v45, %v1030_v62  ;;  %v1040_v18 = vmax.f32 %v1038_v11, %v1039_v6 }
 0x41c   : > { %v3831_v13 = vpop.eup %3044  ;;  %v1069_v17 = vmul.f32 %v3827_v56, %v3571_v24  ;;  %v1070_v8 = vmul.f32 %v3827_v56, %v3574_v25  ;;  %v1058_v45 = vadd.f32 %v1057_v4, %v1056_v63 }
 0x41d   : > { %v1113_v36 = vmul.f32 %v3831_v13, %v3591_v33  ;;  %v1114_v5 = vmul.f32 %v3831_v13, %v3594_v34  ;;  %v1032_v10 = vrot.slane %v1031_v30, 2  ;;  %v1041_v11 = vrot.slane %v1040_v18, 2 }
 0x41e   : > { %v3843_v15 = vpop.eup %3046  ;;  %v1094_v1 = vadd.f32 %v1093_v23, %v1069_v17  ;;  %v1103_v46 = vadd.f32 %v1102_v19, %v1070_v8  ;;  %v1073_v32 = vmax.f32 %v1065_v3, %v1069_v17  ;;  %v1082_v37 = vmax.f32 %v1066_v14, %v1070_v8 }
 0x41f   : > { %4584 = vst [vmem:[#allocation15_spill] sm:$0xff] %v3843_v15  ;;  %v3853_v35 = vpop.eup %3048  ;;  %v1141_v24 = vadd.f32 %v3837_v2, %v1113_v36  ;;  %v1150_v25 = vadd.f32 %v3841_v0, %v1114_v5  ;;  %v1117_v28 = vmul.f32 %v3843_v15, %v3611_v41  ;;  %v1118_v38 = vmul.f32 %v3843_v15, %v3614_v42 }
 0x420   : > { %v3859_v9 = vpop.eup %3050  ;;  %v1071_v33 = vmul.f32 %v3853_v35, %v3577_v26  ;;  %v1072_v34 = vmul.f32 %v3853_v35, %v3580_v27  ;;  %v1050_v42 = vrot.slane %v1049_v31, 2 }
 0x421   : > { %4585 = vst [vmem:[#allocation16_spill] sm:$0xff] %v3859_v9  ;;  %v3053_v21 = vpop.eup %3052  ;;  %v1119_v47 = vmul.f32 %v3859_v9, %v3617_v43  ;;  %v1120_v41 = vmul.f32 %v3859_v9, %v3620_v44  ;;  %v1142_v62 = vadd.f32 %v1141_v24, %v1117_v28  ;;  %v1151_v6 = vadd.f32 %v1150_v25, %v1118_v38 }
 0x422   : > { %v3055_v7 = vpop.eup %3054  ;;  %v984_v27 = vadd.f32 1.0, %v3053_v21  ;;  %v1074_v19 = vmax.f32 %v1067_v16, %v1071_v33  ;;  %v1083_v20 = vmax.f32 %v1068_v29, %v1072_v34  ;;  %v1095_v63 = vadd.f32 %v1094_v1, %v1071_v33 }
 0x423   : > { %v3057_v26 = vpop.eup %3056  ;;  %v983_v12 = vadd.f32 1.0, %v3055_v7  ;;  %v1104_v4 = vadd.f32 %v1103_v46, %v1072_v34  ;;  %v1122_v43 = vmax.f32 %v3837_v2, %v1119_v47  ;;  %v1131_v15 = vmax.f32 %v3841_v0, %v1120_v41 }
 0x424   : > { %v3059_v23 = vpop.eup %3058  ;;  %3060 = vrcp.f32 %v984_v27  ;;  %v985_v44 = vadd.f32 1.0, %v3057_v26  ;;  %v1075_v9 = vmax.f32 %v1073_v32, %v1074_v19  ;;  %v1084_v61 = vmax.f32 %v1082_v37, %v1083_v20 }
 0x425   : > { %v1121_v3 = vmax.f32 %v1113_v36, %v1117_v28  ;;  %v1130_v14 = vmax.f32 %v1114_v5, %v1118_v38  ;;  %v1143_v17 = vadd.f32 %v1142_v62, %v1119_v47  ;;  %v1152_v8 = vadd.f32 %v1151_v6, %v1120_v41 }
 0x426   : > { %3062 = vrcp.f32 %v983_v12  ;;  %v986_v24 = vadd.f32 1.0, %v3059_v23  ;;  %v1033_v25 = vmax.f32 %v1031_v30, %v1032_v10  ;;  %v1042_v21 = vmax.f32 %v1040_v18, %v1041_v11 }
 0x427   : > { %v1059_v16 = vrot.slane %v1058_v45, 2  ;;  %v1096_v29 = vrot.slane %v1095_v63, 4  ;;  %v1105_v33 = vrot.slane %v1104_v4, 4  ;;  %v1123_v34 = vmax.f32 %v1121_v3, %v1122_v43 }
 0x428   : > { %v1132_v1 = vmax.f32 %v1130_v14, %v1131_v15  ;;  %3064 = vrcp.f32 %v985_v44  ;;  %v1076_v2 = vrot.slane %v1075_v9, 4  ;;  %v1085_v0 = vrot.slane %v1084_v61, 4 }
 0x429   : > { %v1144_v46 = vrot.slane %v1143_v17, 4  ;;  %v1153_v7 = vrot.slane %v1152_v8, 4  ;;  %3066 = vrcp.f32 %v986_v24  ;;  %v1034_v20 = vrot.slane %v1033_v25, 1 }
 0x42a   : > { %v1043_v36 = vrot.slane %v1042_v21, 1  ;;  %v1051_v5 = vadd.f32 %v1050_v42, %v1049_v31  ;;  %v1060_v28 = vadd.f32 %v1059_v16, %v1058_v45  ;;  %v1097_v38 = vadd.f32 %v1096_v29, %v1095_v63 }
 0x42b   : > { %v1106_v47 = vadd.f32 %v1105_v33, %v1104_v4  ;;  %v1124_v41 = vrot.slane %v1123_v34, 4  ;;  %v1133_v30 = vrot.slane %v1132_v1, 4  ;;  %v4586_v18 = vlaneseq }
 0x42c   : > { %v1077_v15 = vmax.f32 %v1075_v9, %v1076_v2  ;;  %v1086_v32 = vmax.f32 %v1084_v61, %v1085_v0  ;;  %v1145_v37 = vadd.f32 %v1144_v46, %v1143_v17  ;;  %v1154_v26 = vadd.f32 %v1153_v7, %v1152_v8 }
 0x42d   : > { %v3878_v10 = vshrl.u32 %v4586_v18, 7  ;;  %v3882_v62 = vmax.f32 %v1033_v25, %v1034_v20  ;;  %v3884_v6 = vmax.f32 %v1042_v21, %v1043_v36  ;;  %v1052_v27 = vrot.slane %v1051_v5, 1 }
 0x42e   : > { %v3880_v11 = vpop.eup %3060  ;;  %v1061_v31 = vrot.slane %v1060_v28, 1  ;;  %v1098_v42 = vrot.slane %v1097_v38, 2  ;;  %v1107_v12 = vrot.slane %v1106_v47, 2  ;;  %v1125_v23 = vmax.f32 %v1123_v34, %v1124_v41 }
 0x42f   : > { %v1134_v19 = vmax.f32 %v1132_v1, %v1133_v30  ;;  %v1163_v63 = vmul.f32 %v3880_v11, %v3637_v51  ;;  %v1164_v61 = vmul.f32 %v3880_v11, %v3640_v52  ;;  %v1078_v44 = vrot.slane %v1077_v15, 2 }
 0x430   : > { %v3886_v45 = vpop.eup %3062  ;;  %v1087_v3 = vrot.slane %v1086_v32, 2  ;;  %v1146_v14 = vrot.slane %v1145_v37, 2  ;;  %v1155_v17 = vrot.slane %v1154_v26, 2  ;;  %v1062_v21 = vadd.f32 %v1061_v31, %v1060_v28 }
 0x431   : > { %v1161_v9 = vmul.f32 %v3886_v45, %v3631_v49  ;;  %v1162_v4 = vmul.f32 %v3886_v45, %v3634_v50  ;;  %v1053_v49 = vadd.f32 %v1052_v27, %v1051_v5  ;;  %v1099_v16 = vadd.f32 %v1098_v42, %v1097_v38 }
 0x432   : > { %v3896_v43 = vpop.eup %3064  ;;  %v1108_v50 = vadd.f32 %v1107_v12, %v1106_v47  ;;  %v1126_v29 = vrot.slane %v1125_v23, 2  ;;  %v1135_v33 = vrot.slane %v1134_v19, 2  ;;  %v1079_v2 = vmax.f32 %v1077_v15, %v1078_v44 }
 0x433   : > { %v1189_v8 = vadd.f32 %v1163_v63, %v1161_v9  ;;  %v1198_v24 = vadd.f32 %v1164_v61, %v1162_v4  ;;  %v1165_v51 = vmul.f32 %v3896_v43, %v3651_v57  ;;  %v1166_v52 = vmul.f32 %v3896_v43, %v3654_v58  ;;  %v3902_v25 = vpop.eup %3066 }
 0x434   : > { %v1088_v0 = vmax.f32 %v1086_v32, %v1087_v3  ;;  %v1167_v46 = vmul.f32 %v3902_v25, %v3657_v59  ;;  %v1168_v57 = vmul.f32 %v3902_v25, %v3660_v60  ;;  %v1147_v7 = vadd.f32 %v1146_v14, %v1145_v37 }
 0x435   : > { %v1190_v34 = vadd.f32 %v1189_v8, %v1165_v51  ;;  %v1199_v1 = vadd.f32 %v1198_v24, %v1166_v52  ;;  %v1156_v58 = vadd.f32 %v1155_v17, %v1154_v26  ;;  %v1169_v20 = vmax.f32 %v1161_v9, %v1165_v51 }
 0x436   : > { %v1178_v36 = vmax.f32 %v1162_v4, %v1166_v52  ;;  %v1170_v5 = vmax.f32 %v1163_v63, %v1167_v46  ;;  %v1179_v28 = vmax.f32 %v1164_v61, %v1168_v57  ;;  %v1100_v41 = vrot.slane %v1099_v16, 1 }
 0x437   : > { %v1191_v38 = vadd.f32 %v1190_v34, %v1167_v46  ;;  %v1200_v47 = vadd.f32 %v1199_v1, %v1168_v57  ;;  %v1109_v30 = vrot.slane %v1108_v50, 1  ;;  %v1127_v27 = vmax.f32 %v1125_v23, %v1126_v29 }
 0x438   : > { %v1136_v31 = vmax.f32 %v1134_v19, %v1135_v33  ;;  %v1171_v15 = vmax.f32 %v1169_v20, %v1170_v5  ;;  %v1180_v32 = vmax.f32 %v1178_v36, %v1179_v28  ;;  %v1080_v59 = vrot.slane %v1079_v2, 1 }
 0x439   : > { %v1192_v42 = vrot.slane %v1191_v38, 4  ;;  %v1201_v12 = vrot.slane %v1200_v47, 4  ;;  %v1089_v44 = vrot.slane %v1088_v0, 1  ;;  %v1148_v3 = vrot.slane %v1147_v7, 1 }
 0x43a   : > { %v1157_v60 = vrot.slane %v1156_v58, 1  ;;  %v1172_v37 = vrot.slane %v1171_v15, 4  ;;  %v1181_v26 = vrot.slane %v1180_v32, 4  ;;  %v1101_v63 = vadd.f32 %v1100_v41, %v1099_v16 }
 0x43b   : > { %v1193_v9 = vadd.f32 %v1192_v42, %v1191_v38  ;;  %v1202_v4 = vadd.f32 %v1201_v12, %v1200_v47  ;;  %v1110_v61 = vadd.f32 %v1109_v30, %v1108_v50  ;;  %v1128_v14 = vrot.slane %v1127_v27, 1 }
 0x43c   : > { %v1137_v17 = vrot.slane %v1136_v31, 1  ;;  %v1173_v8 = vmax.f32 %v1171_v15, %v1172_v37  ;;  %v1182_v24 = vmax.f32 %v1180_v32, %v1181_v26  ;;  %v1081_v51 = vmax.f32 %v1079_v2, %v1080_v59 }
 0x43d   : > { %v1194_v23 = vrot.slane %v1193_v9, 2  ;;  %v1203_v19 = vrot.slane %v1202_v4, 2  ;;  %v1090_v52 = vmax.f32 %v1088_v0, %v1089_v44  ;;  %v1149_v29 = vadd.f32 %v1148_v3, %v1147_v7 }
 0x43e   : > { %v1158_v33 = vadd.f32 %v1157_v60, %v1156_v58  ;;  %v1174_v34 = vrot.slane %v1173_v8, 2  ;;  %v1183_v1 = vrot.slane %v1182_v24, 2  ;;  %v1111_v20 = vadd.f32 %v1101_v63, %v1053_v49 }
 0x43f   : > { %v1195_v46 = vadd.f32 %v1194_v23, %v1193_v9  ;;  %v1204_v57 = vadd.f32 %v1203_v19, %v1202_v4  ;;  %v1112_v36 = vadd.f32 %v1110_v61, %v1062_v21  ;;  %v1129_v5 = vmax.f32 %v1127_v27, %v1128_v14 }
 0x440   : > { %v1138_v28 = vmax.f32 %v1136_v31, %v1137_v17  ;;  %v1175_v16 = vmax.f32 %v1173_v8, %v1174_v34  ;;  %v1184_v50 = vmax.f32 %v1182_v24, %v1183_v1  ;;  %v1091_v41 = vmax.f32 %v3882_v62, %v1081_v51  ;;  %v1245_v34 = vld [vmem:[#allocation5 + $0x4] sm:$0xf] }
 0x441   : > { %v1196_v38 = vrot.slane %v1195_v46, 1  ;;  %v1205_v47 = vrot.slane %v1204_v57, 1  ;;  %v1092_v30 = vmax.f32 %v3884_v6, %v1090_v52  ;;  %v1159_v2 = vadd.f32 %v1149_v29, %v1111_v20 }
 0x442   : > { %v1160_v0 = vadd.f32 %v1158_v33, %v1112_v36  ;;  %v1176_v7 = vrot.slane %v1175_v16, 1  ;;  %v1185_v58 = vrot.slane %v1184_v50, 1  ;;  %v1139_v42 = vmax.f32 %v1091_v41, %v1129_v5  ;;  %v1223_v33 = vld [vmem:[#allocation5] sm:$0xf] }
 0x443   : > { %v1197_v15 = vadd.f32 %v1196_v38, %v1195_v46  ;;  %v1206_v32 = vadd.f32 %v1205_v47, %v1204_v57  ;;  %v1140_v12 = vmax.f32 %v1092_v30, %v1138_v28  ;;  %vm1213_vm4 = vcmp.eq.s32.totalorder %v3878_v10, 0 }
 0x444   : > { %v1177_v49 = vmax.f32 %v1175_v16, %v1176_v7  ;;  %v1186_v21 = vmax.f32 %v1184_v50, %v1185_v58  ;;  %v3300_v37 = vmov 1983009808   ;;  %v1267_v50 = vld [vmem:[#allocation5 + $0x8] sm:$0xf] }
 0x445   : > { %v1207_v27 = vadd.f32 %v1197_v15, %v1159_v2  ;;  %v1208_v31 = vadd.f32 %v1206_v32, %v1160_v0  ;;  %v1228_v26 = vunpack.c.l.s4 %v3300_v37  ;;  %v1289_v15 = vld [vmem:[#allocation5 + $0xc] sm:$0xf] }
 0x446   : > { %v1187_v59 = vmax.f32 %v1139_v42, %v1177_v49  ;;  %v1188_v44 = vmax.f32 %v1140_v12, %v1186_v21 }
 0x447   : > { %v1209_v3 = vmul.f32 0.0078125, %v1207_v27  ;;  %v1210_v62 = vmul.f32 0.0078125, %v1208_v31  ;;  %v1229_v9 = vunpack.c.0.s8 %v1228_v26 }
 0x449   : > { %v3911_v60 = vsel %vm1213_vm4, %v1187_v59, %v1209_v3  ;;  %v3913_v6 = vsel %vm1213_vm4, %v1188_v44, %v1210_v62  ;;  %v3980_v8 = vsub.s32 %v1229_v9, %v3878_v10  ;;  %v1311_v44 = vld [vmem:[#allocation5 + $0x10] sm:$0xf]  ;;  %vm1549_vm4 = vcmp.lt.s32.totalorder %v3672_v22, 18 }
 0x44a   : > { %1218 = vrot.lane.b32.xlu1 %v3913_v6, %s3272_s13  ;;  %1216 = vrot.lane.b32.xlu0 %v3911_v60, %s3272_s13  ;;  %s3285_s13 = smov 29  }
 0x44e   : > { %1237 = vrot.lane.b32.xlu1 %v3911_v60, %s3273_s28  ;;  %1239 = vrot.lane.b32.xlu0 %v3913_v6, %s3273_s28  ;;  %s3286_s28 = smov 19  }
 0x452   : > { %1259 = vrot.lane.b32.xlu1 %v3911_v60, %s3274_s16  ;;  %1261 = vrot.lane.b32.xlu0 %v3913_v6, %s3274_s16  ;;  %s3287_s16 = smov 18  }
 0x456   : > { %1281 = vrot.lane.b32.xlu1 %v3911_v60, %s3275_s17  ;;  %1283 = vrot.lane.b32.xlu0 %v3913_v6, %s3275_s17  ;;  %s3288_s17 = smov 17  }
 0x45a   : > { %1303 = vrot.lane.b32.xlu1 %v3911_v60, %s3276_s11  ;;  %1305 = vrot.lane.b32.xlu0 %v3913_v6, %s3276_s11  ;;  %s3289_s11 = smov 16  }
 0x45e   : > { %1325 = vrot.lane.b32.xlu1 %v3911_v60, %s3277_s24  ;;  %1327 = vrot.lane.b32.xlu0 %v3913_v6, %s3277_s24  ;;  %s3290_s24 = smov 15  }
 0x462   : > { %1347 = vrot.lane.b32.xlu1 %v3911_v60, %s3278_s26  ;;  %1349 = vrot.lane.b32.xlu0 %v3913_v6, %s3278_s26  ;;  %s3291_s26 = smov 14  }
 0x466   : > { %1369 = vrot.lane.b32.xlu1 %v3911_v60, %s3279_s14  ;;  %1371 = vrot.lane.b32.xlu0 %v3913_v6, %s3279_s14  ;;  %s3292_s14 = smov 13  }
 0x46a   : > { %1391 = vrot.lane.b32.xlu1 %v3911_v60, %s3280_s6  ;;  %1393 = vrot.lane.b32.xlu0 %v3913_v6, %s3280_s6  ;;  %s3293_s6 = smov 3  }
 0x46e   : > { %1413 = vrot.lane.b32.xlu1 %v3911_v60, %s3281_s7  ;;  %1415 = vrot.lane.b32.xlu0 %v3913_v6, %s3281_s7  ;;  %s3294_s7 = smov 2  }
 0x472   : > { %1435 = vrot.lane.b32.xlu1 %v3911_v60, %s3282_s15  ;;  %1437 = vrot.lane.b32.xlu0 %v3913_v6, %s3282_s15  ;;  %s3295_s15 = smov 1  }
 0x476   : > { %1457 = vrot.lane.b32.xlu1 %v3911_v60, %s3283_s10  ;;  %1459 = vrot.lane.b32.xlu0 %v3913_v6, %s3283_s10  ;;  %s3296_s10 = smov 127  }
 0x47a   : > { %1479 = vrot.lane.b32.xlu1 %v3911_v60, %s3284_s29  ;;  %1481 = vrot.lane.b32.xlu0 %v3913_v6, %s3284_s29  ;;  %s3297_s29 = smov 126  }
 0x47e   : > { %1501 = vrot.lane.b32.xlu1 %v3911_v60, %s3285_s13  ;;  %1503 = vrot.lane.b32.xlu0 %v3913_v6, %s3285_s13  ;;  %s3298_s13 = smov 125  }
 0x482   : > { %1523 = vrot.lane.b32.xlu1 %v3911_v60, %s3286_s28  ;;  %1525 = vrot.lane.b32.xlu0 %v3913_v6, %s3286_s28  ;;  %s3299_s28 = smov 115  }
 0x486   : > { %1545 = vrot.lane.b32.xlu1 %v3911_v60, %s3287_s16  ;;  %1547 = vrot.lane.b32.xlu0 %v3913_v6, %s3287_s16  ;;  %s3301_s16 = smov 114  }
 0x48a   : > { %1567 = vrot.lane.b32.xlu1 %v3911_v60, %s3288_s17  ;;  %1569 = vrot.lane.b32.xlu0 %v3913_v6, %s3288_s17  ;;  %s3302_s17 = smov 113  }
 0x48e   : > { %1589 = vrot.lane.b32.xlu1 %v3911_v60, %s3289_s11  ;;  %1591 = vrot.lane.b32.xlu0 %v3913_v6, %s3289_s11 }
 0x492   : > { %1611 = vrot.lane.b32.xlu1 %v3911_v60, %s3290_s24  ;;  %1613 = vrot.lane.b32.xlu0 %v3913_v6, %s3290_s24  ;;  %s3303_s24 = smov 112  }
 0x496   : > { %1633 = vrot.lane.b32.xlu1 %v3911_v60, %s3291_s26  ;;  %1635 = vrot.lane.b32.xlu0 %v3913_v6, %s3291_s26  ;;  %s3304_s26 = smov 111  }
 0x49a   : > { %1655 = vrot.lane.b32.xlu1 %v3911_v60, %s3292_s14  ;;  %1657 = vrot.lane.b32.xlu0 %v3913_v6, %s3292_s14  ;;  %s3305_s14 = smov 110  }
 0x49e   : > { %1677 = vrot.lane.b32.xlu1 %v3911_v60, %s3293_s6  ;;  %1679 = vrot.lane.b32.xlu0 %v3913_v6, %s3293_s6  ;;  %s3306_s6 = smov 109  }
 0x4a2   : > { %1699 = vrot.lane.b32.xlu1 %v3911_v60, %s3294_s7  ;;  %1701 = vrot.lane.b32.xlu0 %v3913_v6, %s3294_s7  ;;  %s3307_s7 = smov 99  }
 0x4a6   : > { %1721 = vrot.lane.b32.xlu1 %v3911_v60, %s3295_s15  ;;  %1723 = vrot.lane.b32.xlu0 %v3913_v6, %s3295_s15  ;;  %s3308_s15 = smov 98  }
 0x4aa   : > { %1758 = vrot.lane.b32.xlu1 %v3911_v60, %s3296_s10  ;;  %1760 = vrot.lane.b32.xlu0 %v3913_v6, %s3296_s10  ;;  %s3309_s10 = smov 97  }
 0x4ae   : > { %1780 = vrot.lane.b32.xlu1 %v3911_v60, %s3297_s29  ;;  %1782 = vrot.lane.b32.xlu0 %v3913_v6, %s3297_s29  ;;  %s3310_s29 = smov 96  }
 0x4b2   : > { %1802 = vrot.lane.b32.xlu1 %v3911_v60, %s3298_s13  ;;  %1804 = vrot.lane.b32.xlu0 %v3913_v6, %s3298_s13  ;;  %s3311_s13 = smov 95  }
 0x4b6   : > { %1824 = vrot.lane.b32.xlu1 %v3911_v60, %s3299_s28  ;;  %1826 = vrot.lane.b32.xlu0 %v3913_v6, %s3299_s28  ;;  %s3312_s28 = smov 94  }
 0x4ba   : > { %1846 = vrot.lane.b32.xlu1 %v3911_v60, %s3301_s16  ;;  %1848 = vrot.lane.b32.xlu0 %v3913_v6, %s3301_s16  ;;  %s3313_s16 = smov 93  }
 0x4bc   : > { %v1219_v4 = vpop.permute.xlu1 %1218  ;;  %v1217_v63 = vpop.permute.xlu0 %1216 }
 0x4bd   : > { %v1221_v61 = vsel %vm1220_vm5, %v1217_v63, %v1219_v4  ;;  %v1222_v14 = vsel %vm1220_vm5, %v1219_v4, %v1217_v63  ;;  %vm1571_vm5 = vcmp.lt.s32.totalorder %v3672_v22, 17 }
 0x4be   : > { %v1226_v17 = vcombine.low %v1222_v14, %v1221_v61  ;;  %1868 = vrot.lane.b32.xlu1 %v3911_v60, %s3302_s17  ;;  %1870 = vrot.lane.b32.xlu0 %v3913_v6, %s3302_s17  ;;  %v1333_v14 = vld [vmem:[#allocation5 + $0x14] sm:$0xf]  ;;  %s3314_s17 = smov 83  }
 0x4c0   : > { %v1238_v24 = vpop.permute.xlu1 %1237  ;;  %v1240_v23 = vpop.permute.xlu0 %1239  ;;  %v1233_v52 = vrot.slane %v1226_v17, %v3980_v8 }
 0x4c1   : > { %v1242_v19 = vsel %vm1241_vm6, %v1238_v24, %v1240_v23  ;;  %v1243_v51 = vsel %vm1241_vm6, %v1240_v23, %v1238_v24  ;;  %vm1593_vm6 = vcmp.lt.s32.totalorder %v3672_v22, 16 }
 0x4c2   : > { %v1248_v29 = vcombine.low %v1243_v51, %v1242_v19  ;;  %1890 = vrot.lane.b32.xlu1 %v3911_v60, %s3303_s24  ;;  %1892 = vrot.lane.b32.xlu0 %v3913_v6, %s3303_s24  ;;  %v1235_v5 = vmul.f32 %v1233_v52, %v1223_v33  ;;  %s3315_s24 = smov 82  }
 0x4c4   : > { %v1255_v1 = vrot.slane %v1248_v29, %v3980_v8  ;;  %v1260_v46 = vpop.permute.xlu1 %1259  ;;  %v1262_v57 = vpop.permute.xlu0 %1261 }
 0x4c5   : > { %v1264_v20 = vsel %vm1263_vm7, %v1260_v46, %v1262_v57  ;;  %v1265_v36 = vsel %vm1263_vm7, %v1262_v57, %v1260_v46  ;;  %vm1615_vm7 = vcmp.lt.s32.totalorder %v3672_v22, 15 }
 0x4c6   : > { %v1257_v28 = vmul.f32 %v1255_v1, %v1245_v34  ;;  %v1270_v16 = vcombine.low %v1265_v36, %v1264_v20  ;;  %1912 = vrot.lane.b32.xlu1 %v3911_v60, %s3304_s26  ;;  %1914 = vrot.lane.b32.xlu0 %v3913_v6, %s3304_s26  ;;  %v1355_v34 = vld [vmem:[#allocation5 + $0x18] sm:$0xf]  ;;  %s3316_s26 = smov 81  }
 0x4c8   : > { %v1258_v38 = vadd.f32 %v1257_v28, %v1235_v5  ;;  %v1277_v47 = vrot.slane %v1270_v16, %v3980_v8  ;;  %v1282_v41 = vpop.permute.xlu1 %1281  ;;  %v1284_v30 = vpop.permute.xlu0 %1283 }
 0x4c9   : > { %v1286_v2 = vsel %vm1285_vm8, %v1282_v41, %v1284_v30  ;;  %v1287_v0 = vsel %vm1285_vm8, %v1284_v30, %v1282_v41  ;;  %vm1637_vm8 = vcmp.lt.s32.totalorder %v3672_v22, 14 }
 0x4ca   : > { %v1279_v7 = vmul.f32 %v1277_v47, %v1267_v50  ;;  %v1292_v58 = vcombine.low %v1287_v0, %v1286_v2  ;;  %1934 = vrot.lane.b32.xlu1 %v3911_v60, %s3305_s14  ;;  %1936 = vrot.lane.b32.xlu0 %v3913_v6, %s3305_s14  ;;  %v1377_v50 = vld [vmem:[#allocation5 + $0x1c] sm:$0xf]  ;;  %s3317_s14 = smov 80  }
 0x4cc   : > { %v1280_v32 = vadd.f32 %v1279_v7, %v1258_v38  ;;  %v1299_v42 = vrot.slane %v1292_v58, %v3980_v8  ;;  %v1304_v12 = vpop.permute.xlu1 %1303  ;;  %v1306_v49 = vpop.permute.xlu0 %1305 }
 0x4cd   : > { %v1308_v21 = vsel %vm1307_vm9, %v1304_v12, %v1306_v49  ;;  %v1309_v27 = vsel %vm1307_vm9, %v1306_v49, %v1304_v12  ;;  %vm1659_vm9 = vcmp.lt.s32.totalorder %v3672_v22, 13 }
 0x4ce   : > { %v1301_v31 = vmul.f32 %v1299_v42, %v1289_v15  ;;  %v1314_v59 = vcombine.low %v1309_v27, %v1308_v21  ;;  %1956 = vrot.lane.b32.xlu1 %v3911_v60, %s3306_s6  ;;  %1958 = vrot.lane.b32.xlu0 %v3913_v6, %s3306_s6  ;;  %v1399_v15 = vld [vmem:[#allocation5 + $0x20] sm:$0xf]  ;;  %s3318_s6 = smov 79  }
 0x4d0   : > { %v1302_v3 = vadd.f32 %v1301_v31, %v1280_v32  ;;  %v1321_v62 = vrot.slane %v1314_v59, %v3980_v8  ;;  %v1326_v37 = vpop.permute.xlu1 %1325  ;;  %v1328_v26 = vpop.permute.xlu0 %1327 }
 0x4d1   : > { %v1330_v9 = vsel %vm1329_vm10, %v1326_v37, %v1328_v26  ;;  %v1331_v4 = vsel %vm1329_vm10, %v1328_v26, %v1326_v37  ;;  %vm1681_vm10 = vcmp.lt.s32.totalorder %v3672_v22, 3 }
 0x4d2   : > { %v1323_v63 = vmul.f32 %v1321_v62, %v1311_v44  ;;  %v1336_v61 = vcombine.low %v1331_v4, %v1330_v9  ;;  %1978 = vrot.lane.b32.xlu1 %v3911_v60, %s3307_s7  ;;  %1980 = vrot.lane.b32.xlu0 %v3913_v6, %s3307_s7  ;;  %v1421_v44 = vld [vmem:[#allocation5 + $0x24] sm:$0xf]  ;;  %s3319_s7 = smov 78  }
 0x4d4   : > { %v1324_v17 = vadd.f32 %v1323_v63, %v1302_v3  ;;  %v1343_v24 = vrot.slane %v1336_v61, %v3980_v8  ;;  %v1348_v23 = vpop.permute.xlu1 %1347  ;;  %v1350_v19 = vpop.permute.xlu0 %1349 }
 0x4d5   : > { %v1352_v51 = vsel %vm1351_vm11, %v1348_v23, %v1350_v19  ;;  %v1353_v52 = vsel %vm1351_vm11, %v1350_v19, %v1348_v23  ;;  %vm1703_vm11 = vcmp.lt.s32.totalorder %v3672_v22, 2 }
 0x4d6   : > { %v1345_v29 = vmul.f32 %v1343_v24, %v1333_v14  ;;  %v1358_v33 = vcombine.low %v1353_v52, %v1352_v51  ;;  %2000 = vrot.lane.b32.xlu1 %v3911_v60, %s3308_s15  ;;  %2002 = vrot.lane.b32.xlu0 %v3913_v6, %s3308_s15  ;;  %v1443_v14 = vld [vmem:[#allocation5 + $0x28] sm:$0xf]  ;;  %s3320_s15 = smov 77  }
 0x4d8   : > { %v1346_v1 = vadd.f32 %v1345_v29, %v1324_v17  ;;  %v1365_v46 = vrot.slane %v1358_v33, %v3980_v8  ;;  %v1370_v57 = vpop.permute.xlu1 %1369  ;;  %v1372_v20 = vpop.permute.xlu0 %1371 }
 0x4d9   : > { %v1374_v36 = vsel %vm1373_vm12, %v1370_v57, %v1372_v20  ;;  %v1375_v5 = vsel %vm1373_vm12, %v1372_v20, %v1370_v57  ;;  %vm1725_vm12 = vcmp.lt.s32.totalorder %v3672_v22, 1 }
 0x4da   : > { %v1367_v28 = vmul.f32 %v1365_v46, %v1355_v34  ;;  %v1380_v16 = vcombine.low %v1375_v5, %v1374_v36  ;;  %2022 = vrot.lane.b32.xlu1 %v3911_v60, %s3309_s10  ;;  %2024 = vrot.lane.b32.xlu0 %v3913_v6, %s3309_s10  ;;  %v1465_v34 = vld [vmem:[#allocation5 + $0x2c] sm:$0xf]  ;;  %s2680_s10 = sshll.u32 %s3376_s22, 12 }
 0x4dc   : > { %v1368_v38 = vadd.f32 %v1367_v28, %v1346_v1  ;;  %v1387_v47 = vrot.slane %v1380_v16, %v3980_v8  ;;  %v1392_v41 = vpop.permute.xlu1 %1391  ;;  %v1394_v30 = vpop.permute.xlu0 %1393 }
 0x4dd   : > { %v1396_v2 = vsel %vm1395_vm13, %v1392_v41, %v1394_v30  ;;  %v1397_v0 = vsel %vm1395_vm13, %v1394_v30, %v1392_v41  ;;  %vm1762_vm13 = vcmp.lt.s32.totalorder %v3672_v22, 127 }
 0x4de   : > { %v1389_v7 = vmul.f32 %v1387_v47, %v1377_v50  ;;  %v1402_v58 = vcombine.low %v1397_v0, %v1396_v2  ;;  %2044 = vrot.lane.b32.xlu1 %v3911_v60, %s3310_s29  ;;  %2046 = vrot.lane.b32.xlu0 %v3913_v6, %s3310_s29  ;;  %v1487_v50 = vld [vmem:[#allocation5 + $0x30] sm:$0xf] }
 0x4e0   : > { %v1390_v32 = vadd.f32 %v1389_v7, %v1368_v38  ;;  %v1409_v42 = vrot.slane %v1402_v58, %v3980_v8  ;;  %v1414_v12 = vpop.permute.xlu1 %1413  ;;  %v1416_v49 = vpop.permute.xlu0 %1415 }
 0x4e1   : > { %v1418_v21 = vsel %vm1417_vm14, %v1414_v12, %v1416_v49  ;;  %v1419_v27 = vsel %vm1417_vm14, %v1416_v49, %v1414_v12  ;;  %vm1784_vm14 = vcmp.lt.s32.totalorder %v3672_v22, 126 }
 0x4e2   : > { %v1411_v31 = vmul.f32 %v1409_v42, %v1399_v15  ;;  %v1424_v59 = vcombine.low %v1419_v27, %v1418_v21  ;;  %2066 = vrot.lane.b32.xlu1 %v3911_v60, %s3311_s13  ;;  %2068 = vrot.lane.b32.xlu0 %v3913_v6, %s3311_s13  ;;  %v1509_v15 = vld [vmem:[#allocation5 + $0x34] sm:$0xf] }
 0x4e4   : > { %v1412_v3 = vadd.f32 %v1411_v31, %v1390_v32  ;;  %v1431_v62 = vrot.slane %v1424_v59, %v3980_v8  ;;  %v1436_v37 = vpop.permute.xlu1 %1435  ;;  %v1438_v26 = vpop.permute.xlu0 %1437 }
 0x4e5   : > { %v1440_v9 = vsel %vm1439_vm15, %v1436_v37, %v1438_v26  ;;  %v1441_v4 = vsel %vm1439_vm15, %v1438_v26, %v1436_v37  ;;  %vm1806_vm15 = vcmp.lt.s32.totalorder %v3672_v22, 125 }
 0x4e6   : > { %v1433_v63 = vmul.f32 %v1431_v62, %v1421_v44  ;;  %v1446_v61 = vcombine.low %v1441_v4, %v1440_v9  ;;  %2088 = vrot.lane.b32.xlu1 %v3911_v60, %s3312_s28  ;;  %2090 = vrot.lane.b32.xlu0 %v3913_v6, %s3312_s28  ;;  %v1531_v44 = vld [vmem:[#allocation5 + $0x38] sm:$0xf] }
 0x4e8   : > { %v1434_v17 = vadd.f32 %v1433_v63, %v1412_v3  ;;  %v1453_v24 = vrot.slane %v1446_v61, %v3980_v8  ;;  %v1458_v23 = vpop.permute.xlu1 %1457  ;;  %v1460_v19 = vpop.permute.xlu0 %1459 }
 0x4e9   : > { %v1462_v51 = vsel %vm1461_vm0, %v1458_v23, %v1460_v19  ;;  %v1463_v52 = vsel %vm1461_vm0, %v1460_v19, %v1458_v23  ;;  %vm1828_vm0 = vcmp.lt.s32.totalorder %v3672_v22, 115 }
 0x4ea   : > { %v1455_v29 = vmul.f32 %v1453_v24, %v1443_v14  ;;  %v1468_v33 = vcombine.low %v1463_v52, %v1462_v51  ;;  %2110 = vrot.lane.b32.xlu1 %v3911_v60, %s3313_s16  ;;  %2112 = vrot.lane.b32.xlu0 %v3913_v6, %s3313_s16  ;;  %s4453_s16 = scalar_lea.hbm %s4559_s4, %s2680_s10 }
 0x4ec   : > { %v1456_v1 = vadd.f32 %v1455_v29, %v1434_v17  ;;  %v1475_v46 = vrot.slane %v1468_v33, %v3980_v8  ;;  %v1480_v57 = vpop.permute.xlu1 %1479  ;;  %v1482_v20 = vpop.permute.xlu0 %1481 }
 0x4ed   : > { %v1484_v36 = vsel %vm1483_vm1, %v1480_v57, %v1482_v20  ;;  %v1485_v5 = vsel %vm1483_vm1, %v1482_v20, %v1480_v57  ;;  %vm1850_vm1 = vcmp.lt.s32.totalorder %v3672_v22, 114 }
 0x4ee   : > { %v1477_v28 = vmul.f32 %v1475_v46, %v1465_v34  ;;  %v1490_v16 = vcombine.low %v1485_v5, %v1484_v36  ;;  %2132 = vrot.lane.b32.xlu1 %v3911_v60, %s3314_s17  ;;  %2134 = vrot.lane.b32.xlu0 %v3913_v6, %s3314_s17  ;;  %s2681_s17 = sshll.u32 %s3376_s22, 5 }
 0x4f0   : > { %v1478_v38 = vadd.f32 %v1477_v28, %v1456_v1  ;;  %v1497_v47 = vrot.slane %v1490_v16, %v3980_v8  ;;  %v1502_v41 = vpop.permute.xlu1 %1501  ;;  %v1504_v30 = vpop.permute.xlu0 %1503 }
 0x4f1   : > { %v1506_v2 = vsel %vm1505_vm2, %v1502_v41, %v1504_v30  ;;  %v1507_v0 = vsel %vm1505_vm2, %v1504_v30, %v1502_v41  ;;  %vm1872_vm2 = vcmp.lt.s32.totalorder %v3672_v22, 113 }
 0x4f2   : > { %v1499_v7 = vmul.f32 %v1497_v47, %v1487_v50  ;;  %v1512_v58 = vcombine.low %v1507_v0, %v1506_v2  ;;  %2154 = vrot.lane.b32.xlu1 %v3911_v60, %s3315_s24  ;;  %2156 = vrot.lane.b32.xlu0 %v3913_v6, %s3315_s24 }
 0x4f4   : > { %v1500_v32 = vadd.f32 %v1499_v7, %v1478_v38  ;;  %v1519_v42 = vrot.slane %v1512_v58, %v3980_v8  ;;  %v1524_v12 = vpop.permute.xlu1 %1523  ;;  %v1526_v49 = vpop.permute.xlu0 %1525 }
 0x4f5   : > { %v1528_v21 = vsel %vm1527_vm3, %v1524_v12, %v1526_v49  ;;  %v1529_v27 = vsel %vm1527_vm3, %v1526_v49, %v1524_v12  ;;  %vm1894_vm3 = vcmp.lt.s32.totalorder %v3672_v22, 112 }
 0x4f6   : > { %v1521_v31 = vmul.f32 %v1519_v42, %v1509_v15  ;;  %v1534_v59 = vcombine.low %v1529_v27, %v1528_v21  ;;  %2176 = vrot.lane.b32.xlu1 %v3911_v60, %s3316_s26  ;;  %2178 = vrot.lane.b32.xlu0 %v3913_v6, %s3316_s26 }
 0x4f8   : > { %v1522_v3 = vadd.f32 %v1521_v31, %v1500_v32  ;;  %v1541_v62 = vrot.slane %v1534_v59, %v3980_v8  ;;  %v1546_v37 = vpop.permute.xlu1 %1545  ;;  %v1548_v26 = vpop.permute.xlu0 %1547 }
 0x4f9   : > { %v1550_v30 = vsel %vm1549_vm4, %v1546_v37, %v1548_v26  ;;  %v1551_v2 = vsel %vm1549_vm4, %v1548_v26, %v1546_v37  ;;  %vm1916_vm4 = vcmp.lt.s32.totalorder %v3672_v22, 111 }
 0x4fa   : > { %v1543_v9 = vmul.f32 %v1541_v62, %v1531_v44  ;;  %2198 = vrot.lane.b32.xlu1 %v3911_v60, %s3317_s14  ;;  %2200 = vrot.lane.b32.xlu0 %v3913_v6, %s3317_s14  ;;  %v1556_v32 = vcombine.low %v1551_v2, %v1550_v30  ;;  %v1553_v62 = vld [vmem:[#allocation5 + $0x3c] sm:$0xf]  ;;  %s2478_s14 = scalar_lea.sflag [#allocation4], %s3494_s23 }
 0x4fc   : > { %v4040_v4 = vadd.f32 %v1543_v9, %v1522_v3  ;;  %v1568_v63 = vpop.permute.xlu1 %1567  ;;  %v1570_v61 = vpop.permute.xlu0 %1569  ;;  %v1563_v44 = vrot.slane %v1556_v32, %v3980_v8 }
 0x4fd   : > { %v1572_v58 = vsel %vm1571_vm5, %v1568_v63, %v1570_v61  ;;  %v1573_v15 = vsel %vm1571_vm5, %v1570_v61, %v1568_v63  ;;  %vm1938_vm5 = vcmp.lt.s32.totalorder %v3672_v22, 110 }
 0x4fe   : > { %2220 = vrot.lane.b32.xlu1 %v3911_v60, %s3318_s6  ;;  %2222 = vrot.lane.b32.xlu0 %v3913_v6, %s3318_s6  ;;  %v1578_v49 = vcombine.low %v1573_v15, %v1572_v58  ;;  %v1597_v15 = vld [vmem:[#allocation5 + $0x44] sm:$0xf] }
 0x500   : > { %v1590_v14 = vpop.permute.xlu1 %1589  ;;  %v1592_v17 = vpop.permute.xlu0 %1591  ;;  %v1585_v9 = vrot.slane %v1578_v49, %v3980_v8 }
 0x501   : > { %v1594_v42 = vsel %vm1593_vm6, %v1590_v14, %v1592_v17  ;;  %v1595_v12 = vsel %vm1593_vm6, %v1592_v17, %v1590_v14  ;;  %v1575_v17 = vld [vmem:[#allocation5 + $0x40] sm:$0xf]  ;;  %vm1960_vm6 = vcmp.lt.s32.totalorder %v3672_v22, 109 }
 0x502   : > { %2242 = vrot.lane.b32.xlu1 %v3911_v60, %s3319_s7  ;;  %2244 = vrot.lane.b32.xlu0 %v3913_v6, %s3319_s7  ;;  %v1600_v3 = vcombine.low %v1595_v12, %v1594_v42  ;;  %v1587_v32 = vmul.f32 %v1585_v9, %v1575_v17  ;;  %s3322_s7 = smov [#allocation7]  }
 0x504   : > { %v1612_v24 = vpop.permute.xlu1 %1611  ;;  %v1614_v23 = vpop.permute.xlu0 %1613  ;;  %v1607_v2 = vrot.slane %v1600_v3, %v3980_v8 }
 0x505   : > { %v1616_v31 = vsel %vm1615_vm7, %v1612_v24, %v1614_v23  ;;  %v1617_v59 = vsel %vm1615_vm7, %v1614_v23, %v1612_v24  ;;  %v1565_v23 = vmul.f32 %v1563_v44, %v1553_v62  ;;  %vm1982_vm7 = vcmp.lt.s32.totalorder %v3672_v22, 99 }
 0x506   : > { %2264 = vrot.lane.b32.xlu1 %v3911_v60, %s3320_s15  ;;  %2266 = vrot.lane.b32.xlu0 %v3913_v6, %s3320_s15  ;;  %v1622_v63 = vcombine.low %v1617_v59, %v1616_v31  ;;  %v1609_v3 = vmul.f32 %v1607_v2, %v1597_v15  ;;  %v1685_v15 = vld [vmem:[#allocation5 + $0x54] sm:$0xf]  ;;  %s3162_s15 = sshll.u32 %s3322_s7, 4  ;;  %s3163_s15 = int_to_ptr.vmem [resolvable:$false] %s3162_s15 }
 0x507   : > { %v1566_v44 = vadd.f32 %v1565_v23, %v4040_v4  ;;  %v1663_v4 = vld [vmem:[#allocation5 + $0x50] sm:$0xf]  ;;  %s3164_s10 = scalar_lea.vmem %s3163_s15, 8192 }
 0x508   : > { %v1634_v19 = vpop.permute.xlu1 %1633  ;;  %v1636_v51 = vpop.permute.xlu0 %1635  ;;  %v1629_v42 = vrot.slane %v1622_v63, %v3980_v8 }
 0x509   : > { %v1638_v37 = vsel %vm1637_vm8, %v1634_v19, %v1636_v51  ;;  %v1639_v26 = vsel %vm1637_vm8, %v1636_v51, %v1634_v19  ;;  %v1588_v9 = vadd.f32 %v1587_v32, %v1566_v44  ;;  %vm2004_vm8 = vcmp.lt.s32.totalorder %v3672_v22, 98 }
 0x50a   : > { %v1644_v58 = vcombine.low %v1639_v26, %v1638_v37 }
 0x50c   : > { %v1656_v52 = vpop.permute.xlu1 %1655  ;;  %v1658_v29 = vpop.permute.xlu0 %1657  ;;  %v1651_v62 = vrot.slane %v1644_v58, %v3980_v8 }
 0x50d   : > { %v1660_v30 = vsel %vm1659_vm9, %v1656_v52, %v1658_v29  ;;  %v1661_v24 = vsel %vm1659_vm9, %v1658_v29, %v1656_v52  ;;  %v1619_v52 = vld [vmem:[#allocation5 + $0x48] sm:$0xf]  ;;  %vm2026_vm9 = vcmp.lt.s32.totalorder %v3672_v22, 97 }
 0x50e   : > { %v1666_v12 = vcombine.low %v1661_v24, %v1660_v30  ;;  %v1631_v63 = vmul.f32 %v1629_v42, %v1619_v52  ;;  %v1707_v42 = vld [vmem:[#allocation5 + $0x58] sm:$0xf] }
 0x510   : > { %v1678_v33 = vpop.permute.xlu1 %1677  ;;  %v1680_v34 = vpop.permute.xlu0 %1679  ;;  %v1673_v17 = vrot.slane %v1666_v12, %v3980_v8 }
 0x511   : > { %v1682_v19 = vsel %vm1681_vm10, %v1678_v33, %v1680_v34  ;;  %v1683_v51 = vsel %vm1681_vm10, %v1680_v34, %v1678_v33  ;;  %v1641_v33 = vld [vmem:[#allocation5 + $0x4c] sm:$0xf]  ;;  %vm2048_vm10 = vcmp.lt.s32.totalorder %v3672_v22, 96 }
 0x512   : > { %v1688_v37 = vcombine.low %v1683_v51, %v1682_v19  ;;  %v1653_v23 = vmul.f32 %v1651_v62, %v1641_v33  ;;  %v1675_v51 = vmul.f32 %v1673_v17, %v1663_v4  ;;  %v1747_v33 = vcombine.low %v3911_v60, %v3913_v6 }
 0x514   : > { %v1700_v1 = vpop.permute.xlu1 %1699  ;;  %v1702_v46 = vpop.permute.xlu0 %1701  ;;  %v1695_v2 = vrot.slane %v1688_v37, %v3980_v8  ;;  %v1754_v4 = vrot.slane %v1747_v33, %v3980_v8 }
 0x515   : > { %v1704_v29 = vsel %vm1703_vm11, %v1700_v1, %v1702_v46  ;;  %v1705_v59 = vsel %vm1703_vm11, %v1702_v46, %v1700_v1  ;;  %v1610_v46 = vadd.f32 %v1609_v3, %v1588_v9  ;;  %vm2070_vm11 = vcmp.lt.s32.totalorder %v3672_v22, 95 }
 0x516   : > { %v1710_v30 = vcombine.low %v1705_v59, %v1704_v29  ;;  %v1697_v52 = vmul.f32 %v1695_v2, %v1685_v15  ;;  %v1729_v59 = vld [vmem:[#allocation5 + $0x5c] sm:$0xf] }
 0x517   : > { %v1632_v19 = vadd.f32 %v1631_v63, %v1610_v46 }
 0x518   : > { %v4048_v57 = vpop.permute.xlu1 %1721  ;;  %v4050_v20 = vpop.permute.xlu0 %1723 }
 0x519   : > { %v1726_v34 = vsel %vm1725_vm12, %v4048_v57, %v4050_v20  ;;  %v1727_v26 = vsel %vm1725_vm12, %v4050_v20, %v4048_v57  ;;  %v1717_v57 = vrot.slane %v1710_v30, %v3980_v8  ;;  %v1654_v12 = vadd.f32 %v1653_v23, %v1632_v19  ;;  %v1766_v19 = vld [vmem:[#allocation5 + $0x64] sm:$0xf] }
 0x51a   : > { %v1732_v58 = vcombine.low %v1727_v26, %v1726_v34  ;;  %vm2092_vm12 = vcmp.lt.s32.totalorder %v3672_v22, 94 }
 0x51b   : > { %v1676_v62 = vadd.f32 %v1675_v51, %v1654_v12  ;;  %v1719_v37 = vmul.f32 %v1717_v57, %v1707_v42 }
 0x51c   : > { %v4052_v36 = vpop.permute.xlu1 %1758  ;;  %v4054_v5 = vpop.permute.xlu0 %1760  ;;  %v1739_v29 = vrot.slane %v1732_v58, %v3980_v8 }
 0x51d   : > { %v1763_v44 = vsel %vm1762_vm13, %v4052_v36, %v4054_v5  ;;  %v1764_v3 = vsel %vm1762_vm13, %v4054_v5, %v4052_v36  ;;  %v1698_v17 = vadd.f32 %v1697_v52, %v1676_v62  ;;  %vm2114_vm13 = vcmp.lt.s32.totalorder %v3672_v22, 93 }
 0x51e   : > { %v1741_v30 = vmul.f32 %v1739_v29, %v1729_v59  ;;  %v1769_v36 = vcombine.low %v1763_v44, %v1764_v3  ;;  %v1788_v29 = vld [vmem:[#allocation5 + $0x68] sm:$0xf] }
 0x51f   : > { %v1720_v5 = vadd.f32 %v1719_v37, %v1698_v17  ;;  %v1810_v37 = vld [vmem:[#allocation5 + $0x6c] sm:$0xf] }
 0x520   : > { %v4056_v28 = vpop.permute.xlu1 %1780  ;;  %v4058_v16 = vpop.permute.xlu0 %1782 }
 0x521   : > { %v1785_v9 = vsel %vm1784_vm14, %v4056_v28, %v4058_v16  ;;  %v1786_v63 = vsel %vm1784_vm14, %v4058_v16, %v4056_v28  ;;  %v1744_v16 = vld [vmem:[#allocation5 + $0x60] sm:$0xf]  ;;  %v1742_v15 = vadd.f32 %v1741_v30, %v1720_v5  ;;  %vm2136_vm14 = vcmp.lt.s32.totalorder %v3672_v22, 83 }
 0x522   : > { %v1791_v46 = vcombine.low %v1785_v9, %v1786_v63  ;;  %v1756_v42 = vmul.f32 %v1754_v4, %v1744_v16 }
 0x524   : > { %v4060_v50 = vpop.permute.xlu1 %1802  ;;  %v4062_v38 = vpop.permute.xlu0 %1804  ;;  %v1798_v12 = vrot.slane %v1791_v46, %v3980_v8  ;;  %v1854_v46 = vld [vmem:[#allocation5 + $0x74] sm:$0xf] }
 0x525   : > { %v1807_v60 = vsel %vm1806_vm15, %v4060_v50, %v4062_v38  ;;  %v1808_v6 = vsel %vm1806_vm15, %v4062_v38, %v4060_v50  ;;  %v1776_v50 = vrot.slane %v1769_v36, %v3980_v8  ;;  %v1832_v36 = vld [vmem:[#allocation5 + $0x70] sm:$0xf]  ;;  %vm2158_vm15 = vcmp.lt.s32.totalorder %v3672_v22, 82 }
 0x526   : > { %v1813_v38 = vcombine.low %v1807_v60, %v1808_v6  ;;  %v1800_v63 = vmul.f32 %v1798_v12, %v1788_v29 }
 0x528   : > { %v4065_v47 = vpop.permute.xlu1 %1824  ;;  %v4067_v41 = vpop.permute.xlu0 %1826  ;;  %v1820_v3 = vrot.slane %v1813_v38, %v3980_v8 }
 0x529   : > { %v1829_v2 = vsel %vm1828_vm0, %v4065_v47, %v4067_v41  ;;  %v1830_v58 = vsel %vm1828_vm0, %v4067_v41, %v4065_v47  ;;  %vm2180_vm0 = vcmp.lt.s32.totalorder %v3672_v22, 81 }
 0x52a   : > { %v1835_v52 = vcombine.low %v1829_v2, %v1830_v58 }
 0x52c   : > { %v4071_v0 = vpop.permute.xlu1 %1846  ;;  %v4073_v7 = vpop.permute.xlu0 %1848  ;;  %v1842_v17 = vrot.slane %v1835_v52, %v3980_v8  ;;  %v1898_v52 = vld [vmem:[#allocation5 + $0x7c] sm:$0xf] }
 0x52d   : > { %v1851_v51 = vsel %vm1850_vm1, %v4071_v0, %v4073_v7  ;;  %v1852_v57 = vsel %vm1850_vm1, %v4073_v7, %v4071_v0  ;;  %v1757_v0 = vadd.f32 %v1756_v42, %v1742_v15  ;;  %v1778_v7 = vmul.f32 %v1776_v50, %v1766_v19  ;;  %v1876_v19 = vld [vmem:[#allocation5 + $0x78] sm:$0xf] }
 0x52e   : > { %v1857_v62 = vcombine.low %v1851_v51, %v1852_v57  ;;  %v1844_v15 = vmul.f32 %v1842_v17, %v1832_v36  ;;  %v1942_v17 = vld [vmem:[#allocation5 + $0x84] sm:$0xf]  ;;  %vm2202_vm1 = vcmp.lt.s32.totalorder %v3672_v22, 80 }
 0x530   : > { %v4077_v21 = vpop.permute.xlu1 %1868  ;;  %v4079_v27 = vpop.permute.xlu0 %1870  ;;  %v1864_v5 = vrot.slane %v1857_v62, %v3980_v8  ;;  %v1920_v62 = vld [vmem:[#allocation5 + $0x80] sm:$0xf] }
 0x531   : > { %v1873_v59 = vsel %vm1872_vm2, %v4077_v21, %v4079_v27  ;;  %v1874_v44 = vsel %vm1872_vm2, %v4079_v27, %v4077_v21  ;;  %vm2224_vm2 = vcmp.lt.s32.totalorder %v3672_v22, 79 }
 0x532   : > { %v1879_v30 = vcombine.low %v1873_v59, %v1874_v44  ;;  %v1866_v57 = vmul.f32 %v1864_v5, %v1854_v46  ;;  %v1964_v5 = vld [vmem:[#allocation5 + $0x88] sm:$0xf] }
 0x534   : > { %v4085_v61 = vpop.permute.xlu1 %1890  ;;  %v4087_v14 = vpop.permute.xlu0 %1892 }
 0x535   : > { %v1895_v33 = vsel %vm1894_vm3, %v4085_v61, %v4087_v14  ;;  %v1896_v9 = vsel %vm1894_vm3, %v4087_v14, %v4085_v61  ;;  %v1779_v61 = vadd.f32 %v1778_v7, %v1757_v0  ;;  %v1822_v14 = vmul.f32 %v1820_v3, %v1810_v37 }
 0x536   : > { %v1901_v4 = vcombine.low %v1895_v33, %v1896_v9  ;;  %vm2246_vm3 = vcmp.lt.s32.totalorder %v3672_v22, 78 }
 0x537   : > { %v1801_v58 = vadd.f32 %v1800_v63, %v1779_v61 }
 0x538   : > { %v4093_v49 = vpop.permute.xlu1 %1912  ;;  %v4095_v31 = vpop.permute.xlu0 %1914  ;;  %v1908_v42 = vrot.slane %v1901_v4, %v3980_v8 }
 0x539   : > { %v1917_v60 = vsel %vm1916_vm4, %v4093_v49, %v4095_v31  ;;  %v1918_v6 = vsel %vm1916_vm4, %v4095_v31, %v4093_v49  ;;  %v1886_v49 = vrot.slane %v1879_v30, %v3980_v8  ;;  %vm2268_vm4 = vcmp.lt.s32.totalorder %v3672_v22, 77 }
 0x53a   : > { %v1923_v31 = vcombine.low %v1917_v60, %v1918_v6  ;;  %v1910_v33 = vmul.f32 %v1908_v42, %v1898_v52 }
 0x53c   : > { %v4104_v24 = vpop.permute.xlu1 %1934  ;;  %v4106_v1 = vpop.permute.xlu0 %1936  ;;  %v1930_v44 = vrot.slane %v1923_v31, %v3980_v8 }
 0x53d   : > { %v1939_v16 = vsel %vm1938_vm5, %v4104_v24, %v4106_v1  ;;  %v1940_v2 = vsel %vm1938_vm5, %v4106_v1, %v4104_v24  ;;  %v1823_v1 = vadd.f32 %v1822_v14, %v1801_v58  ;;  %v1986_v58 = vld [vmem:[#allocation5 + $0x8c] sm:$0xf]  ;;  %vm2297_vm5 = vcmask 1041408  }
 0x53e   : > { %v1945_v12 = vcombine.low %v1939_v16, %v1940_v2 }
 0x540   : > { %v4111_v20 = vpop.permute.xlu1 %1956  ;;  %v4113_v32 = vpop.permute.xlu0 %1958  ;;  %v1952_v9 = vrot.slane %v1945_v12, %v3980_v8 }
 0x541   : > { %v1961_v51 = vsel %vm1960_vm6, %v4111_v20, %v4113_v32  ;;  %v1962_v24 = vsel %vm1960_vm6, %v4113_v32, %v4111_v20  ;;  %v1845_v20 = vadd.f32 %v1844_v15, %v1823_v1  ;;  %v1888_v32 = vmul.f32 %v1886_v49, %v1876_v19  ;;  %v2008_v1 = vld [vmem:[#allocation5 + $0x90] sm:$0xf] }
 0x542   : > { %v1967_v0 = vcombine.low %v1961_v51, %v1962_v24 }
 0x544   : > { %v4124_v34 = vpop.permute.xlu1 %1978  ;;  %v4126_v26 = vpop.permute.xlu0 %1980  ;;  %v1974_v60 = vrot.slane %v1967_v0, %v3980_v8 }
 0x545   : > { %v1983_v29 = vsel %vm1982_vm7, %v4124_v34, %v4126_v26  ;;  %v1984_v59 = vsel %vm1982_vm7, %v4126_v26, %v4124_v34  ;;  %v1867_v26 = vadd.f32 %v1866_v57, %v1845_v20 }
 0x546   : > { %v1989_v63 = vcombine.low %v1983_v29, %v1984_v59  ;;  %v1976_v19 = vmul.f32 %v1974_v60, %v1964_v5  ;;  %v2030_v29 = vld [vmem:[#allocation5 + $0x94] sm:$0xf] }
 0x548   : > { %v4139_v23 = vpop.permute.xlu1 %2000  ;;  %v4141_v28 = vpop.permute.xlu0 %2002 }
 0x549   : > { %v2005_v37 = vsel %vm2004_vm8, %v4139_v23, %v4141_v28  ;;  %v2006_v34 = vsel %vm2004_vm8, %v4141_v28, %v4139_v23  ;;  %v1889_v23 = vadd.f32 %v1888_v32, %v1867_v26  ;;  %v1932_v28 = vmul.f32 %v1930_v44, %v1920_v62 }
 0x54a   : > { %v2011_v6 = vcombine.low %v2005_v37, %v2006_v34  ;;  %v2052_v37 = vld [vmem:[#allocation5 + $0x98] sm:$0xf] }
 0x54b   : > { %v1911_v16 = vadd.f32 %v1910_v33, %v1889_v23 }
 0x54c   : > { %v4155_v47 = vpop.permute.xlu1 %2022  ;;  %v4157_v41 = vpop.permute.xlu0 %2024 }
 0x54d   : > { %v2027_v30 = vsel %vm2026_vm9, %v4155_v47, %v4157_v41  ;;  %v2028_v36 = vsel %vm2026_vm9, %v4157_v41, %v4155_v47  ;;  %v1954_v47 = vmul.f32 %v1952_v9, %v1942_v17  ;;  %v1996_v41 = vrot.slane %v1989_v63, %v3980_v8 }
 0x54e   : > { %v2033_v2 = vcombine.low %v2027_v30, %v2028_v36  ;;  %v1933_v31 = vadd.f32 %v1932_v28, %v1911_v16  ;;  %v2074_v30 = vld [vmem:[#allocation5 + $0x9c] sm:$0xf] }
 0x550   : > { %v2045_v21 = vpop.permute.xlu1 %2044  ;;  %v2047_v27 = vpop.permute.xlu0 %2046  ;;  %v1955_v12 = vadd.f32 %v1954_v47, %v1933_v31 }
 0x551   : > { %v2049_v4 = vsel %vm2048_vm10, %v2045_v21, %v2047_v27  ;;  %v2050_v46 = vsel %vm2048_vm10, %v2047_v27, %v2045_v21  ;;  %v2018_v21 = vrot.slane %v2011_v6, %v3980_v8 }
 0x552   : > { %v2055_v27 = vcombine.low %v2049_v4, %v2050_v46  ;;  %v1977_v32 = vadd.f32 %v1976_v19, %v1955_v12  ;;  %v2096_v4 = vld [vmem:[#allocation5 + $0xa0] sm:$0xf] }
 0x553   : > { %v2020_v44 = vmul.f32 %v2018_v21, %v2008_v1 }
 0x554   : > { %v2067_v50 = vpop.permute.xlu1 %2066  ;;  %v2069_v38 = vpop.permute.xlu0 %2068  ;;  %v2062_v0 = vrot.slane %v2055_v27, %v3980_v8 }
 0x555   : > { %v2071_v15 = vsel %vm2070_vm11, %v2067_v50, %v2069_v38  ;;  %v2072_v49 = vsel %vm2070_vm11, %v2069_v38, %v2067_v50  ;;  %v1998_v50 = vmul.f32 %v1996_v41, %v1986_v58  ;;  %v2040_v38 = vrot.slane %v2033_v2, %v3980_v8 }
 0x556   : > { %v2077_v52 = vcombine.low %v2071_v15, %v2072_v49  ;;  %v2064_v60 = vmul.f32 %v2062_v0, %v2052_v37  ;;  %v2118_v15 = vld [vmem:[#allocation5 + $0xa4] sm:$0xf]  ;;  %v2184_v0 = vld [vmem:[#allocation5 + $0xb0] sm:$0xf] }
 0x557   : > { %v1999_v33 = vadd.f32 %v1998_v50, %v1977_v32  ;;  %v2042_v9 = vmul.f32 %v2040_v38, %v2030_v29 }
 0x558   : > { %v2089_v7 = vpop.permute.xlu1 %2088  ;;  %v2091_v3 = vpop.permute.xlu0 %2090  ;;  %v2084_v63 = vrot.slane %v2077_v52, %v3980_v8  ;;  %v2162_v52 = vld [vmem:[#allocation5 + $0xac] sm:$0xf] }
 0x559   : > { %v2093_v57 = vsel %vm2092_vm12, %v2089_v7, %v2091_v3  ;;  %v2094_v42 = vsel %vm2092_vm12, %v2091_v3, %v2089_v7  ;;  %v2021_v28 = vadd.f32 %v2020_v44, %v1999_v33  ;;  %v2206_v33 = vld [vmem:[#allocation5 + $0xb4] sm:$0xf] }
 0x55a   : > { %v2099_v7 = vcombine.low %v2093_v57, %v2094_v42  ;;  %v2086_v41 = vmul.f32 %v2084_v63, %v2074_v30 }
 0x55b   : > { %v2043_v47 = vadd.f32 %v2042_v9, %v2021_v28 }
 0x55c   : > { %v2111_v61 = vpop.permute.xlu1 %2110  ;;  %v2113_v14 = vpop.permute.xlu0 %2112  ;;  %v2106_v6 = vrot.slane %v2099_v7, %v3980_v8 }
 0x55d   : > { %v2115_v59 = vsel %vm2114_vm13, %v2111_v61, %v2113_v14  ;;  %v2116_v20 = vsel %vm2114_vm13, %v2113_v14, %v2111_v61  ;;  %v2065_v49 = vadd.f32 %v2064_v60, %v2043_v47 }
 0x55e   : > { %v2121_v17 = vcombine.low %v2115_v59, %v2116_v20  ;;  %v2108_v31 = vmul.f32 %v2106_v6, %v2096_v4 }
 0x55f   : > { %v2087_v42 = vadd.f32 %v2086_v41, %v2065_v49 }
 0x560   : > { %v2133_v51 = vpop.permute.xlu1 %2132  ;;  %v2135_v24 = vpop.permute.xlu0 %2134  ;;  %v2128_v2 = vrot.slane %v2121_v17, %v3980_v8 }
 0x561   : > { %v2137_v34 = vsel %vm2136_vm14, %v2133_v51, %v2135_v24  ;;  %v2138_v26 = vsel %vm2136_vm14, %v2135_v24, %v2133_v51  ;;  %v2140_v24 = vld [vmem:[#allocation5 + $0xa8] sm:$0xf]  ;;  %v2109_v29 = vadd.f32 %v2108_v31, %v2087_v42 }
 0x562   : > { %v2143_v61 = vcombine.low %v2137_v34, %v2138_v26  ;;  %v2130_v12 = vmul.f32 %v2128_v2, %v2118_v15 }
 0x564   : > { %v2155_v3 = vpop.permute.xlu1 %2154  ;;  %v2157_v62 = vpop.permute.xlu0 %2156  ;;  %v2150_v19 = vrot.slane %v2143_v61, %v3980_v8 }
 0x565   : > { %v2159_v36 = vsel %vm2158_vm15, %v2155_v3, %v2157_v62  ;;  %v2160_v23 = vsel %vm2158_vm15, %v2157_v62, %v2155_v3  ;;  %v2131_v62 = vadd.f32 %v2130_v12, %v2109_v29 }
 0x566   : > { %v2165_v58 = vcombine.low %v2159_v36, %v2160_v23  ;;  %v2152_v59 = vmul.f32 %v2150_v19, %v2140_v24  ;;  %v2228_v23 = vld [vmem:[#allocation5 + $0xb8] sm:$0xf]  ;;  %v2272_v19 = vld [vmem:[#allocation5 + $0xc0] sm:$0xf] }
 0x568   : > { %v2177_v14 = vpop.permute.xlu1 %2176  ;;  %v2179_v5 = vpop.permute.xlu0 %2178  ;;  %v2172_v50 = vrot.slane %v2165_v58, %v3980_v8  ;;  %v2153_v9 = vadd.f32 %v2152_v59, %v2131_v62 }
 0x569   : > { %v2181_v46 = vsel %vm2180_vm0, %v2177_v14, %v2179_v5  ;;  %v2182_v16 = vsel %vm2180_vm0, %v2179_v5, %v2177_v14  ;;  %v2250_v5 = vld [vmem:[#allocation5 + $0xbc] sm:$0xf] }
 0x56a   : > { %v2187_v21 = vcombine.low %v2181_v46, %v2182_v16  ;;  %v2174_v37 = vmul.f32 %v2172_v50, %v2162_v52 }
 0x56c   : > { %v2199_v27 = vpop.permute.xlu1 %2198  ;;  %v2201_v51 = vpop.permute.xlu0 %2200  ;;  %v2194_v20 = vrot.slane %v2187_v21, %v3980_v8  ;;  %v2175_v6 = vadd.f32 %v2174_v37, %v2153_v9 }
 0x56d   : > { %v2203_v1 = vsel %vm2202_vm1, %v2199_v27, %v2201_v51  ;;  %v2204_v57 = vsel %vm2202_vm1, %v2201_v51, %v2199_v27 }
 0x56e   : > { %v2209_v38 = vcombine.low %v2203_v1, %v2204_v57  ;;  %v2196_v63 = vmul.f32 %v2194_v20, %v2184_v0 }
 0x570   : > { %v2221_v32 = vpop.permute.xlu1 %2220  ;;  %v2223_v44 = vpop.permute.xlu0 %2222  ;;  %v2216_v34 = vrot.slane %v2209_v38, %v3980_v8  ;;  %v2197_v4 = vadd.f32 %v2196_v63, %v2175_v6  ;;  %v3076_v63 = vld [vmem:[%s3500_s12 + $0x10] sm:$0xff] }
 0x571   : > { %v2225_v7 = vsel %vm2224_vm2, %v2221_v32, %v2223_v44  ;;  %v2226_v3 = vsel %vm2224_vm2, %v2223_v44, %v2221_v32 }
 0x572   : > { %v2231_v26 = vcombine.low %v2225_v7, %v2226_v3  ;;  %v2218_v61 = vmul.f32 %v2216_v34, %v2206_v33 }
 0x574   : > { %v2238_v17 = vrot.slane %v2231_v26, %v3980_v8  ;;  %v2243_v30 = vpop.permute.xlu1 %2242  ;;  %v2245_v36 = vpop.permute.xlu0 %2244  ;;  %v2219_v15 = vadd.f32 %v2218_v61, %v2197_v4  ;;  %v3079_v61 = vld [vmem:[%s3500_s12 + $0x8] sm:$0xff] }
 0x575   : > { %v2247_v28 = vsel %vm2246_vm3, %v2243_v30, %v2245_v36  ;;  %v2248_v60 = vsel %vm2246_vm3, %v2245_v36, %v2243_v30  ;;  %v3077_v30 = vld [vmem:[%s3500_s12 + $0x18] sm:$0xff] }
 0x576   : > { %v2253_v14 = vcombine.low %v2247_v28, %v2248_v60  ;;  %v2240_v46 = vmul.f32 %v2238_v17, %v2228_v23  ;;  %v4281_v17 = vmul.f32 %v3076_v63, %v3797_v39  ;;  %v4285_v36 = vmul.f32 %v3077_v30, %v3797_v39  ;;  %v3078_v23 = vld [vmem:[%s3500_s12] sm:$0xff]  ;;  %v3081_v39 = vld [vmem:[%s3500_s12 + $0x38] sm:$0xff]  ;;  %v3098_v63 = vld [vmem:[%s3500_s12 + $0xb0] sm:$0xff] }
 0x577   : > { %v4289_v28 = vmul.f32 %v3078_v23, %v3799_v40  ;;  %v3321_v60 = vmov 1966171168   ;;  %v4589_v30 = vld [vmem:[#allocation16_spill] sm:$0xff] }
 0x578   : > { %v2260_v16 = vrot.slane %v2253_v14, %v3980_v8  ;;  %v2265_v47 = vpop.permute.xlu1 %2264  ;;  %v2267_v41 = vpop.permute.xlu0 %2266  ;;  %v2241_v21 = vadd.f32 %v2240_v46, %v2219_v15  ;;  %v4291_v6 = vunpack.c.l.s4 %v3321_v60  ;;  %v4295_v14 = vmul.f32 %v3079_v61, %v3799_v40  ;;  %v3084_v40 = vld [vmem:[%s3500_s12 + $0x50] sm:$0xff]  ;;  %v3085_v15 = vld [vmem:[%s3500_s12 + $0x58] sm:$0xff] }
 0x579   : > { %v2269_v2 = vsel %vm2268_vm4, %v2265_v47, %v2267_v41  ;;  %v2270_v58 = vsel %vm2268_vm4, %v2267_v41, %v2265_v47  ;;  %v4303_v46 = vmul.f32 %v3081_v39, %v3803_v55  ;;  %v3083_v41 = vld [vmem:[%s3500_s12 + $0x28] sm:$0xff]  ;;  %v2427_v23 = vmul.f32 %v3098_v63, %v4589_v30  ;;  %v3099_v60 = vld [vmem:[%s3500_s12 + $0xb8] sm:$0xff] }
 0x57a   : > { %v2262_v49 = vmul.f32 %v2260_v16, %v2250_v5  ;;  %v2275_v31 = vcombine.low %v2269_v2, %v2270_v58  ;;  %v3080_v5 = vld [vmem:[%s3500_s12 + $0x30] sm:$0xff]  ;;  %v3082_v16 = vld [vmem:[%s3500_s12 + $0x20] sm:$0xff]  ;;  %v4309_v2 = vmul.f32 %v3083_v41, %v3801_v53  ;;  %v2391_v58 = vmul.f32 %v3084_v40, %v3823_v54 }
 0x57b   : > { %v4299_v4 = vmul.f32 %v3080_v5, %v3803_v55  ;;  %v2361_v47 = vmul.f32 %v3082_v16, %v3801_v53  ;;  %v3086_v55 = vld [vmem:[%s3500_s12 + $0x40] sm:$0xff]  ;;  %v3088_v53 = vld [vmem:[%s3500_s12 + $0x70] sm:$0xff] }
 0x57c   : > { %v2282_v27 = vrot.slane %v2275_v31, %v3980_v8  ;;  %v2263_v51 = vadd.f32 %v2262_v49, %v2241_v21  ;;  %v4315_v49 = vmul.f32 %v3085_v15, %v3823_v54  ;;  %v2389_v31 = vmul.f32 %v3086_v55, %v3821_v48 }
 0x57e   : > { %v2284_v24 = vmul.f32 %v2282_v27, %v2272_v19  ;;  %v3087_v19 = vld [vmem:[%s3500_s12 + $0x48] sm:$0xff]  ;;  %v4325_v27 = vmul.f32 %v3088_v53, %v3853_v35 }
 0x57f   : > { %v4321_v21 = vmul.f32 %v3087_v19, %v3821_v48  ;;  %v3091_v48 = vld [vmem:[%s3500_s12 + $0x68] sm:$0xff] }
 0x580   : > { %v2285_v1 = vadd.f32 %v2284_v24, %v2263_v51  ;;  %v3089_v51 = vld [vmem:[%s3500_s12 + $0x78] sm:$0xff]  ;;  %v3090_v24 = vld [vmem:[%s3500_s12 + $0x60] sm:$0xff] }
 0x581   : > { %v4329_v54 = vmul.f32 %v3089_v51, %v3853_v35 }
 0x582   : > { %v2293_v22 = vrot.slane %v2285_v1, %v3980_v8  ;;  %v2393_v1 = vmul.f32 %v3090_v24, %v3827_v56 }
 0x584   : > { %v2294_v57 = vcombine.high %v2293_v22, %v2293_v22  ;;  %v2298_v42 = vsel %vm2297_vm5, %v2293_v22, 0.0  ;;  %v2447_v22 = vld [vmem:[%s3500_s12 + $0xd0] sm:$0xff] }
 0x585   : > { %v2299_v12 = vrot.slane %v2298_v42, 4  ;;  %v2455_v61 = vmul.f32 %v3880_v11, %v2447_v22 }
 0x586   : > { %v2305_v50 = vsel %vm2297_vm5, %v2294_v57, 0.0  ;;  %v2448_v57 = vld [vmem:[%s3500_s12 + $0xd8] sm:$0xff] }
 0x587   : > { %v2300_v38 = vadd.f32 %v2299_v12, %v2298_v42  ;;  %v2306_v52 = vrot.slane %v2305_v50, 4  ;;  %v2394_v42 = vmul.f32 %v3091_v48, %v3827_v56  ;;  %v3092_v12 = vld [vmem:[%s3500_s12 + $0x80] sm:$0xff]  ;;  %v4587_v56 = vld [vmem:[#allocation14_spill] sm:$0xff]  ;;  %v4368_v5 = vmul.f32 %v3880_v11, %v2448_v57 }
 0x589   : > { %v2301_v29 = vrot.slane %v2300_v38, 2  ;;  %v2307_v59 = vadd.f32 %v2306_v52, %v2305_v50  ;;  %v4339_v50 = vmul.f32 %v3092_v12, %v3831_v13  ;;  %v2445_v52 = vld [vmem:[%s3500_s12 + $0xc0] sm:$0xff] }
 0x58a   : > { %v2453_v39 = vmul.f32 %v3886_v45, %v2445_v52 }
 0x58b   : > { %v2302_v20 = vadd.f32 %v2301_v29, %v2300_v38  ;;  %v2308_v32 = vrot.slane %v2307_v59, 2  ;;  %v3093_v38 = vld [vmem:[%s3500_s12 + $0x88] sm:$0xff] }
 0x58c   : > { %v4343_v35 = vmul.f32 %v3093_v38, %v3831_v13  ;;  %v2446_v29 = vld [vmem:[%s3500_s12 + $0xc8] sm:$0xff] }
 0x58d   : > { %v2303_v44 = vrot.slane %v2302_v20, 1  ;;  %v2309_v0 = vadd.f32 %v2308_v32, %v2307_v59  ;;  %v2449_v59 = vld [vmem:[%s3500_s12 + $0xe0] sm:$0xff]  ;;  %v3094_v32 = vld [vmem:[%s3500_s12 + $0x90] sm:$0xff]  ;;  %v2454_v16 = vmul.f32 %v3886_v45, %v2446_v29 }
 0x58e   : > { %v4373_v41 = vmul.f32 %v3896_v43, %v2449_v59 }
 0x58f   : > { %v2304_v7 = vadd.f32 %v2303_v44, %v2302_v20  ;;  %v2310_v3 = vrot.slane %v2309_v0, 1  ;;  %v2329_v20 = vunpack.c.0.s8 %v4291_v6  ;;  %v2423_v44 = vmul.f32 %v3094_v32, %v4587_v56 }
 0x590   : > { %v2428_v6 = vmul.f32 %v3099_v60, %v4589_v30 }
 0x591   : > { %v2311_v62 = vadd.f32 %v2310_v3, %v2309_v0  ;;  %v2669_v37 = vmul.f32 -1.442695, %v2304_v7  ;;  %v3095_v0 = vld [vmem:[%s3500_s12 + $0x98] sm:$0xff]  ;;  %v3096_v3 = vld [vmem:[%s3500_s12 + $0xa0] sm:$0xff]  ;;  %v4386_v53 = vsub.s32 %v2329_v20, %v3878_v10 }
 0x592   : > { %v2424_v7 = vmul.f32 %v3095_v0, %v4587_v56 }
 0x593   : > { %3068 = vpow2.f32 %v2669_v37  ;;  %v2670_v8 = vmul.f32 -1.442695, %v2311_v62  ;;  %v4588_v62 = vld [vmem:[#allocation15_spill] sm:$0xff] }
 0x594   : > { %v2425_v37 = vmul.f32 %v3096_v3, %v4588_v62 }
 0x595   : > { %3070 = vpow2.f32 %v2670_v8  ;;  %v3097_v8 = vld [vmem:[%s3500_s12 + $0xa8] sm:$0xff] }
 0x596   : > { %v2426_v13 = vmul.f32 %v3097_v8, %v4588_v62 }
 0x59d   : > { %v3069_v34 = vpop.eup %3068 }
 0x59e   : > { %v2318_v26 = vadd.f32 1.0, %v3069_v34  ;;  %v2450_v34 = vld [vmem:[%s3500_s12 + $0xe8] sm:$0xff] }
 0x59f   : > { %v3071_v33 = vpop.eup %3070  ;;  %v2458_v55 = vmul.f32 %v3896_v43, %v2450_v34 }
 0x5a0   : > { %v2319_v9 = vadd.f32 1.0, %v3071_v33  ;;  %3072 = vrcp.f32 %v2318_v26  ;;  %v2451_v26 = vld [vmem:[%s3500_s12 + $0xf0] sm:$0xff]  ;;  %v2452_v33 = vld [vmem:[%s3500_s12 + $0xf8] sm:$0xff]  ;;  %s4405_s12 = scalar_lea.vmem [#allocation7], %s2633_s27  ;;  %s2636_s27 = sshll.u32 %s3494_s23, 1 }
 0x5a1   : > { %v2459_v19 = vmul.f32 %v3902_v25, %v2451_v26  ;;  %v4383_v11 = vmul.f32 %v3902_v25, %v2452_v33  ;;  %s2496_s29 = sshll.u32 %s4405_s12, 4  ;;  %s4471_s24 = scalar_lea.vmem [#allocation8], %s2636_s27  ;;  %s4460_s29 = int_to_ptr.vmem [resolvable:$true] %s2496_s29 }
 0x5a2   : > { %3074 = vrcp.f32 %v2319_v9  ;;  %s2513_s26 = sshll.u32 %s4471_s24, 4  ;;  %s3158_s6 = scalar_lea.vmem %s4460_s29, 4096  ;;  %s4512_s26 = int_to_ptr.vmem [resolvable:$true] %s2513_s26 }
 0x5a3   : > { %p3159_p4 = scmp.ne.s32.totalorder %s4460_s29, %s3158_s6  ;;  %p3165_p10 = scmp.lt.s32.totalorder %s4460_s29, %s3163_s15 }
 0x5a4   : > { %p3166_p13 = scmp.lt.s32.totalorder %s3164_s10, %s3158_s6 }
 0x5a5   : > { %p3160_p6 = pnand %p3159_p4, %p3446_p12 }
 0x5a6   : > { %p3167_p3 = por %p3166_p13, %p3165_p10 }
 0x5a7   : > { %p3161_p8 = pneg %p3160_p6 }
 0x5a9   : > { %p3168_p7 = pnand %p3167_p3, %p3161_p8 }
 0x5aa   : > { %v4360_v9 = vpop.eup %3072 }
 0x5ab   : > { %v4376_v40 = vadd.f32 1.0, %v4360_v9 }
 0x5ac   : > { %v4378_v15 = vpop.eup %3074 }
 0x5ad   : > { %v2348_v45 = vadd.f32 1.0, %v4378_v15  ;;  %v2365_v51 = vmul.f32 %v4289_v28, %v4376_v40  ;;  %v2367_v24 = vmul.f32 %v4281_v17, %v4376_v40  ;;  %v2369_v22 = vmul.f32 %v2361_v47, %v4376_v40 }
 0x5ae   : > { %v2371_v43 = vmul.f32 %v4299_v4, %v4376_v40  ;;  %v2397_v57 = vmul.f32 %v2389_v31, %v4376_v40  ;;  %v2399_v25 = vmul.f32 %v2391_v58, %v4376_v40  ;;  %v2401_v10 = vmul.f32 %v2393_v1, %v4376_v40 }
 0x5af   : > { %v2366_v48 = vmul.f32 %v4295_v14, %v2348_v45  ;;  %v2368_v12 = vmul.f32 %v4285_v36, %v2348_v45  ;;  %v2370_v28 = vmul.f32 %v4309_v2, %v2348_v45  ;;  %v2372_v17 = vmul.f32 %v4303_v46, %v2348_v45  ;;  %2373 = vst [vmem:[%s4405_s12] sm:$0xff] %v2365_v51 }
 0x5b0   : > { %2375 = vst [vmem:[%s4405_s12 + $0x10] sm:$0xff] %v2367_v24  ;;  %2377 = vst [vmem:[%s4405_s12 + $0x20] sm:$0xff] %v2369_v22  ;;  %v2398_v36 = vmul.f32 %v4321_v21, %v2348_v45  ;;  %v2400_v14 = vmul.f32 %v4315_v49, %v2348_v45  ;;  %v2402_v4 = vmul.f32 %v2394_v42, %v2348_v45 }
 0x5b1   : > { %2379 = vst [vmem:[%s4405_s12 + $0x30] sm:$0xff] %v2371_v43  ;;  %v2403_v46 = vmul.f32 %v4325_v27, %v4376_v40  ;;  %2405 = vst [vmem:[%s4405_s12 + $0x40] sm:$0xff] %v2397_v57  ;;  %v2404_v47 = vmul.f32 %v4329_v54, %v2348_v45  ;;  %v2429_v2 = vmul.f32 %v4339_v50, %v4376_v40 }
 0x5b2   : > { %2407 = vst [vmem:[%s4405_s12 + $0x50] sm:$0xff] %v2399_v25  ;;  %2409 = vst [vmem:[%s4405_s12 + $0x60] sm:$0xff] %v2401_v10  ;;  %v2430_v58 = vmul.f32 %v4343_v35, %v2348_v45  ;;  %v2431_v49 = vmul.f32 %v2423_v44, %v4376_v40  ;;  %v2432_v31 = vmul.f32 %v2424_v7, %v2348_v45 }
 0x5b3   : > { %2374 = vst [vmem:[%s4405_s12 + $0x8] sm:$0xff] %v2366_v48  ;;  %2376 = vst [vmem:[%s4405_s12 + $0x18] sm:$0xff] %v2368_v12  ;;  %v2433_v21 = vmul.f32 %v2425_v37, %v4376_v40  ;;  %v2434_v27 = vmul.f32 %v2426_v13, %v2348_v45  ;;  %v2435_v54 = vmul.f32 %v2427_v23, %v4376_v40 }
 0x5b4   : > { %2378 = vst [vmem:[%s4405_s12 + $0x28] sm:$0xff] %v2370_v28  ;;  %2380 = vst [vmem:[%s4405_s12 + $0x38] sm:$0xff] %v2372_v17  ;;  %v2436_v1 = vmul.f32 %v2428_v6, %v2348_v45  ;;  %v2461_v42 = vmul.f32 %v2453_v39, %v4376_v40  ;;  %v2462_v50 = vmul.f32 %v2454_v16, %v2348_v45 }
 0x5b5   : > { %2406 = vst [vmem:[%s4405_s12 + $0x48] sm:$0xff] %v2398_v36  ;;  %2408 = vst [vmem:[%s4405_s12 + $0x58] sm:$0xff] %v2400_v14  ;;  %v2463_v38 = vmul.f32 %v2455_v61, %v4376_v40  ;;  %v2464_v35 = vmul.f32 %v4368_v5, %v2348_v45  ;;  %v2465_v52 = vmul.f32 %v4373_v41, %v4376_v40 }
 0x5b6   : > { %2410 = vst [vmem:[%s4405_s12 + $0x68] sm:$0xff] %v2402_v4  ;;  %2411 = vst [vmem:[%s4405_s12 + $0x70] sm:$0xff] %v2403_v46  ;;  %v2466_v29 = vmul.f32 %v2458_v55, %v2348_v45  ;;  %v2467_v59 = vmul.f32 %v2459_v19, %v4376_v40  ;;  %v2468_v20 = vmul.f32 %v4383_v11, %v2348_v45 }
 0x5b7   : > { %2412 = vst [vmem:[%s4405_s12 + $0x78] sm:$0xff] %v2404_v47  ;;  %2437 = vst [vmem:[%s4405_s12 + $0x80] sm:$0xff] %v2429_v2  ;;  %v2326_v32 = vcombine.low %v4360_v9, %v4378_v15 }
 0x5b8   : > { %2438 = vst [vmem:[%s4405_s12 + $0x88] sm:$0xff] %v2430_v58  ;;  %2439 = vst [vmem:[%s4405_s12 + $0x90] sm:$0xff] %v2431_v49 }
 0x5b9   : > { %2440 = vst [vmem:[%s4405_s12 + $0x98] sm:$0xff] %v2432_v31  ;;  %2441 = vst [vmem:[%s4405_s12 + $0xa0] sm:$0xff] %v2433_v21  ;;  %v2333_v56 = vrot.slane %v2326_v32, %v4386_v53 }
 0x5ba   : > { %2442 = vst [vmem:[%s4405_s12 + $0xa8] sm:$0xff] %v2434_v27  ;;  %2443 = vst [vmem:[%s4405_s12 + $0xb0] sm:$0xff] %v2435_v54 }
 0x5bb   : > { %2444 = vst [vmem:[%s4405_s12 + $0xb8] sm:$0xff] %v2436_v1  ;;  %2469 = vst [vmem:[%s4405_s12 + $0xc0] sm:$0xff] %v2461_v42 }
 0x5bc   : > { %2470 = vst [vmem:[%s4405_s12 + $0xc8] sm:$0xff] %v2462_v50  ;;  %2471 = vst [vmem:[%s4405_s12 + $0xd0] sm:$0xff] %v2463_v38 }
 0x5bd   : > { %2472 = vst [vmem:[%s4405_s12 + $0xd8] sm:$0xff] %v2464_v35  ;;  %2473 = vst [vmem:[%s4405_s12 + $0xe0] sm:$0xff] %v2465_v52 }
 0x5be   : > { %2474 = vst [vmem:[%s4405_s12 + $0xe8] sm:$0xff] %v2466_v29  ;;  %2475 = vst [vmem:[%s4405_s12 + $0xf0] sm:$0xff] %v2467_v59 }
 0x5bf   : > { %2476 = vst [vmem:[%s4405_s12 + $0xf8] sm:$0xff] %v2468_v20 }
 0x5c0   : > { %3171 = shalt.err (!%p3168_p7)
}
 0x5c1   : > { %s3172_s12 = scalar_lea.hbm %s4453_s16, 4096  ;;  %s3176_s28 = scalar_lea.hbm %s4559_s4, 8192 }
 0x5c2   : > { %p3173_p9 = scmp.ne.s32.totalorder %s4453_s16, %s3172_s12  ;;  %p3177_p5 = scmp.lt.u32.totalorder %s4453_s16, %s4559_s4 }
 0x5c3   : > { %p3178_p11 = scmp.lt.u32.totalorder %s3176_s28, %s3172_s12  ;;  %p3180_p4 = scmp.lt.u32.totalorder %s3172_s12, %s4453_s16 }
 0x5c4   : > { %p3174_p2 = pnand %p3173_p9, %p3446_p12 }
 0x5c5   : > { %p3179_p1 = por %p3178_p11, %p3177_p5 }
 0x5c6   : > { %p3175_p0 = pneg %p3174_p2 }
 0x5c7   : > { %p3181_p6 = por %p3180_p4, %p3179_p1 }
 0x5c9   : > { %p3182_p8 = pnand %p3181_p6, %p3175_p0 }
 0x5cb   : > { %3185 = shalt.err (!%p3182_p8)
}
 0x5cc   : > { %s3323_s6 = smov 256   ;;  %vm2344_vm6 = vcmp.lt.s32.totalorder %v4586_v18, 256  ;;  %v2340_v44 = vrot.slane %v2333_v56, %v4386_v53  ;;  %s4508_s27 = scalar_lea.hbm %s4560_s5, %s2681_s17 }
 0x5cd   : > { %2807 = dma.vmem_to_hbm [thread:$0]  (%p3446_p12), %s4460_s29, 4096, %s4453_s16, %s2478_s14, %s3323_s6, %s3323_s6, %s3289_s11  }
 0x5ce   : > { %2346 = vst.msk [vmem:[%s4471_s24] sm:$0x3] %vm2344_vm6, %v2340_v44  ;;  %s2483_s13 = scalar_lea.sflag [#allocation9], %s3494_s23  ;;  %s3186_s28 = scalar_lea.vmem %s4512_s26, 32 }
 0x5cf   : > { %p3187_p10 = scmp.ne.s32.totalorder %s4512_s26, %s3186_s28  ;;  %s3324_s11 = smov [#allocation8]  }
 0x5d0   : > { %s3190_s22 = sshll.u32 %s3324_s11, 4  ;;  %s3191_s22 = int_to_ptr.vmem [resolvable:$false] %s3190_s22 }
 0x5d1   : > { %p3188_p13 = pnand %p3187_p10, %p3446_p12  ;;  %s3192_s29 = scalar_lea.vmem %s3191_s22, 64 }
 0x5d2   : > { %p3193_p7 = scmp.lt.s32.totalorder %s4512_s26, %s3191_s22  ;;  %p3194_p9 = scmp.lt.s32.totalorder %s3192_s29, %s3186_s28 }
 0x5d3   : > { %p3189_p3 = pneg %p3188_p13 }
 0x5d4   : > { %p3195_p2 = por %p3194_p9, %p3193_p7 }
 0x5d6   : > { %p3196_p0 = pnand %p3195_p2, %p3189_p3 }
 0x5d8   : > { %3199 = shalt.err (!%p3196_p0)
}
 0x5d9   : > { %s3200_s23 = scalar_lea.hbm %s4508_s27, 32  ;;  %s3204_s24 = scalar_lea.hbm %s4560_s5, 64 }
 0x5da   : > { %p3201_p5 = scmp.ne.s32.totalorder %s4508_s27, %s3200_s23  ;;  %p3205_p4 = scmp.lt.u32.totalorder %s4508_s27, %s4560_s5 }
 0x5db   : > { %p3206_p6 = scmp.lt.u32.totalorder %s3204_s24, %s3200_s23  ;;  %p3208_p10 = scmp.lt.u32.totalorder %s3200_s23, %s4508_s27 }
 0x5dc   : > { %p3202_p11 = pnand %p3201_p5, %p3446_p12 }
 0x5dd   : > { %p3207_p8 = por %p3206_p6, %p3205_p4 }
 0x5de   : > { %p3203_p1 = pneg %p3202_p11 }
 0x5df   : > { %p3209_p13 = por %p3208_p10, %p3207_p8 }
 0x5e1   : > { %p3210_p3 = pnand %p3209_p13, %p3203_p1 }
 0x5e3   : > { %3213 = shalt.err (!%p3210_p3)
}
 0x5e4   : > { %2808 = dma.vmem_to_hbm [thread:$0]  (%p3446_p12), %s4512_s26, 32, %s4508_s27, %s2483_s13  }
 0x5e5 PF: > { %s2525_s15 = sand.u32 1, %s3248_s18   ;;  %p4590_p7 = scmp.ne.s32.totalorder %s4573_s25, 0 }
 0x5e6   : > { %p4591_p9 = scmp.ge.s32.totalorder %s3260_s21, 2  ;;  %s2526_s6 = scalar_lea.sflag [#allocation4], %s2525_s15 }
 0x5e8   : > { %p2820_p2 = pnand %p4591_p9, %p4590_p7 }
 0x5ea   : > { %3239 = dma.done.wait (!%p2820_p2), %s2526_s6, 4096  }
 0x5eb   : > { %3241 = vsyncadd (!%p2820_p2), %s2526_s6, 4294963200  ;;  %s2535_s10 = scalar_lea.sflag [#allocation9], %s2525_s15 }
 0x5ec   : > { %3243 = dma.done.wait (!%p2820_p2), %s2535_s10, 32  }
 0x5ed   : > { %3245 = vsyncadd (!%p2820_p2), %s2535_s10, 4294967264  ;;  %p23_p12 = scmp.ge.s32.totalorder %s3411_s30, 4   ;;  %s4592_s18 = smov %s3252_s19 }
 0x5ee   : > { %s4593_s19 = smov %s3256_s20  ;;  %s4594_s20 = smov %s3442_s8 }
 0x5ef   : > { %s4595_s21 = smov %s3411_s30  ;;  %25 = sbr.rel (!%p23_p12) target bundleno = 8 (0x8), region = 150 }
 0x5f6   :  { %2540 = vsyncpa [#allocation3], 1 }
 0x5f7   :  { %2542 = vsyncpa [#allocation3 + $0x1], 1 }
 0x5f8   :  { %2543 = vsyncpa [#allocation6], 1 }
 0x5f9   :  { %2544 = vsyncpa [#allocation4], 1 }
 0x5fa   :  { %2546 = vsyncpa [#allocation4 + $0x1], 1 }
 0x5fb   :  { %2547 = vsyncpa [#allocation9], 1 }
 0x5fc   :  { %2549 = vsyncpa [#allocation9 + $0x1], 1 }

</bundles_post_ra>
